<compile_context>
chip_gen: v7x
topology: tpu7x:2x2x1
jax: 0.10.0
libtpu: 0.0.40
codegen_flags: <defaults>
</compile_context>

<pallas_src>
import jax
import jax.numpy as jnp
from jax import lax
from jax.experimental import pallas as pl
from jax.experimental.pallas import tpu as pltpu

BN_EPS = 1e-5


def _make_conv_stats_kernel(NB, C, Cout, H, W, M_total, eps):
    """Pass 1: im2col + fused 3x3 conv, conv activation -> HBM, global BN stats.

    Per grid step (NB images): build the (H*W, 9C) im2col slab for each image in
    a double-slot VMEM scratch, run one (Cout,9C) x (H*W,9C)^T MXU contraction,
    store the (Cout, H*W) activation, and accumulate global per-channel
    sum / sum-of-squares in the resident (Cout, 2) output block.  The last grid
    step folds them into scale = gamma*rsqrt(var+eps), bias = beta - mean*scale.
    """
    M = H * W
    inv_M = 1.0 / float(M_total)
    dnums = (((1,), (1,)), ((), ()))      # contract lhs 9C with rhs 9C (q @ k^T style)

    def kernel(xp_ref, w_ref, g_ref, b_ref, conv_ref, sb_ref, slab_ref):
        n = pl.program_id(0)

        @pl.when(n == 0)
        def _init():
            sb_ref[...] = jnp.zeros_like(sb_ref)

        w = w_ref[...]                                      # (Cout, 9C), compute dtype
        ssum = jnp.zeros((Cout, 1), jnp.float32)
        ssq = jnp.zeros((Cout, 1), jnp.float32)

        for b in range(NB):                                 # static unroll, NB <= 8
            s = b & 1                                       # double-slot slab: lets the
            xb = xp_ref[b]                                  # slab build of image b+1
            for dy in range(3):                             # overlap the MXU work of b
                for dx in range(3):
                    k = dy * 3 + dx
                    slab_ref[s, :, k * C:(k + 1) * C] = (
                        xb[dy:dy + H, dx:dx + W, :].reshape(M, C))
            y = lax.dot_general(w, slab_ref[s], dnums,      # (Cout, M), K = 9C
                                preferred_element_type=jnp.float32)
            conv_ref[b] = y.astype(conv_ref.dtype)
            ssum = ssum + jnp.sum(y, axis=1, keepdims=True)
            ssq = ssq + jnp.sum(y * y, axis=1, keepdims=True)

        sb_ref[:, 0:1] += ssum                              # resident f32 accumulators
        sb_ref[:, 1:2] += ssq

        @pl.when(n == pl.num_programs(0) - 1)
        def _finalize():
            mean = sb_ref[:, 0:1] * inv_M                   # (Cout, 1)
            # E[x^2] - mean^2 in f32; clamp guards tiny negatives from cancellation.
            var = jnp.maximum(sb_ref[:, 1:2] * inv_M - mean * mean, 0.0)
            scale = g_ref[...] * lax.rsqrt(var + eps)
            sb_ref[:, 0:1] = scale
            sb_ref[:, 1:2] = b_ref[...] - mean * scale

    return kernel


def _make_norm_kernel(Cout):
    """Pass 2: folded-BN FMA on the materialized conv activation (mem-bound)."""

    def kernel(conv_ref, sb_ref, out_ref):
        scale = sb_ref[:, 0:1].reshape(1, Cout, 1)
        bias = sb_ref[:, 1:2].reshape(1, Cout, 1)
        out_ref[...] = conv_ref[...].astype(jnp.float32) * scale + bias

    return kernel


def _pick_nb(N, C, Cout, H, W, itemsize, vmem_budget=12 * 1024 * 1024):
    """Largest NB <= 8 dividing N whose pass-1 working set fits the VMEM budget."""
    M, Hp, Wp = H * W, H + 2, W + 2
    slab_bytes = 2 * M * 9 * C * itemsize                   # double-slot im2col scratch
    per_img = 2 * (C * Hp * Wp + Cout * M) * itemsize       # double-buffered in/out blocks
    nb = max(1, min(8, N, (vmem_budget - slab_bytes) // max(per_img, 1)))
    while N % nb:
        nb -= 1
    return int(nb)


def cell3_forward(x_nchw, w_hwio, gamma, beta, *, compute_dtype=jnp.float32):
    """Cell3 forward (ReLU -> conv3x3 SAME -> training-mode BN) via Pallas.

    x_nchw : (N, C, H, W) float32     PyTorch-layout activation
    w_hwio : (3, 3, C, Cout) float32  conv weight (kh, kw, cin, cout), bias=False
    gamma, beta : (Cout,) float32     BN affine parameters
    compute_dtype: jnp.float32, or jnp.bfloat16 for the fast MXU path on v6e/v7x
                   (BN statistics and the folded scale/bias stay in f32).
    returns (N, Cout, H, W) float32
    """
    N, C, H, W = x_nchw.shape
    kh, kw, cin, Cout = w_hwio.shape
    assert (kh, kw, cin) == (3, 3, C)
    M = H * W
    Hp, Wp = H + 2, W + 2
    cdt = jnp.dtype(compute_dtype)
    NB = _pick_nb(N, C, Cout, H, W, cdt.itemsize)
    grid = (N // NB,)

    # Layout plumbing (single XLA materialization): NCHW -> NHWC with ReLU and
    # the compute-dtype cast fused into the SAME zero-pad.  The kernels never
    # re-apply ReLU or per-tap casts.
    x = jnp.maximum(jnp.transpose(x_nchw, (0, 2, 3, 1)), 0.0).astype(cdt)
    xp = jnp.pad(x, ((0, 0), (1, 1), (1, 1), (0, 0)))        # (N, H+2, W+2, C)

    # Weight pre-packed for the flipped contraction: column k*C + c <-> (dy, dx, c).
    wT = jnp.transpose(w_hwio.reshape(9 * C, Cout)).astype(cdt)   # (Cout, 9C)
    g = gamma.reshape(Cout, 1).astype(jnp.float32)
    b = beta.reshape(Cout, 1).astype(jnp.float32)

    flops_conv = 2 * N * M * 9 * C * Cout
    xp_bytes = N * Hp * Wp * C * cdt.itemsize
    w_bytes = 9 * C * Cout * cdt.itemsize
    conv_bytes = N * Cout * M * cdt.itemsize
    out_bytes = N * Cout * M * 4

    # ---- Pass 1: fused conv (activation -> HBM) + global BN stats -> (scale, bias) ----
    conv, sb = pl.pallas_call(
        _make_conv_stats_kernel(NB, C, Cout, H, W, N * M, BN_EPS),
        grid=grid,
        in_specs=[
            pl.BlockSpec((NB, Hp, Wp, C), lambda n: (n, 0, 0, 0)),
            pl.BlockSpec((Cout, 9 * C), lambda n: (0, 0)),
            pl.BlockSpec((Cout, 1), lambda n: (0, 0)),
            pl.BlockSpec((Cout, 1), lambda n: (0, 0)),
        ],
        out_specs=(
            pl.BlockSpec((NB, Cout, M), lambda n: (n, 0, 0)),
            pl.BlockSpec((Cout, 2), lambda n: (0, 0)),
        ),
        out_shape=(
            jax.ShapeDtypeStruct((N, Cout, M), cdt),
            jax.ShapeDtypeStruct((Cout, 2), jnp.float32),
        ),
        scratch_shapes=[pltpu.VMEM((2, M, 9 * C), cdt)],
        compiler_params=pltpu.CompilerParams(
            dimension_semantics=("arbitrary",)),             # sequential: global BN stats
        cost_estimate=pl.CostEstimate(
            flops=flops_conv + 3 * N * M * Cout,
            transcendentals=Cout,
            bytes_accessed=xp_bytes + w_bytes + conv_bytes + 24 * Cout),
    )(xp, wT, g, b)

    # ---- Pass 2: y = conv * scale + bias, stored lane-dense in NCHW ----
    # NOTE: on v7x, 'parallel' may need CORE_PARALLEL to guarantee a 2-TC split.
    out3 = pl.pallas_call(
        _make_norm_kernel(Cout),
        grid=grid,
        in_specs=[
            pl.BlockSpec((NB, Cout, M), lambda n: (n, 0, 0)),
            pl.BlockSpec((Cout, 2), lambda n: (0, 0)),
        ],
        out_specs=pl.BlockSpec((NB, Cout, M), lambda n: (n, 0, 0)),
        out_shape=jax.ShapeDtypeStruct((N, Cout, M), jnp.float32),
        compiler_params=pltpu.CompilerParams(
            dimension_semantics=("parallel",)),
        cost_estimate=pl.CostEstimate(
            flops=2 * N * M * Cout,
            transcendentals=0,
            bytes_accessed=conv_bytes + out_bytes + 8 * Cout),
    )(conv, sb)

    return out3.reshape(N, Cout, H, W)                       # metadata-only reshape


def cell3_reference(x_nchw, w_hwio, gamma, beta):
    """Pure-JAX reference (ReLU -> conv3x3 SAME -> training-mode BN)."""
    x = jnp.transpose(x_nchw, (0, 2, 3, 1))
    x = jnp.maximum(x, 0.0)
    conv = lax.conv_general_dilated(
        x, w_hwio, window_strides=(1, 1), padding="SAME",
        dimension_numbers=("NHWC", "HWIO", "NHWC"))
    mean = jnp.mean(conv, axis=(0, 1, 2), keepdims=True)
    var = jnp.mean((conv - mean) ** 2, axis=(0, 1, 2), keepdims=True)
    out = gamma.reshape(1, 1, 1, -1) * (conv - mean) * lax.rsqrt(var + BN_EPS) \
        + beta.reshape(1, 1, 1, -1)
    return jnp.transpose(out, (0, 3, 1, 2))


if __name__ == "__main__":
    key = jax.random.PRNGKey(0)
    kx, kw = jax.random.split(key)

    N, C, H, W = 2, 4, 16, 16
    x = jax.random.normal(kx, (N, C, H, W), dtype=jnp.float32)

    # Deterministic parameter init (Conv2d bias=False; BN gamma=1, beta=0).
    w = 0.1 * jax.random.normal(kw, (3, 3, C, C), dtype=jnp.float32)   # (kh, kw, cin, cout)
    gamma = jnp.ones((C,), dtype=jnp.float32)
    beta = jnp.zeros((C,), dtype=jnp.float32)

    ref = jax.block_until_ready(cell3_reference(x, w, gamma, beta))

    # f32 path: exact MXU operands, tight tolerance vs the f32 reference.
    out = jax.block_until_ready(cell3_forward(x, w, gamma, beta))
    assert out.shape == (N, C, H, W)
    err = float(jnp.max(jnp.abs(out - ref)))
    assert jnp.allclose(out, ref, atol=1e-4, rtol=1e-4), err

    # bf16 MXU path (recommended on v6e/v7x): looser tolerance vs the f32 reference.
    out_bf16 = jax.block_until_ready(
        cell3_forward(x, w, gamma, beta, compute_dtype=jnp.bfloat16))
    assert out_bf16.shape == (N, C, H, W)
    err_bf16 = float(jnp.max(jnp.abs(out_bf16 - ref)))
    assert jnp.allclose(out_bf16, ref, atol=1e-1, rtol=1e-1), err_bf16

    print("KERNEL_OK")
</pallas_src>

<mosaic_0001>
module attributes {stable_mosaic.version = 11 : i64} {
  func.func @kernel(%arg0: i32, %arg1: memref<2x18x18x4xf32, #tpu.memory_space<vmem>>, %arg2: memref<4x36xf32, #tpu.memory_space<vmem>>, %arg3: memref<4x1xf32, #tpu.memory_space<vmem>>, %arg4: memref<4x1xf32, #tpu.memory_space<vmem>>, %arg5: memref<2x4x256xf32, #tpu.memory_space<vmem>>, %arg6: memref<4x2xf32, #tpu.memory_space<vmem>>, %arg7: memref<2x256x36xf32, #tpu.memory_space<vmem>>) attributes {dimension_semantics = [#tpu.dimension_semantics<arbitrary>], iteration_bounds = array<i64: 1>, scalar_prefetch = 0 : i64, scratch_operands = 1 : i64, tpu.core_type = #tpu.core_type<tc>, window_params = [{transform_indices = @transform_0, window_bounds = array<i64: 2, 18, 18, 4>}, {pipeline_mode = #tpu.pipeline_mode<synchronous>, transform_indices = @transform_1, window_bounds = array<i64: 4, 36>}, {pipeline_mode = #tpu.pipeline_mode<synchronous>, transform_indices = @transform_2, window_bounds = array<i64: 4, 1>}, {pipeline_mode = #tpu.pipeline_mode<synchronous>, transform_indices = @transform_3, window_bounds = array<i64: 4, 1>}, {transform_indices = @transform_4, window_bounds = array<i64: 2, 4, 256>}, {pipeline_mode = #tpu.pipeline_mode<synchronous>, transform_indices = @transform_5, window_bounds = array<i64: 4, 2>}]} {
    %c0_i32 = arith.constant 0 : i32
    %0 = arith.cmpi eq, %arg0, %c0_i32 : i32
    %1 = arith.extui %0 : i1 to i32
    %c0_i32_0 = arith.constant 0 : i32
    %2 = arith.cmpi ne, %1, %c0_i32_0 : i32
    scf.if %2 {
      %cst_84 = arith.constant 0.000000e+00 : f32
      %135 = vector.broadcast %cst_84 : f32 to vector<4x2xf32>
      %c0_85 = arith.constant 0 : index
      %c0_86 = arith.constant 0 : index
      %136 = vector.load %arg6[%c0_85, %c0_86] : memref<4x2xf32, #tpu.memory_space<vmem>>, vector<4x2xf32>
      tpu.vector_store %arg6[%c0_85, %c0_86], %135 {strides = array<i32>} : memref<4x2xf32, #tpu.memory_space<vmem>>, vector<4x2xf32>,
    } else {
    }
    %c0 = arith.constant 0 : index
    %c0_1 = arith.constant 0 : index
    %3 = vector.load %arg2[%c0, %c0_1] : memref<4x36xf32, #tpu.memory_space<vmem>>, vector<4x36xf32>
    %cst = arith.constant 0.000000e+00 : f32
    %4 = vector.broadcast %cst : f32 to vector<4x1xf32>
    %cst_2 = arith.constant 0.000000e+00 : f32
    %5 = vector.broadcast %cst_2 : f32 to vector<4x1xf32>
    %c0_3 = arith.constant 0 : index
    %c0_4 = arith.constant 0 : index
    %c0_5 = arith.constant 0 : index
    %c0_6 = arith.constant 0 : index
    %6 = vector.load %arg1[%c0_3, %c0_4, %c0_5, %c0_6] : memref<2x18x18x4xf32, #tpu.memory_space<vmem>>, vector<1x18x18x4xf32>
    %7 = vector.shape_cast %6 : vector<1x18x18x4xf32> to vector<18x18x4xf32>
    %8 = vector.extract_strided_slice %7 {offsets = [0, 0, 0], sizes = [16, 16, 4], strides = [1, 1, 1]} : vector<18x18x4xf32> to vector<16x16x4xf32>
    %9 = vector.shape_cast %8 : vector<16x16x4xf32> to vector<256x4xf32>
    %c0_7 = arith.constant 0 : index
    %c0_8 = arith.constant 0 : index
    %c0_9 = arith.constant 0 : index
    %10 = vector.load %arg7[%c0_7, %c0_8, %c0_9] : memref<2x256x36xf32, #tpu.memory_space<vmem>>, vector<1x256x4xf32>
    %11 = vector.shape_cast %10 : vector<1x256x4xf32> to vector<256x4xf32>
    %12 = vector.shape_cast %9 : vector<256x4xf32> to vector<1x256x4xf32>
    tpu.vector_store %arg7[%c0_7, %c0_8, %c0_9], %12 {strides = array<i32>} : memref<2x256x36xf32, #tpu.memory_space<vmem>>, vector<1x256x4xf32>,
    %13 = vector.extract_strided_slice %7 {offsets = [0, 1, 0], sizes = [16, 16, 4], strides = [1, 1, 1]} : vector<18x18x4xf32> to vector<16x16x4xf32>
    %14 = vector.shape_cast %13 : vector<16x16x4xf32> to vector<256x4xf32>
    %c0_10 = arith.constant 0 : index
    %c0_11 = arith.constant 0 : index
    %c4 = arith.constant 4 : index
    %15 = vector.load %arg7[%c0_10, %c0_11, %c4] : memref<2x256x36xf32, #tpu.memory_space<vmem>>, vector<1x256x4xf32>
    %16 = vector.shape_cast %15 : vector<1x256x4xf32> to vector<256x4xf32>
    %17 = vector.shape_cast %14 : vector<256x4xf32> to vector<1x256x4xf32>
    tpu.vector_store %arg7[%c0_10, %c0_11, %c4], %17 {strides = array<i32>} : memref<2x256x36xf32, #tpu.memory_space<vmem>>, vector<1x256x4xf32>,
    %18 = vector.extract_strided_slice %7 {offsets = [0, 2, 0], sizes = [16, 16, 4], strides = [1, 1, 1]} : vector<18x18x4xf32> to vector<16x16x4xf32>
    %19 = vector.shape_cast %18 : vector<16x16x4xf32> to vector<256x4xf32>
    %c0_12 = arith.constant 0 : index
    %c0_13 = arith.constant 0 : index
    %c8 = arith.constant 8 : index
    %20 = vector.load %arg7[%c0_12, %c0_13, %c8] : memref<2x256x36xf32, #tpu.memory_space<vmem>>, vector<1x256x4xf32>
    %21 = vector.shape_cast %20 : vector<1x256x4xf32> to vector<256x4xf32>
    %22 = vector.shape_cast %19 : vector<256x4xf32> to vector<1x256x4xf32>
    tpu.vector_store %arg7[%c0_12, %c0_13, %c8], %22 {strides = array<i32>} : memref<2x256x36xf32, #tpu.memory_space<vmem>>, vector<1x256x4xf32>,
    %23 = vector.extract_strided_slice %7 {offsets = [1, 0, 0], sizes = [16, 16, 4], strides = [1, 1, 1]} : vector<18x18x4xf32> to vector<16x16x4xf32>
    %24 = vector.shape_cast %23 : vector<16x16x4xf32> to vector<256x4xf32>
    %c0_14 = arith.constant 0 : index
    %c0_15 = arith.constant 0 : index
    %c12 = arith.constant 12 : index
    %25 = vector.load %arg7[%c0_14, %c0_15, %c12] : memref<2x256x36xf32, #tpu.memory_space<vmem>>, vector<1x256x4xf32>
    %26 = vector.shape_cast %25 : vector<1x256x4xf32> to vector<256x4xf32>
    %27 = vector.shape_cast %24 : vector<256x4xf32> to vector<1x256x4xf32>
    tpu.vector_store %arg7[%c0_14, %c0_15, %c12], %27 {strides = array<i32>} : memref<2x256x36xf32, #tpu.memory_space<vmem>>, vector<1x256x4xf32>,
    %28 = vector.extract_strided_slice %7 {offsets = [1, 1, 0], sizes = [16, 16, 4], strides = [1, 1, 1]} : vector<18x18x4xf32> to vector<16x16x4xf32>
    %29 = vector.shape_cast %28 : vector<16x16x4xf32> to vector<256x4xf32>
    %c0_16 = arith.constant 0 : index
    %c0_17 = arith.constant 0 : index
    %c16 = arith.constant 16 : index
    %30 = vector.load %arg7[%c0_16, %c0_17, %c16] : memref<2x256x36xf32, #tpu.memory_space<vmem>>, vector<1x256x4xf32>
    %31 = vector.shape_cast %30 : vector<1x256x4xf32> to vector<256x4xf32>
    %32 = vector.shape_cast %29 : vector<256x4xf32> to vector<1x256x4xf32>
    tpu.vector_store %arg7[%c0_16, %c0_17, %c16], %32 {strides = array<i32>} : memref<2x256x36xf32, #tpu.memory_space<vmem>>, vector<1x256x4xf32>,
    %33 = vector.extract_strided_slice %7 {offsets = [1, 2, 0], sizes = [16, 16, 4], strides = [1, 1, 1]} : vector<18x18x4xf32> to vector<16x16x4xf32>
    %34 = vector.shape_cast %33 : vector<16x16x4xf32> to vector<256x4xf32>
    %c0_18 = arith.constant 0 : index
    %c0_19 = arith.constant 0 : index
    %c20 = arith.constant 20 : index
    %35 = vector.load %arg7[%c0_18, %c0_19, %c20] : memref<2x256x36xf32, #tpu.memory_space<vmem>>, vector<1x256x4xf32>
    %36 = vector.shape_cast %35 : vector<1x256x4xf32> to vector<256x4xf32>
    %37 = vector.shape_cast %34 : vector<256x4xf32> to vector<1x256x4xf32>
    tpu.vector_store %arg7[%c0_18, %c0_19, %c20], %37 {strides = array<i32>} : memref<2x256x36xf32, #tpu.memory_space<vmem>>, vector<1x256x4xf32>,
    %38 = vector.extract_strided_slice %7 {offsets = [2, 0, 0], sizes = [16, 16, 4], strides = [1, 1, 1]} : vector<18x18x4xf32> to vector<16x16x4xf32>
    %39 = vector.shape_cast %38 : vector<16x16x4xf32> to vector<256x4xf32>
    %c0_20 = arith.constant 0 : index
    %c0_21 = arith.constant 0 : index
    %c24 = arith.constant 24 : index
    %40 = vector.load %arg7[%c0_20, %c0_21, %c24] : memref<2x256x36xf32, #tpu.memory_space<vmem>>, vector<1x256x4xf32>
    %41 = vector.shape_cast %40 : vector<1x256x4xf32> to vector<256x4xf32>
    %42 = vector.shape_cast %39 : vector<256x4xf32> to vector<1x256x4xf32>
    tpu.vector_store %arg7[%c0_20, %c0_21, %c24], %42 {strides = array<i32>} : memref<2x256x36xf32, #tpu.memory_space<vmem>>, vector<1x256x4xf32>,
    %43 = vector.extract_strided_slice %7 {offsets = [2, 1, 0], sizes = [16, 16, 4], strides = [1, 1, 1]} : vector<18x18x4xf32> to vector<16x16x4xf32>
    %44 = vector.shape_cast %43 : vector<16x16x4xf32> to vector<256x4xf32>
    %c0_22 = arith.constant 0 : index
    %c0_23 = arith.constant 0 : index
    %c28 = arith.constant 28 : index
    %45 = vector.load %arg7[%c0_22, %c0_23, %c28] : memref<2x256x36xf32, #tpu.memory_space<vmem>>, vector<1x256x4xf32>
    %46 = vector.shape_cast %45 : vector<1x256x4xf32> to vector<256x4xf32>
    %47 = vector.shape_cast %44 : vector<256x4xf32> to vector<1x256x4xf32>
    tpu.vector_store %arg7[%c0_22, %c0_23, %c28], %47 {strides = array<i32>} : memref<2x256x36xf32, #tpu.memory_space<vmem>>, vector<1x256x4xf32>,
    %48 = vector.extract_strided_slice %7 {offsets = [2, 2, 0], sizes = [16, 16, 4], strides = [1, 1, 1]} : vector<18x18x4xf32> to vector<16x16x4xf32>
    %49 = vector.shape_cast %48 : vector<16x16x4xf32> to vector<256x4xf32>
    %c0_24 = arith.constant 0 : index
    %c0_25 = arith.constant 0 : index
    %c32 = arith.constant 32 : index
    %50 = vector.load %arg7[%c0_24, %c0_25, %c32] : memref<2x256x36xf32, #tpu.memory_space<vmem>>, vector<1x256x4xf32>
    %51 = vector.shape_cast %50 : vector<1x256x4xf32> to vector<256x4xf32>
    %52 = vector.shape_cast %49 : vector<256x4xf32> to vector<1x256x4xf32>
    tpu.vector_store %arg7[%c0_24, %c0_25, %c32], %52 {strides = array<i32>} : memref<2x256x36xf32, #tpu.memory_space<vmem>>, vector<1x256x4xf32>,
    %c0_26 = arith.constant 0 : index
    %c0_27 = arith.constant 0 : index
    %c0_28 = arith.constant 0 : index
    %53 = vector.load %arg7[%c0_26, %c0_27, %c0_28] : memref<2x256x36xf32, #tpu.memory_space<vmem>>, vector<1x256x36xf32>
    %54 = vector.shape_cast %53 : vector<1x256x36xf32> to vector<256x36xf32>
    %cst_29 = arith.constant dense<0.000000e+00> : vector<4x256xf32>
    %55 = tpu.matmul %3, %54, %cst_29 {dimension_numbers = #tpu.dot_dimension_numbers<[1], [1], [0], [0], [0, 0, 1, 0], [], []>} : vector<4x36xf32>, vector<256x36xf32>, vector<4x256xf32> -> vector<4x256xf32>
    %c0_30 = arith.constant 0 : index
    %c0_31 = arith.constant 0 : index
    %c0_32 = arith.constant 0 : index
    %56 = vector.load %arg5[%c0_30, %c0_31, %c0_32] : memref<2x4x256xf32, #tpu.memory_space<vmem>>, vector<1x4x256xf32>
    %57 = vector.shape_cast %56 : vector<1x4x256xf32> to vector<4x256xf32>
    %58 = vector.shape_cast %55 : vector<4x256xf32> to vector<1x4x256xf32>
    tpu.vector_store %arg5[%c0_30, %c0_31, %c0_32], %58 {strides = array<i32>} : memref<2x4x256xf32, #tpu.memory_space<vmem>>, vector<1x4x256xf32>,
    %cst_33 = arith.constant dense<0.000000e+00> : vector<4xf32>
    %59 = vector.multi_reduction <add>, %55, %cst_33 [1] : vector<4x256xf32> to vector<4xf32>
    %60 = vector.shape_cast %59 : vector<4xf32> to vector<4x1xf32>
    %61 = arith.addf %4, %60 : vector<4x1xf32>
    %62 = arith.mulf %55, %55 : vector<4x256xf32>
    %cst_34 = arith.constant dense<0.000000e+00> : vector<4xf32>
    %63 = vector.multi_reduction <add>, %62, %cst_34 [1] : vector<4x256xf32> to vector<4xf32>
    %64 = vector.shape_cast %63 : vector<4xf32> to vector<4x1xf32>
    %65 = arith.addf %5, %64 : vector<4x1xf32>
    %c1 = arith.constant 1 : index
    %c0_35 = arith.constant 0 : index
    %c0_36 = arith.constant 0 : index
    %c0_37 = arith.constant 0 : index
    %66 = vector.load %arg1[%c1, %c0_35, %c0_36, %c0_37] : memref<2x18x18x4xf32, #tpu.memory_space<vmem>>, vector<1x18x18x4xf32>
    %67 = vector.shape_cast %66 : vector<1x18x18x4xf32> to vector<18x18x4xf32>
    %68 = vector.extract_strided_slice %67 {offsets = [0, 0, 0], sizes = [16, 16, 4], strides = [1, 1, 1]} : vector<18x18x4xf32> to vector<16x16x4xf32>
    %69 = vector.shape_cast %68 : vector<16x16x4xf32> to vector<256x4xf32>
    %c1_38 = arith.constant 1 : index
    %c0_39 = arith.constant 0 : index
    %c0_40 = arith.constant 0 : index
    %70 = vector.load %arg7[%c1_38, %c0_39, %c0_40] : memref<2x256x36xf32, #tpu.memory_space<vmem>>, vector<1x256x4xf32>
    %71 = vector.shape_cast %70 : vector<1x256x4xf32> to vector<256x4xf32>
    %72 = vector.shape_cast %69 : vector<256x4xf32> to vector<1x256x4xf32>
    tpu.vector_store %arg7[%c1_38, %c0_39, %c0_40], %72 {strides = array<i32>} : memref<2x256x36xf32, #tpu.memory_space<vmem>>, vector<1x256x4xf32>,
    %73 = vector.extract_strided_slice %67 {offsets = [0, 1, 0], sizes = [16, 16, 4], strides = [1, 1, 1]} : vector<18x18x4xf32> to vector<16x16x4xf32>
    %74 = vector.shape_cast %73 : vector<16x16x4xf32> to vector<256x4xf32>
    %c1_41 = arith.constant 1 : index
    %c0_42 = arith.constant 0 : index
    %c4_43 = arith.constant 4 : index
    %75 = vector.load %arg7[%c1_41, %c0_42, %c4_43] : memref<2x256x36xf32, #tpu.memory_space<vmem>>, vector<1x256x4xf32>
    %76 = vector.shape_cast %75 : vector<1x256x4xf32> to vector<256x4xf32>
    %77 = vector.shape_cast %74 : vector<256x4xf32> to vector<1x256x4xf32>
    tpu.vector_store %arg7[%c1_41, %c0_42, %c4_43], %77 {strides = array<i32>} : memref<2x256x36xf32, #tpu.memory_space<vmem>>, vector<1x256x4xf32>,
    %78 = vector.extract_strided_slice %67 {offsets = [0, 2, 0], sizes = [16, 16, 4], strides = [1, 1, 1]} : vector<18x18x4xf32> to vector<16x16x4xf32>
    %79 = vector.shape_cast %78 : vector<16x16x4xf32> to vector<256x4xf32>
    %c1_44 = arith.constant 1 : index
    %c0_45 = arith.constant 0 : index
    %c8_46 = arith.constant 8 : index
    %80 = vector.load %arg7[%c1_44, %c0_45, %c8_46] : memref<2x256x36xf32, #tpu.memory_space<vmem>>, vector<1x256x4xf32>
    %81 = vector.shape_cast %80 : vector<1x256x4xf32> to vector<256x4xf32>
    %82 = vector.shape_cast %79 : vector<256x4xf32> to vector<1x256x4xf32>
    tpu.vector_store %arg7[%c1_44, %c0_45, %c8_46], %82 {strides = array<i32>} : memref<2x256x36xf32, #tpu.memory_space<vmem>>, vector<1x256x4xf32>,
    %83 = vector.extract_strided_slice %67 {offsets = [1, 0, 0], sizes = [16, 16, 4], strides = [1, 1, 1]} : vector<18x18x4xf32> to vector<16x16x4xf32>
    %84 = vector.shape_cast %83 : vector<16x16x4xf32> to vector<256x4xf32>
    %c1_47 = arith.constant 1 : index
    %c0_48 = arith.constant 0 : index
    %c12_49 = arith.constant 12 : index
    %85 = vector.load %arg7[%c1_47, %c0_48, %c12_49] : memref<2x256x36xf32, #tpu.memory_space<vmem>>, vector<1x256x4xf32>
    %86 = vector.shape_cast %85 : vector<1x256x4xf32> to vector<256x4xf32>
    %87 = vector.shape_cast %84 : vector<256x4xf32> to vector<1x256x4xf32>
    tpu.vector_store %arg7[%c1_47, %c0_48, %c12_49], %87 {strides = array<i32>} : memref<2x256x36xf32, #tpu.memory_space<vmem>>, vector<1x256x4xf32>,
    %88 = vector.extract_strided_slice %67 {offsets = [1, 1, 0], sizes = [16, 16, 4], strides = [1, 1, 1]} : vector<18x18x4xf32> to vector<16x16x4xf32>
    %89 = vector.shape_cast %88 : vector<16x16x4xf32> to vector<256x4xf32>
    %c1_50 = arith.constant 1 : index
    %c0_51 = arith.constant 0 : index
    %c16_52 = arith.constant 16 : index
    %90 = vector.load %arg7[%c1_50, %c0_51, %c16_52] : memref<2x256x36xf32, #tpu.memory_space<vmem>>, vector<1x256x4xf32>
    %91 = vector.shape_cast %90 : vector<1x256x4xf32> to vector<256x4xf32>
    %92 = vector.shape_cast %89 : vector<256x4xf32> to vector<1x256x4xf32>
    tpu.vector_store %arg7[%c1_50, %c0_51, %c16_52], %92 {strides = array<i32>} : memref<2x256x36xf32, #tpu.memory_space<vmem>>, vector<1x256x4xf32>,
    %93 = vector.extract_strided_slice %67 {offsets = [1, 2, 0], sizes = [16, 16, 4], strides = [1, 1, 1]} : vector<18x18x4xf32> to vector<16x16x4xf32>
    %94 = vector.shape_cast %93 : vector<16x16x4xf32> to vector<256x4xf32>
    %c1_53 = arith.constant 1 : index
    %c0_54 = arith.constant 0 : index
    %c20_55 = arith.constant 20 : index
    %95 = vector.load %arg7[%c1_53, %c0_54, %c20_55] : memref<2x256x36xf32, #tpu.memory_space<vmem>>, vector<1x256x4xf32>
    %96 = vector.shape_cast %95 : vector<1x256x4xf32> to vector<256x4xf32>
    %97 = vector.shape_cast %94 : vector<256x4xf32> to vector<1x256x4xf32>
    tpu.vector_store %arg7[%c1_53, %c0_54, %c20_55], %97 {strides = array<i32>} : memref<2x256x36xf32, #tpu.memory_space<vmem>>, vector<1x256x4xf32>,
    %98 = vector.extract_strided_slice %67 {offsets = [2, 0, 0], sizes = [16, 16, 4], strides = [1, 1, 1]} : vector<18x18x4xf32> to vector<16x16x4xf32>
    %99 = vector.shape_cast %98 : vector<16x16x4xf32> to vector<256x4xf32>
    %c1_56 = arith.constant 1 : index
    %c0_57 = arith.constant 0 : index
    %c24_58 = arith.constant 24 : index
    %100 = vector.load %arg7[%c1_56, %c0_57, %c24_58] : memref<2x256x36xf32, #tpu.memory_space<vmem>>, vector<1x256x4xf32>
    %101 = vector.shape_cast %100 : vector<1x256x4xf32> to vector<256x4xf32>
    %102 = vector.shape_cast %99 : vector<256x4xf32> to vector<1x256x4xf32>
    tpu.vector_store %arg7[%c1_56, %c0_57, %c24_58], %102 {strides = array<i32>} : memref<2x256x36xf32, #tpu.memory_space<vmem>>, vector<1x256x4xf32>,
    %103 = vector.extract_strided_slice %67 {offsets = [2, 1, 0], sizes = [16, 16, 4], strides = [1, 1, 1]} : vector<18x18x4xf32> to vector<16x16x4xf32>
    %104 = vector.shape_cast %103 : vector<16x16x4xf32> to vector<256x4xf32>
    %c1_59 = arith.constant 1 : index
    %c0_60 = arith.constant 0 : index
    %c28_61 = arith.constant 28 : index
    %105 = vector.load %arg7[%c1_59, %c0_60, %c28_61] : memref<2x256x36xf32, #tpu.memory_space<vmem>>, vector<1x256x4xf32>
    %106 = vector.shape_cast %105 : vector<1x256x4xf32> to vector<256x4xf32>
    %107 = vector.shape_cast %104 : vector<256x4xf32> to vector<1x256x4xf32>
    tpu.vector_store %arg7[%c1_59, %c0_60, %c28_61], %107 {strides = array<i32>} : memref<2x256x36xf32, #tpu.memory_space<vmem>>, vector<1x256x4xf32>,
    %108 = vector.extract_strided_slice %67 {offsets = [2, 2, 0], sizes = [16, 16, 4], strides = [1, 1, 1]} : vector<18x18x4xf32> to vector<16x16x4xf32>
    %109 = vector.shape_cast %108 : vector<16x16x4xf32> to vector<256x4xf32>
    %c1_62 = arith.constant 1 : index
    %c0_63 = arith.constant 0 : index
    %c32_64 = arith.constant 32 : index
    %110 = vector.load %arg7[%c1_62, %c0_63, %c32_64] : memref<2x256x36xf32, #tpu.memory_space<vmem>>, vector<1x256x4xf32>
    %111 = vector.shape_cast %110 : vector<1x256x4xf32> to vector<256x4xf32>
    %112 = vector.shape_cast %109 : vector<256x4xf32> to vector<1x256x4xf32>
    tpu.vector_store %arg7[%c1_62, %c0_63, %c32_64], %112 {strides = array<i32>} : memref<2x256x36xf32, #tpu.memory_space<vmem>>, vector<1x256x4xf32>,
    %c1_65 = arith.constant 1 : index
    %c0_66 = arith.constant 0 : index
    %c0_67 = arith.constant 0 : index
    %113 = vector.load %arg7[%c1_65, %c0_66, %c0_67] : memref<2x256x36xf32, #tpu.memory_space<vmem>>, vector<1x256x36xf32>
    %114 = vector.shape_cast %113 : vector<1x256x36xf32> to vector<256x36xf32>
    %cst_68 = arith.constant dense<0.000000e+00> : vector<4x256xf32>
    %115 = tpu.matmul %3, %114, %cst_68 {dimension_numbers = #tpu.dot_dimension_numbers<[1], [1], [0], [0], [0, 0, 1, 0], [], []>} : vector<4x36xf32>, vector<256x36xf32>, vector<4x256xf32> -> vector<4x256xf32>
    %c1_69 = arith.constant 1 : index
    %c0_70 = arith.constant 0 : index
    %c0_71 = arith.constant 0 : index
    %116 = vector.load %arg5[%c1_69, %c0_70, %c0_71] : memref<2x4x256xf32, #tpu.memory_space<vmem>>, vector<1x4x256xf32>
    %117 = vector.shape_cast %116 : vector<1x4x256xf32> to vector<4x256xf32>
    %118 = vector.shape_cast %115 : vector<4x256xf32> to vector<1x4x256xf32>
    tpu.vector_store %arg5[%c1_69, %c0_70, %c0_71], %118 {strides = array<i32>} : memref<2x4x256xf32, #tpu.memory_space<vmem>>, vector<1x4x256xf32>,
    %cst_72 = arith.constant dense<0.000000e+00> : vector<4xf32>
    %119 = vector.multi_reduction <add>, %115, %cst_72 [1] : vector<4x256xf32> to vector<4xf32>
    %120 = vector.shape_cast %119 : vector<4xf32> to vector<4x1xf32>
    %121 = arith.addf %61, %120 : vector<4x1xf32>
    %122 = arith.mulf %115, %115 : vector<4x256xf32>
    %cst_73 = arith.constant dense<0.000000e+00> : vector<4xf32>
    %123 = vector.multi_reduction <add>, %122, %cst_73 [1] : vector<4x256xf32> to vector<4xf32>
    %124 = vector.shape_cast %123 : vector<4xf32> to vector<4x1xf32>
    %125 = arith.addf %65, %124 : vector<4x1xf32>
    %c0_74 = arith.constant 0 : index
    %c0_75 = arith.constant 0 : index
    %126 = vector.load %arg6[%c0_74, %c0_75] : memref<4x2xf32, #tpu.memory_space<vmem>>, vector<4x1xf32>
    %127 = arith.addf %126, %121 : vector<4x1xf32>
    %c0_76 = arith.constant 0 : index
    %c0_77 = arith.constant 0 : index
    %128 = vector.load %arg6[%c0_76, %c0_77] : memref<4x2xf32, #tpu.memory_space<vmem>>, vector<4x1xf32>
    tpu.vector_store %arg6[%c0_76, %c0_77], %127 {strides = array<i32>} : memref<4x2xf32, #tpu.memory_space<vmem>>, vector<4x1xf32>,
    %c0_78 = arith.constant 0 : index
    %c1_79 = arith.constant 1 : index
    %129 = vector.load %arg6[%c0_78, %c1_79] : memref<4x2xf32, #tpu.memory_space<vmem>>, vector<4x1xf32>
    %130 = arith.addf %129, %125 : vector<4x1xf32>
    %c0_80 = arith.constant 0 : index
    %c1_81 = arith.constant 1 : index
    %131 = vector.load %arg6[%c0_80, %c1_81] : memref<4x2xf32, #tpu.memory_space<vmem>>, vector<4x1xf32>
    tpu.vector_store %arg6[%c0_80, %c1_81], %130 {strides = array<i32>} : memref<4x2xf32, #tpu.memory_space<vmem>>, vector<4x1xf32>,
    %c0_i32_82 = arith.constant 0 : i32
    %132 = arith.cmpi eq, %arg0, %c0_i32_82 : i32
    %133 = arith.extui %132 : i1 to i32
    %c0_i32_83 = arith.constant 0 : i32
    %134 = arith.cmpi ne, %133, %c0_i32_83 : i32
    scf.if %134 {
      %c0_84 = arith.constant 0 : index
      %c0_85 = arith.constant 0 : index
      %135 = vector.load %arg6[%c0_84, %c0_85] : memref<4x2xf32, #tpu.memory_space<vmem>>, vector<4x1xf32>
      %cst_86 = arith.constant 0.001953125 : f32
      %136 = vector.broadcast %cst_86 : f32 to vector<4x1xf32>
      %137 = arith.mulf %135, %136 : vector<4x1xf32>
      %c0_87 = arith.constant 0 : index
      %c1_88 = arith.constant 1 : index
      %138 = vector.load %arg6[%c0_87, %c1_88] : memref<4x2xf32, #tpu.memory_space<vmem>>, vector<4x1xf32>
      %cst_89 = arith.constant 0.001953125 : f32
      %139 = vector.broadcast %cst_89 : f32 to vector<4x1xf32>
      %140 = arith.mulf %138, %139 : vector<4x1xf32>
      %141 = arith.mulf %137, %137 : vector<4x1xf32>
      %142 = arith.subf %140, %141 : vector<4x1xf32>
      %cst_90 = arith.constant 0.000000e+00 : f32
      %143 = vector.broadcast %cst_90 : f32 to vector<4x1xf32>
      %144 = arith.maximumf %142, %143 : vector<4x1xf32>
      %c0_91 = arith.constant 0 : index
      %c0_92 = arith.constant 0 : index
      %145 = vector.load %arg3[%c0_91, %c0_92] : memref<4x1xf32, #tpu.memory_space<vmem>>, vector<4x1xf32>
      %cst_93 = arith.constant 9.99999974E-6 : f32
      %146 = vector.broadcast %cst_93 : f32 to vector<4x1xf32>
      %147 = arith.addf %144, %146 : vector<4x1xf32>
      %148 = math.rsqrt %147 : vector<4x1xf32>
      %149 = arith.mulf %145, %148 : vector<4x1xf32>
      %c0_94 = arith.constant 0 : index
      %c0_95 = arith.constant 0 : index
      %150 = vector.load %arg6[%c0_94, %c0_95] : memref<4x2xf32, #tpu.memory_space<vmem>>, vector<4x1xf32>
      tpu.vector_store %arg6[%c0_94, %c0_95], %149 {strides = array<i32>} : memref<4x2xf32, #tpu.memory_space<vmem>>, vector<4x1xf32>,
      %c0_96 = arith.constant 0 : index
      %c0_97 = arith.constant 0 : index
      %151 = vector.load %arg4[%c0_96, %c0_97] : memref<4x1xf32, #tpu.memory_space<vmem>>, vector<4x1xf32>
      %152 = arith.mulf %137, %149 : vector<4x1xf32>
      %153 = arith.subf %151, %152 : vector<4x1xf32>
      %c0_98 = arith.constant 0 : index
      %c1_99 = arith.constant 1 : index
      %154 = vector.load %arg6[%c0_98, %c1_99] : memref<4x2xf32, #tpu.memory_space<vmem>>, vector<4x1xf32>
      tpu.vector_store %arg6[%c0_98, %c1_99], %153 {strides = array<i32>} : memref<4x2xf32, #tpu.memory_space<vmem>>, vector<4x1xf32>,
    } else {
    }
    return
  }
  func.func @transform_0(%arg0: i32) -> (i32, i32, i32, i32) {
    %c0_i32 = arith.constant 0 : i32
    %c0_i32_0 = arith.constant 0 : i32
    %c0_i32_1 = arith.constant 0 : i32
    %c0_i32_2 = arith.constant 0 : i32
    return %arg0, %c0_i32, %c0_i32_0, %c0_i32_1 : i32, i32, i32, i32
  }
  func.func @transform_1(%arg0: i32) -> (i32, i32) {
    %c0_i32 = arith.constant 0 : i32
    %c0_i32_0 = arith.constant 0 : i32
    %c0_i32_1 = arith.constant 0 : i32
    return %c0_i32, %c0_i32_0 : i32, i32
  }
  func.func @transform_2(%arg0: i32) -> (i32, i32) {
    %c0_i32 = arith.constant 0 : i32
    %c0_i32_0 = arith.constant 0 : i32
    %c0_i32_1 = arith.constant 0 : i32
    return %c0_i32, %c0_i32_0 : i32, i32
  }
  func.func @transform_3(%arg0: i32) -> (i32, i32) {
    %c0_i32 = arith.constant 0 : i32
    %c0_i32_0 = arith.constant 0 : i32
    %c0_i32_1 = arith.constant 0 : i32
    return %c0_i32, %c0_i32_0 : i32, i32
  }
  func.func @transform_4(%arg0: i32) -> (i32, i32, i32) {
    %c0_i32 = arith.constant 0 : i32
    %c0_i32_0 = arith.constant 0 : i32
    %c0_i32_1 = arith.constant 0 : i32
    return %arg0, %c0_i32, %c0_i32_0 : i32, i32, i32
  }
  func.func @transform_5(%arg0: i32) -> (i32, i32) {
    %c0_i32 = arith.constant 0 : i32
    %c0_i32_0 = arith.constant 0 : i32
    %c0_i32_1 = arith.constant 0 : i32
    return %c0_i32, %c0_i32_0 : i32, i32
  }
}

</mosaic_0001>

<bundles_post_ra>
// kernel: tpu_custom_call.1
= control target key start
LH: loop header
LB: loop body
LE: loop exit
PB: predicated region body
PF: predicated region fallthrough
CT: control target
= control target key end

     0   :  { %vm162_vm0 = vcmask 1046528   ;;  %s3552_s11 = smov 4   ;;  %s6468_s0 = inlined_call_operand.vmem [shape: f32[2,18,18,4], index: 0, kind: input, shape index: {}]   ;;  %s6469_s1 = inlined_call_operand.vmem [shape: f32[4,36], index: 1, kind: input, shape index: {}]   ;;  %s6470_s2 = inlined_call_operand.vmem [shape: f32[4,1], index: 2, kind: input, shape index: {}]   ;;  %s6471_s3 = inlined_call_operand.vmem [shape: f32[4,1], index: 3, kind: input, shape index: {}]   ;;  %s6472_s4 = inlined_call_operand.hbm [shape: f32[2,4,256], index: 4, kind: output, shape index: {0}]   ;;  %s6473_s5 = inlined_call_operand.vmem [shape: f32[4,2], index: 5, kind: output, shape index: {1}]  }
   0x1   :  { %v3598_v0 = vld [vmem:[%s6468_s0 + $0x18] sm:$0xff]  ;;  %v3603_v1 = vld [vmem:[%s6468_s0 + $0x20] sm:$0xff]  ;;  %v3615_v5 = vld [vmem:[%s6468_s0 + $0x8] sm:$0xff] }
   0x2   :  { %v3608_v2 = vld [vmem:[%s6468_s0] sm:$0xff]  ;;  %v168_v3 = vrot.slane %v3598_v0, 1  ;;  %v169_v4 = vrot.slane %v3603_v1, 1  ;;  %v3621_v7 = vld [vmem:[%s6468_s0 + $0x28] sm:$0x3]  ;;  %v164_v8 = vrot.slane %v3615_v5, 1 }
   0x3   :  { %v163_v6 = vrot.slane %v3608_v2, 1  ;;  %v171_v9 = vrot.slane %v3621_v7, 1  ;;  %v3628_v10 = vld [vmem:[%s6468_s0 + $0x10] sm:$0x3]  ;;  %v3633_v11 = vld [vmem:[%s6468_s0 + $0x38] sm:$0xff]  ;;  %v3673_v24 = vld [vmem:[%s6468_s0 + $0x48] sm:$0xff] }
   0x4   :  { %v3636_v12 = vsel %vm162_vm0, %v168_v3, %v169_v4  ;;  %v166_v13 = vrot.slane %v3628_v10, 1  ;;  %v3642_v14 = vld [vmem:[%s6468_s0 + $0x40] sm:$0x3]  ;;  %v3647_v15 = vld [vmem:[%s6468_s0 + $0x30] sm:$0xff]  ;;  %v174_v18 = vrot.slane %v3633_v11, 1  ;;  %v178_v29 = vrot.slane %v3673_v24, 1 }
   0x5   :  { %247 = vrot.lane.b32.xlu1 %v3636_v12, %s3552_s11  ;;  %v165_v16 = vsel %vm162_vm0, %v163_v6, %v164_v8  ;;  %v3654_v17 = vsel %vm162_vm0, %v169_v4, %v171_v9  ;;  %v176_v19 = vrot.slane %v3642_v14, 1  ;;  %v173_v21 = vrot.slane %v3647_v15, 1  ;;  %v3663_v22 = vld [vmem:[%s6468_s0 + $0x50] sm:$0xff]  ;;  %v3668_v23 = vld [vmem:[%s6468_s0 + $0x58] sm:$0x3]  ;;  %v3690_v30 = vld [vmem:[%s6468_s0 + $0x68] sm:$0xff] }
   0x6   :  { %243 = vrot.lane.b32.xlu0 %v165_v16, %s3552_s11  ;;  %v167_v20 = vsel %vm162_vm0, %v164_v8, %v166_v13  ;;  %v179_v26 = vrot.slane %v3663_v22, 1  ;;  %v181_v27 = vrot.slane %v3668_v23, 1  ;;  %v3695_v31 = vld [vmem:[%s6468_s0 + $0x70] sm:$0x3]  ;;  %v3700_v32 = vld [vmem:[%s6468_s0 + $0x60] sm:$0xff]  ;;  %v184_v34 = vrot.slane %v3690_v30, 1 }
   0x7   :  { %v3679_v25 = vsel %vm162_vm0, %v174_v18, %v176_v19  ;;  %v3684_v28 = vsel %vm162_vm0, %v173_v21, %v174_v18  ;;  %v186_v35 = vrot.slane %v3695_v31, 1  ;;  %v183_v37 = vrot.slane %v3700_v32, 1  ;;  %v3718_v38 = vld [vmem:[%s6468_s0 + $0x80] sm:$0xff]  ;;  %v3723_v39 = vld [vmem:[%s6468_s0 + $0x88] sm:$0x3]  ;;  %v3728_v40 = vld [vmem:[%s6468_s0 + $0x78] sm:$0xff] }
   0x8   :  { %v3707_v33 = vsel %vm162_vm0, %v179_v26, %v181_v27  ;;  %v3712_v36 = vsel %vm162_vm0, %v178_v29, %v179_v26  ;;  %v189_v42 = vrot.slane %v3718_v38, 1  ;;  %v191_v43 = vrot.slane %v3723_v39, 1  ;;  %v3746_v46 = vld [vmem:[%s6468_s0 + $0x98] sm:$0xff]  ;;  %v3751_v47 = vld [vmem:[%s6468_s0 + $0xa0] sm:$0x3] }
   0x9   :  { %249 = vrot.lane.b32.xlu1 %v3654_v17, %s3552_s11  ;;  %6553 = vst [vmem:[#allocation6_spill] sm:$0xff] %v3712_v36  ;;  %v3735_v41 = vsel %vm162_vm0, %v184_v34, %v186_v35  ;;  %v3740_v44 = vsel %vm162_vm0, %v183_v37, %v184_v34  ;;  %v188_v45 = vrot.slane %v3728_v40, 1 }
   0xa   :  { %245 = vrot.lane.b32.xlu0 %v167_v20, %s3552_s11  ;;  %6554 = vst [vmem:[#allocation7_spill] sm:$0xff] %v3735_v41  ;;  %6555 = vst [vmem:[#allocation8_spill] sm:$0xff] %v3740_v44 }
   0xd   :  { %253 = vrot.lane.b32.xlu1 %v3679_v25, %s3552_s11 }
   0xe   :  { %251 = vrot.lane.b32.xlu0 %v3684_v28, %s3552_s11 }
  0x11   :  { %257 = vrot.lane.b32.xlu1 %v3707_v33, %s3552_s11 }
  0x12   :  { %255 = vrot.lane.b32.xlu0 %v3712_v36, %s3552_s11 }
  0x13   :  { %11 = vsyncpa [#allocation4], 0  ;;  %v3756_v48 = vld [vmem:[%s6468_s0 + $0x90] sm:$0xff]  ;;  %v3763_v49 = vsel %vm162_vm0, %v189_v42, %v191_v43  ;;  %v194_v50 = vrot.slane %v3746_v46, 1  ;;  %v196_v51 = vrot.slane %v3751_v47, 1  ;;  %v3768_v52 = vsel %vm162_vm0, %v188_v45, %v189_v42  ;;  %v3784_v56 = vld [vmem:[%s6468_s0 + $0xa8] sm:$0xff] }
  0x14   :  { %6556 = vst [vmem:[#allocation9_spill] sm:$0xff] %v3763_v49  ;;  %6557 = vst [vmem:[#allocation10_spill] sm:$0xff] %v3768_v52  ;;  %v193_v53 = vrot.slane %v3756_v48, 1  ;;  %v3774_v54 = vld [vmem:[%s6468_s0 + $0xb0] sm:$0xff]  ;;  %v3779_v55 = vld [vmem:[%s6468_s0 + $0xb8] sm:$0x3] }
  0x15   :  { %261 = vrot.lane.b32.xlu1 %v3735_v41, %s3552_s11  ;;  %v3791_v57 = vsel %vm162_vm0, %v194_v50, %v196_v51  ;;  %v199_v58 = vrot.slane %v3774_v54, 1  ;;  %v201_v59 = vrot.slane %v3779_v55, 1  ;;  %v198_v61 = vrot.slane %v3784_v56, 1  ;;  %v3802_v62 = vld [vmem:[%s6468_s0 + $0xc8] sm:$0xff]  ;;  %v3807_v63 = vld [vmem:[%s6468_s0 + $0xd0] sm:$0x3] }
  0x16   :  { %259 = vrot.lane.b32.xlu0 %v3740_v44, %s3552_s11  ;;  %6558 = vst [vmem:[#allocation11_spill] sm:$0xff] %v3791_v57  ;;  %v3796_v60 = vsel %vm162_vm0, %v193_v53, %v194_v50  ;;  %v3812_v3 = vld [vmem:[%s6468_s0 + $0xc0] sm:$0xff]  ;;  %v204_v6 = vrot.slane %v3802_v62, 1  ;;  %v206_v8 = vrot.slane %v3807_v63, 1  ;;  %v3835_v18 = vld [vmem:[%s6468_s0 + $0xe8] sm:$0x3] }
  0x17   :  { %6559 = vst [vmem:[#allocation12_spill] sm:$0xff] %v3796_v60  ;;  %v3819_v4 = vsel %vm162_vm0, %v199_v58, %v201_v59  ;;  %v3824_v9 = vsel %vm162_vm0, %v198_v61, %v199_v58  ;;  %v203_v13 = vrot.slane %v3812_v3, 1  ;;  %v3830_v16 = vld [vmem:[%s6468_s0 + $0xe0] sm:$0xff]  ;;  %v3840_v19 = vld [vmem:[%s6468_s0 + $0xd8] sm:$0xff]  ;;  %v211_v26 = vrot.slane %v3835_v18, 1  ;;  %v3868_v37 = vld [vmem:[%s6468_s0 + $0xf0] sm:$0xff] }
  0x18   :  { %6560 = vst [vmem:[#allocation13_spill] sm:$0xff] %v3819_v4  ;;  %6561 = vst [vmem:[#allocation14_spill] sm:$0xff] %v3824_v9  ;;  %v3847_v20 = vsel %vm162_vm0, %v204_v6, %v206_v8  ;;  %v209_v21 = vrot.slane %v3830_v16, 1  ;;  %v208_v29 = vrot.slane %v3840_v19, 1  ;;  %v3858_v34 = vld [vmem:[%s6468_s0 + $0xf8] sm:$0xff]  ;;  %v3873_v42 = vld [vmem:[%s6468_s0 + $0x110] sm:$0xff] }
  0x19   :  { %265 = vrot.lane.b32.xlu1 %v3763_v49, %s3552_s11  ;;  %6562 = vst [vmem:[#allocation15_spill] sm:$0xff] %v3847_v20  ;;  %v3852_v27 = vsel %vm162_vm0, %v203_v13, %v204_v6  ;;  %v3863_v35 = vld [vmem:[%s6468_s0 + $0x100] sm:$0x3]  ;;  %v3878_v43 = vld [vmem:[%s6468_s0 + $0x108] sm:$0xff]  ;;  %v3900_v53 = vld [vmem:[%s6468_s0 + $0x138] sm:$0xff]  ;;  %v214_v61 = vrot.slane %v3858_v34, 1 }
  0x1a   :  { %263 = vrot.lane.b32.xlu0 %v3768_v52, %s3552_s11  ;;  %6563 = vst [vmem:[#allocation16_spill] sm:$0xff] %v3852_v27  ;;  %v3883_v45 = vld [vmem:[%s6468_s0 + $0x128] sm:$0xff]  ;;  %v3888_v50 = vld [vmem:[%s6468_s0 + $0x120] sm:$0xff]  ;;  %v3905_v58 = vld [vmem:[%s6468_s0 + $0x158] sm:$0xff]  ;;  %v3910_v59 = vsel %vm162_vm0, %v209_v21, %v211_v26  ;;  %v216_v6 = vrot.slane %v3863_v35, 1  ;;  %vm81_vm1 = vcmask 31744   ;;  %v3930_v26 = vsel %vm162_vm0, %v208_v29, %v209_v21 }
  0x1b   :  { %v3895_v51 = vld [vmem:[%s6468_s0 + $0x140] sm:$0xff]  ;;  %6564 = vst [vmem:[#allocation17_spill] sm:$0xff] %v3910_v59  ;;  %v3917_v8 = vld [vmem:[%s6468_s0 + $0x150] sm:$0xff]  ;;  %6565 = vst [vmem:[#allocation18_spill] sm:$0xff] %v3930_v26  ;;  %v219_v29 = vrot.slane %v3873_v42, 1  ;;  %vm372_vm2 = vcmask 1045504  }
  0x1c   :  { %v3922_v13 = vld [vmem:[%s6468_s0 + $0x170] sm:$0xff]  ;;  %84 = vst.msk [vmem:[#allocation2 + $0x10] sm:$0xff] %vm81_vm1, %v3598_v0  ;;  %82 = vst.msk [vmem:[#allocation2] sm:$0xff] %vm81_vm1, %v3608_v2  ;;  %v4007_v21 = vsel %vm162_vm0, %v214_v61, %v216_v6  ;;  %v4036_v49 = vld [vmem:[%s6468_s0 + $0x148] sm:$0x3]  ;;  %s3553_s18 = smov 8  }
  0x1d   :  { %269 = vrot.lane.b32.xlu1 %v3791_v57, %s3552_s11  ;;  %83 = vst.msk [vmem:[#allocation2 + $0x8] sm:$0xff] %vm81_vm1, %v3615_v5  ;;  %85 = vst.msk [vmem:[#allocation2 + $0x18] sm:$0xff] %vm81_vm1, %v3603_v1  ;;  %v218_v57 = vrot.slane %v3878_v43, 1  ;;  %v4018_v52 = vld [vmem:[%s6468_s0 + $0x130] sm:$0x3]  ;;  %vm339_vm3 = vcmask 64544  }
  0x1e   :  { %267 = vrot.lane.b32.xlu0 %v3796_v60, %s3552_s11  ;;  %86 = vst.msk [vmem:[#allocation2 + $0x20] sm:$0xff] %vm81_vm1, %v3647_v15  ;;  %87 = vst.msk [vmem:[#allocation2 + $0x28] sm:$0xff] %vm81_vm1, %v3633_v11  ;;  %v4054_v44 = vld [vmem:[%s6468_s0 + $0x160] sm:$0x3]  ;;  %v4072_v41 = vld [vmem:[%s6468_s0 + $0x178] sm:$0x3] }
  0x1f   :  { %88 = vst.msk [vmem:[#allocation2 + $0x30] sm:$0xff] %vm81_vm1, %v3673_v24  ;;  %89 = vst.msk [vmem:[#allocation2 + $0x38] sm:$0xff] %vm81_vm1, %v3663_v22  ;;  %s3554_s19 = smov 12   ;;  %vm549_vm4 = vcmask 97344   ;;  %s3555_s24 = smov 16   ;;  %vm680_vm5 = vcmask 130144  }
  0x20   :  { %90 = vst.msk [vmem:[#allocation2 + $0x40] sm:$0xff] %vm81_vm1, %v3700_v32  ;;  %91 = vst.msk [vmem:[#allocation2 + $0x48] sm:$0xff] %vm81_vm1, %v3690_v30  ;;  %s3556_s27 = smov 20   ;;  %vm815_vm6 = vcmask 162944   ;;  %s3557_s12 = smov 24   ;;  %vm949_vm7 = vcmask 195744  }
  0x21   :  { %273 = vrot.lane.b32.xlu1 %v3819_v4, %s3552_s11  ;;  %92 = vst.msk [vmem:[#allocation2 + $0x50] sm:$0xff] %vm81_vm1, %v3728_v40  ;;  %93 = vst.msk [vmem:[#allocation2 + $0x58] sm:$0xff] %vm81_vm1, %v3718_v38  ;;  %s3558_s14 = smov 28   ;;  %vm1080_vm8 = vcmask 228544   ;;  %s3559_s17 = smov 32   ;;  %vm1215_vm9 = vcmask 261344  }
  0x22   :  { %271 = vrot.lane.b32.xlu0 %v3824_v9, %s3552_s11  ;;  %v3936_v9 = vld [vmem:[%s6468_s0 + $0x118] sm:$0x3]  ;;  %94 = vst.msk [vmem:[#allocation2 + $0x60] sm:$0xff] %vm81_vm1, %v3756_v48  ;;  %95 = vst.msk [vmem:[#allocation2 + $0x68] sm:$0xff] %vm81_vm1, %v3746_v46  ;;  %vm1349_vm10 = vcmask 294144   ;;  %vm1414_vm11 = vcmask 293888  }
  0x23   :  { %96 = vst.msk [vmem:[#allocation2 + $0x70] sm:$0xff] %vm81_vm1, %v3784_v56  ;;  %97 = vst.msk [vmem:[#allocation2 + $0x78] sm:$0xff] %vm81_vm1, %v3774_v54  ;;  %v221_v4 = vrot.slane %v3936_v9, 1  ;;  %vm1590_vm13 = vcmask 1043456   ;;  %vm24_vm14 = vcmask 11264   ;;  %vm3172_vm15 = vcmask 3072  }
  0x24   :  { %98 = vst.msk [vmem:[#allocation2 + $0x80] sm:$0xff] %vm81_vm1, %v3812_v3  ;;  %99 = vst.msk [vmem:[#allocation2 + $0x88] sm:$0xff] %vm81_vm1, %v3802_v62 }
  0x25   :  { %277 = vrot.lane.b32.xlu1 %v3847_v20, %s3552_s11  ;;  %v213_v20 = vrot.slane %v3868_v37, 1  ;;  %100 = vst.msk [vmem:[#allocation2 + $0x90] sm:$0xff] %vm81_vm1, %v3840_v19  ;;  %101 = vst.msk [vmem:[#allocation2 + $0x98] sm:$0xff] %vm81_vm1, %v3830_v16  ;;  %v4025_v6 = vsel %vm162_vm0, %v219_v29, %v221_v4 }
  0x26   :  { %275 = vrot.lane.b32.xlu0 %v3852_v27, %s3552_s11  ;;  %v3927_v27 = vld [vmem:[%s6468_s0 + $0x168] sm:$0xff]  ;;  %102 = vst.msk [vmem:[#allocation2 + $0xa0] sm:$0xff] %vm81_vm1, %v3868_v37  ;;  %103 = vst.msk [vmem:[#allocation2 + $0xa8] sm:$0xff] %vm81_vm1, %v3858_v34 }
  0x27   :  { %104 = vst.msk [vmem:[#allocation2 + $0xb0] sm:$0xff] %vm81_vm1, %v3878_v43  ;;  %105 = vst.msk [vmem:[#allocation2 + $0xb8] sm:$0xff] %vm81_vm1, %v3873_v42  ;;  %v4012_v60 = vsel %vm162_vm0, %v213_v20, %v214_v61  ;;  %v226_v20 = vrot.slane %v4018_v52, 1  ;;  %v4030_v61 = vsel %vm162_vm0, %v218_v57, %v219_v29  ;;  %v231_v57 = vrot.slane %v4036_v49, 1 }
  0x28   :  { %106 = vst.msk [vmem:[#allocation2 + $0xc0] sm:$0xff] %vm81_vm1, %v3888_v50  ;;  %107 = vst.msk [vmem:[#allocation2 + $0xc8] sm:$0xff] %vm81_vm1, %v3883_v45 }
  0x29   :  { %108 = vst.msk [vmem:[#allocation2 + $0xd0] sm:$0xff] %vm81_vm1, %v3900_v53  ;;  %109 = vst.msk [vmem:[#allocation2 + $0xd8] sm:$0xff] %vm81_vm1, %v3895_v51  ;;  %281 = vrot.lane.b32.xlu1 %v3910_v59, %s3552_s11  ;;  %v223_v59 = vrot.slane %v3888_v50, 1 }
  0x2a   :  { %110 = vst.msk [vmem:[#allocation2 + $0xe0] sm:$0xff] %vm81_vm1, %v3917_v8  ;;  %111 = vst.msk [vmem:[#allocation2 + $0xe8] sm:$0xff] %vm81_vm1, %v3905_v58  ;;  %279 = vrot.lane.b32.xlu0 %v3930_v26, %s3552_s11  ;;  %v224_v26 = vrot.slane %v3883_v45, 1 }
  0x2b   :  { %112 = vst.msk [vmem:[#allocation2 + $0xf0] sm:$0xff] %vm81_vm1, %v3927_v27  ;;  %113 = vst.msk [vmem:[#allocation2 + $0xf8] sm:$0xff] %vm81_vm1, %v3922_v13 }
  0x2c   :  { %6566 = vst [vmem:[#allocation19_spill] sm:$0xff] %v4007_v21  ;;  %6567 = vst [vmem:[#allocation20_spill] sm:$0xff] %v4012_v60  ;;  %v4043_v4 = vsel %vm162_vm0, %v224_v26, %v226_v20  ;;  %v4048_v29 = vsel %vm162_vm0, %v223_v59, %v224_v26  ;;  %v236_v59 = vrot.slane %v4054_v44, 1 }
  0x2d   :  { %285 = vrot.lane.b32.xlu1 %v4007_v21, %s3552_s11  ;;  %6568 = vst [vmem:[#allocation21_spill] sm:$0xff] %v4025_v6  ;;  %6569 = vst [vmem:[#allocation22_spill] sm:$0xff] %v4030_v61  ;;  %v228_v21 = vrot.slane %v3900_v53, 1 }
  0x2e   :  { %283 = vrot.lane.b32.xlu0 %v4012_v60, %s3552_s11  ;;  %6570 = vst [vmem:[#allocation23_spill] sm:$0xff] %v4043_v4  ;;  %v229_v60 = vrot.slane %v3895_v51, 1  ;;  %6571 = vst [vmem:[#allocation24_spill] sm:$0xff] %v4048_v29 }
  0x2f   :  { %vm5392_vm12 = vmpackc.low %vm1414_vm11, %vm1414_vm11 }
  0x30   :  { %v4061_v20 = vsel %vm162_vm0, %v229_v60, %v231_v57  ;;  %v4066_v26 = vsel %vm162_vm0, %v228_v21, %v229_v60  ;;  %v241_v60 = vrot.slane %v4072_v41, 1 }
  0x31   :  { %289 = vrot.lane.b32.xlu1 %v4025_v6, %s3552_s11  ;;  %6572 = vst [vmem:[#allocation25_spill] sm:$0xff] %v4061_v20  ;;  %6573 = vst [vmem:[#allocation26_spill] sm:$0xff] %v4066_v26  ;;  %v233_v6 = vrot.slane %v3917_v8, 1 }
  0x32   :  { %287 = vrot.lane.b32.xlu0 %v4030_v61, %s3552_s11  ;;  %v234_v61 = vrot.slane %v3905_v58, 1 }
  0x34   :  { %v4079_v57 = vsel %vm162_vm0, %v234_v61, %v236_v59  ;;  %v4084_v21 = vsel %vm162_vm0, %v233_v6, %v234_v61  ;;  %v374_v59 = vrot.slane %v3615_v5, 2  ;;  %v373_v6 = vrot.slane %v3608_v2, 2 }
  0x35   :  { %293 = vrot.lane.b32.xlu1 %v4043_v4, %s3552_s11  ;;  %6574 = vst [vmem:[#allocation27_spill] sm:$0xff] %v4079_v57  ;;  %6575 = vst [vmem:[#allocation28_spill] sm:$0xff] %v4084_v21  ;;  %v238_v4 = vrot.slane %v3927_v27, 1  ;;  %v381_v5 = vrot.slane %v3621_v7, 2  ;;  %v383_v7 = vrot.slane %v3647_v15, 2 }
  0x36   :  { %291 = vrot.lane.b32.xlu0 %v4048_v29, %s3552_s11  ;;  %v239_v29 = vrot.slane %v3922_v13, 1 }
  0x38   :  { %v4097_v36 = vsel %vm162_vm0, %v238_v4, %v239_v29  ;;  %v378_v4 = vrot.slane %v3598_v0, 2 }
  0x39   :  { %297 = vrot.lane.b32.xlu1 %v4061_v20, %s3552_s11  ;;  %v376_v20 = vrot.slane %v3628_v10, 2  ;;  %6577 = vst [vmem:[#allocation30_spill] sm:$0xff] %v4097_v36  ;;  %v375_v10 = vsel %vm372_vm2, %v373_v6, %v374_v59  ;;  %v389_v6 = vrot.slane %v3663_v22, 2 }
  0x3a   :  { %295 = vrot.lane.b32.xlu0 %v4066_v26, %s3552_s11  ;;  %v4092_v26 = vsel %vm162_vm0, %v239_v29, %v241_v60  ;;  %v379_v60 = vrot.slane %v3603_v1, 2  ;;  %v384_v29 = vrot.slane %v3633_v11, 2 }
  0x3b   :  { %6576 = vst [vmem:[#allocation29_spill] sm:$0xff] %v4092_v26  ;;  %v377_v61 = vsel %vm372_vm2, %v374_v59, %v376_v20  ;;  %v386_v20 = vrot.slane %v3642_v14, 2 }
  0x3c   :  { %v4112_v2 = vsel %vm372_vm2, %v379_v60, %v381_v5  ;;  %v4130_v14 = vsel %vm372_vm2, %v383_v7, %v384_v29  ;;  %v399_v7 = vrot.slane %v3718_v38, 2 }
  0x3d   :  { %301 = vrot.lane.b32.xlu1 %v4079_v57, %s3552_s11  ;;  %v4125_v59 = vsel %vm372_vm2, %v384_v29, %v386_v20  ;;  %v393_v29 = vrot.slane %v3700_v32, 2 }
  0x3e   :  { %299 = vrot.lane.b32.xlu0 %v4084_v21, %s3552_s11 }
  0x41   :  { %305 = vrot.lane.b32.xlu1 %v4092_v26, %s3552_s11 }
  0x42   :  { %303 = vrot.lane.b32.xlu0 %v4097_v36, %s3552_s11  ;;  %v4117_v36 = vsel %vm372_vm2, %v378_v4, %v379_v60  ;;  %v388_v60 = vrot.slane %v3673_v24, 2  ;;  %v396_v4 = vrot.slane %v3695_v31, 2 }
  0x45   :  { %455 = vrot.lane.b32.xlu1 %v377_v61, %s3553_s18  ;;  %v391_v61 = vrot.slane %v3668_v23, 2  ;;  %v4143_v23 = vsel %vm372_vm2, %v388_v60, %v389_v6 }
  0x46   :  { %453 = vrot.lane.b32.xlu0 %v375_v10, %s3553_s18  ;;  %v394_v10 = vrot.slane %v3690_v30, 2  ;;  %6578 = vst [vmem:[#allocation31_spill] sm:$0xff] %v4143_v23 }
  0x47   :  { %v4138_v5 = vsel %vm372_vm2, %v389_v6, %v391_v61  ;;  %v401_v61 = vrot.slane %v3723_v39, 2  ;;  %v398_v6 = vrot.slane %v3728_v40, 2 }
  0x48   :  { %v4151_v20 = vsel %vm372_vm2, %v394_v10, %v396_v4  ;;  %v4156_v31 = vsel %vm372_vm2, %v393_v29, %v394_v10  ;;  %v404_v4 = vrot.slane %v3746_v46, 2  ;;  %v403_v10 = vrot.slane %v3756_v48, 2 }
  0x49   :  { %459 = vrot.lane.b32.xlu1 %v4112_v2, %s3553_s18  ;;  %6579 = vst [vmem:[#allocation32_spill] sm:$0xff] %v4156_v31  ;;  %v4164_v60 = vsel %vm372_vm2, %v399_v7, %v401_v61  ;;  %v4169_v39 = vsel %vm372_vm2, %v398_v6, %v399_v7  ;;  %v409_v61 = vrot.slane %v3774_v54, 2  ;;  %v408_v7 = vrot.slane %v3784_v56, 2 }
  0x4a   :  { %457 = vrot.lane.b32.xlu0 %v4117_v36, %s3553_s18  ;;  %6580 = vst [vmem:[#allocation33_spill] sm:$0xff] %v4164_v60  ;;  %6581 = vst [vmem:[#allocation34_spill] sm:$0xff] %v4169_v39 }
  0x4d   :  { %463 = vrot.lane.b32.xlu1 %v4125_v59, %s3553_s18 }
  0x4e   :  { %461 = vrot.lane.b32.xlu0 %v4130_v14, %s3553_s18 }
  0x51   :  { %467 = vrot.lane.b32.xlu1 %v4138_v5, %s3553_s18 }
  0x52   :  { %465 = vrot.lane.b32.xlu0 %v4143_v23, %s3553_s18  ;;  %v406_v23 = vrot.slane %v3751_v47, 2  ;;  %v4182_v47 = vsel %vm372_vm2, %v403_v10, %v404_v4 }
  0x53   :  { %6583 = vst [vmem:[#allocation36_spill] sm:$0xff] %v4182_v47 }
  0x54   :  { %v4177_v29 = vsel %vm372_vm2, %v404_v4, %v406_v23  ;;  %v414_v23 = vrot.slane %v3802_v62, 2  ;;  %v413_v4 = vrot.slane %v3812_v3, 2 }
  0x55   :  { %471 = vrot.lane.b32.xlu1 %v4151_v20, %s3553_s18  ;;  %6582 = vst [vmem:[#allocation35_spill] sm:$0xff] %v4177_v29 }
  0x56   :  { %469 = vrot.lane.b32.xlu0 %v4156_v31, %s3553_s18  ;;  %v411_v31 = vrot.slane %v3779_v55, 2  ;;  %v4195_v55 = vsel %vm372_vm2, %v408_v7, %v409_v61 }
  0x57   :  { %6585 = vst [vmem:[#allocation38_spill] sm:$0xff] %v4195_v55 }
  0x58   :  { %v4190_v6 = vsel %vm372_vm2, %v409_v61, %v411_v31  ;;  %v419_v31 = vrot.slane %v3830_v16, 2  ;;  %v418_v61 = vrot.slane %v3840_v19, 2 }
  0x59   :  { %475 = vrot.lane.b32.xlu1 %v4164_v60, %s3553_s18  ;;  %6584 = vst [vmem:[#allocation37_spill] sm:$0xff] %v4190_v6 }
  0x5a   :  { %473 = vrot.lane.b32.xlu0 %v4169_v39, %s3553_s18  ;;  %v416_v39 = vrot.slane %v3807_v63, 2  ;;  %v4208_v63 = vsel %vm372_vm2, %v413_v4, %v414_v23 }
  0x5b   :  { %6587 = vst [vmem:[#allocation40_spill] sm:$0xff] %v4208_v63 }
  0x5c   :  { %v4203_v10 = vsel %vm372_vm2, %v414_v23, %v416_v39  ;;  %v424_v39 = vrot.slane %v3858_v34, 2  ;;  %v423_v23 = vrot.slane %v3868_v37, 2 }
  0x5d   :  { %479 = vrot.lane.b32.xlu1 %v4177_v29, %s3553_s18  ;;  %6586 = vst [vmem:[#allocation39_spill] sm:$0xff] %v4203_v10 }
  0x5e   :  { %477 = vrot.lane.b32.xlu0 %v4182_v47, %s3553_s18  ;;  %v421_v47 = vrot.slane %v3835_v18, 2  ;;  %v4221_v18 = vsel %vm372_vm2, %v418_v61, %v419_v31 }
  0x5f   :  { %6589 = vst [vmem:[#allocation42_spill] sm:$0xff] %v4221_v18 }
  0x60   :  { %v4216_v7 = vsel %vm372_vm2, %v419_v31, %v421_v47  ;;  %v429_v47 = vrot.slane %v3873_v42, 2  ;;  %v428_v31 = vrot.slane %v3878_v43, 2 }
  0x61   :  { %483 = vrot.lane.b32.xlu1 %v4190_v6, %s3553_s18  ;;  %6588 = vst [vmem:[#allocation41_spill] sm:$0xff] %v4216_v7 }
  0x62   :  { %481 = vrot.lane.b32.xlu0 %v4195_v55, %s3553_s18  ;;  %v426_v55 = vrot.slane %v3863_v35, 2  ;;  %v4234_v35 = vsel %vm372_vm2, %v423_v23, %v424_v39 }
  0x63   :  { %6590 = vst [vmem:[#allocation43_spill] sm:$0xff] %v4234_v35 }
  0x64   :  { %v4229_v4 = vsel %vm372_vm2, %v424_v39, %v426_v55  ;;  %v434_v55 = vrot.slane %v3883_v45, 2  ;;  %v433_v39 = vrot.slane %v3888_v50, 2 }
  0x65   :  { %487 = vrot.lane.b32.xlu1 %v4203_v10, %s3553_s18 }
  0x66   :  { %485 = vrot.lane.b32.xlu0 %v4208_v63, %s3553_s18  ;;  %v431_v63 = vrot.slane %v3936_v9, 2  ;;  %v4247_v9 = vsel %vm372_vm2, %v428_v31, %v429_v47 }
  0x67   :  { %6591 = vst [vmem:[#allocation44_spill] sm:$0xff] %v4247_v9 }
  0x68   :  { %v4242_v61 = vsel %vm372_vm2, %v429_v47, %v431_v63  ;;  %v439_v63 = vrot.slane %v3895_v51, 2  ;;  %v438_v47 = vrot.slane %v3900_v53, 2 }
  0x69   :  { %491 = vrot.lane.b32.xlu1 %v4216_v7, %s3553_s18 }
  0x6a   :  { %489 = vrot.lane.b32.xlu0 %v4221_v18, %s3553_s18  ;;  %v436_v18 = vrot.slane %v4018_v52, 2  ;;  %v4260_v52 = vsel %vm372_vm2, %v433_v39, %v434_v55  ;;  %v443_v39 = vrot.slane %v3917_v8, 2 }
  0x6b   :  { %6593 = vst [vmem:[#allocation46_spill] sm:$0xff] %v4260_v52 }
  0x6c   :  { %v4255_v23 = vsel %vm372_vm2, %v434_v55, %v436_v18  ;;  %v444_v18 = vrot.slane %v3905_v58, 2  ;;  %v4273_v55 = vsel %vm372_vm2, %v438_v47, %v439_v63 }
  0x6d   :  { %495 = vrot.lane.b32.xlu1 %v4229_v4, %s3553_s18  ;;  %6592 = vst [vmem:[#allocation45_spill] sm:$0xff] %v4255_v23 }
  0x6e   :  { %493 = vrot.lane.b32.xlu0 %v4234_v35, %s3553_s18  ;;  %v441_v35 = vrot.slane %v4036_v49, 2 }
  0x70   :  { %v4268_v31 = vsel %vm372_vm2, %v439_v63, %v441_v35  ;;  %v451_v63 = vrot.slane %v4072_v41, 2 }
  0x71   :  { %499 = vrot.lane.b32.xlu1 %v4242_v61, %s3553_s18 }
  0x72   :  { %497 = vrot.lane.b32.xlu0 %v4247_v9, %s3553_s18  ;;  %v446_v9 = vrot.slane %v4054_v44, 2  ;;  %v449_v44 = vrot.slane %v3922_v13, 2 }
  0x74   :  { %v4283_v35 = vsel %vm372_vm2, %v444_v18, %v446_v9  ;;  %v4298_v9 = vsel %vm372_vm2, %v449_v44, %v451_v63 }
  0x75   :  { %503 = vrot.lane.b32.xlu1 %v4255_v23, %s3553_s18  ;;  %6594 = vst [vmem:[#allocation47_spill] sm:$0xff] %v4283_v35 }
  0x76   :  { %501 = vrot.lane.b32.xlu0 %v4260_v52, %s3553_s18  ;;  %v4288_v52 = vsel %vm372_vm2, %v443_v39, %v444_v18 }
  0x77   :  { %v248_v49 = vpop.permute.xlu1 %247  ;;  %6595 = vst [vmem:[#allocation48_spill] sm:$0xff] %v4288_v52 }
  0x78   :  { %342 = vst.msk [vmem:[#allocation2 + $0x10] sm:$0xff] %vm339_vm3, %v248_v49  ;;  %v244_v23 = vpop.permute.xlu0 %243  ;;  %v448_v49 = vrot.slane %v3927_v27, 2 }
  0x79   :  { %340 = vst.msk [vmem:[#allocation2] sm:$0xff] %vm339_vm3, %v244_v23  ;;  %507 = vrot.lane.b32.xlu1 %v4268_v31, %s3553_s18 }
  0x7a   :  { %505 = vrot.lane.b32.xlu0 %v4273_v55, %s3553_s18  ;;  %v4301_v18 = vsel %vm372_vm2, %v448_v49, %v449_v44 }
  0x7b   :  { %v250_v47 = vpop.permute.xlu1 %249 }
  0x7c   :  { %343 = vst.msk [vmem:[#allocation2 + $0x18] sm:$0xff] %vm339_vm3, %v250_v47  ;;  %v246_v23 = vpop.permute.xlu0 %245 }
  0x7d   :  { %341 = vst.msk [vmem:[#allocation2 + $0x8] sm:$0xff] %vm339_vm3, %v246_v23  ;;  %511 = vrot.lane.b32.xlu1 %v4283_v35, %s3553_s18 }
  0x7e   :  { %509 = vrot.lane.b32.xlu0 %v4288_v52, %s3553_s18 }
  0x7f   :  { %v254_v41 = vpop.permute.xlu1 %253 }
  0x80   :  { %345 = vst.msk [vmem:[#allocation2 + $0x28] sm:$0xff] %vm339_vm3, %v254_v41  ;;  %v252_v39 = vpop.permute.xlu0 %251 }
  0x81   :  { %344 = vst.msk [vmem:[#allocation2 + $0x20] sm:$0xff] %vm339_vm3, %v252_v39  ;;  %515 = vrot.lane.b32.xlu1 %v4298_v9, %s3553_s18 }
  0x82   :  { %513 = vrot.lane.b32.xlu0 %v4301_v18, %s3553_s18 }
  0x83   :  { %v258_v47 = vpop.permute.xlu1 %257 }
  0x84   :  { %347 = vst.msk [vmem:[#allocation2 + $0x38] sm:$0xff] %vm339_vm3, %v258_v47  ;;  %v256_v63 = vpop.permute.xlu0 %255 }
  0x85   :  { %346 = vst.msk [vmem:[#allocation2 + $0x30] sm:$0xff] %vm339_vm3, %v256_v63  ;;  %586 = vrot.lane.b32.xlu1 %v3603_v1, %s3554_s19 }
  0x86   :  { %584 = vrot.lane.b32.xlu0 %v3598_v0, %s3554_s19 }
  0x87   :  { %v262_v44 = vpop.permute.xlu1 %261 }
  0x88   :  { %349 = vst.msk [vmem:[#allocation2 + $0x48] sm:$0xff] %vm339_vm3, %v262_v44  ;;  %v260_v49 = vpop.permute.xlu0 %259 }
  0x89   :  { %348 = vst.msk [vmem:[#allocation2 + $0x40] sm:$0xff] %vm339_vm3, %v260_v49  ;;  %590 = vrot.lane.b32.xlu1 %v3633_v11, %s3554_s19 }
  0x8a   :  { %588 = vrot.lane.b32.xlu0 %v3647_v15, %s3554_s19 }
  0x8b   :  { %v266_v23 = vpop.permute.xlu1 %265 }
  0x8c   :  { %351 = vst.msk [vmem:[#allocation2 + $0x58] sm:$0xff] %vm339_vm3, %v266_v23  ;;  %v264_v41 = vpop.permute.xlu0 %263 }
  0x8d   :  { %350 = vst.msk [vmem:[#allocation2 + $0x50] sm:$0xff] %vm339_vm3, %v264_v41  ;;  %594 = vrot.lane.b32.xlu1 %v3663_v22, %s3554_s19 }
  0x8e   :  { %592 = vrot.lane.b32.xlu0 %v3673_v24, %s3554_s19 }
  0x8f   :  { %v270_v0 = vpop.permute.xlu1 %269 }
  0x90   :  { %353 = vst.msk [vmem:[#allocation2 + $0x68] sm:$0xff] %vm339_vm3, %v270_v0  ;;  %v268_v1 = vpop.permute.xlu0 %267 }
  0x91   :  { %352 = vst.msk [vmem:[#allocation2 + $0x60] sm:$0xff] %vm339_vm3, %v268_v1  ;;  %598 = vrot.lane.b32.xlu1 %v3690_v30, %s3554_s19 }
  0x92   :  { %596 = vrot.lane.b32.xlu0 %v3700_v32, %s3554_s19 }
  0x93   :  { %v274_v39 = vpop.permute.xlu1 %273 }
  0x94   :  { %355 = vst.msk [vmem:[#allocation2 + $0x78] sm:$0xff] %vm339_vm3, %v274_v39  ;;  %v272_v47 = vpop.permute.xlu0 %271 }
  0x95   :  { %354 = vst.msk [vmem:[#allocation2 + $0x70] sm:$0xff] %vm339_vm3, %v272_v47  ;;  %602 = vrot.lane.b32.xlu1 %v3718_v38, %s3554_s19 }
  0x96   :  { %600 = vrot.lane.b32.xlu0 %v3728_v40, %s3554_s19 }
  0x97   :  { %v278_v63 = vpop.permute.xlu1 %277 }
  0x98   :  { %357 = vst.msk [vmem:[#allocation2 + $0x88] sm:$0xff] %vm339_vm3, %v278_v63  ;;  %v276_v44 = vpop.permute.xlu0 %275 }
  0x99   :  { %356 = vst.msk [vmem:[#allocation2 + $0x80] sm:$0xff] %vm339_vm3, %v276_v44  ;;  %606 = vrot.lane.b32.xlu1 %v3746_v46, %s3554_s19 }
  0x9a   :  { %604 = vrot.lane.b32.xlu0 %v3756_v48, %s3554_s19 }
  0x9b   :  { %v282_v49 = vpop.permute.xlu1 %281 }
  0x9c   :  { %359 = vst.msk [vmem:[#allocation2 + $0x98] sm:$0xff] %vm339_vm3, %v282_v49  ;;  %v280_v23 = vpop.permute.xlu0 %279 }
  0x9d   :  { %358 = vst.msk [vmem:[#allocation2 + $0x90] sm:$0xff] %vm339_vm3, %v280_v23  ;;  %610 = vrot.lane.b32.xlu1 %v3774_v54, %s3554_s19 }
  0x9e   :  { %608 = vrot.lane.b32.xlu0 %v3784_v56, %s3554_s19 }
  0x9f   :  { %v286_v41 = vpop.permute.xlu1 %285 }
  0xa0   :  { %361 = vst.msk [vmem:[#allocation2 + $0xa8] sm:$0xff] %vm339_vm3, %v286_v41  ;;  %v284_v0 = vpop.permute.xlu0 %283 }
  0xa1   :  { %360 = vst.msk [vmem:[#allocation2 + $0xa0] sm:$0xff] %vm339_vm3, %v284_v0  ;;  %614 = vrot.lane.b32.xlu1 %v3802_v62, %s3554_s19 }
  0xa2   :  { %612 = vrot.lane.b32.xlu0 %v3812_v3, %s3554_s19 }
  0xa3   :  { %v290_v1 = vpop.permute.xlu1 %289 }
  0xa4   :  { %363 = vst.msk [vmem:[#allocation2 + $0xb8] sm:$0xff] %vm339_vm3, %v290_v1  ;;  %v288_v39 = vpop.permute.xlu0 %287 }
  0xa5   :  { %362 = vst.msk [vmem:[#allocation2 + $0xb0] sm:$0xff] %vm339_vm3, %v288_v39  ;;  %618 = vrot.lane.b32.xlu1 %v3830_v16, %s3554_s19 }
  0xa6   :  { %616 = vrot.lane.b32.xlu0 %v3840_v19, %s3554_s19 }
  0xa7   :  { %v294_v47 = vpop.permute.xlu1 %293 }
  0xa8   :  { %365 = vst.msk [vmem:[#allocation2 + $0xc8] sm:$0xff] %vm339_vm3, %v294_v47  ;;  %v292_v63 = vpop.permute.xlu0 %291 }
  0xa9   :  { %364 = vst.msk [vmem:[#allocation2 + $0xc0] sm:$0xff] %vm339_vm3, %v292_v63  ;;  %622 = vrot.lane.b32.xlu1 %v3858_v34, %s3554_s19 }
  0xaa   :  { %620 = vrot.lane.b32.xlu0 %v3868_v37, %s3554_s19 }
  0xab   :  { %v298_v44 = vpop.permute.xlu1 %297 }
  0xac   :  { %367 = vst.msk [vmem:[#allocation2 + $0xd8] sm:$0xff] %vm339_vm3, %v298_v44  ;;  %v296_v49 = vpop.permute.xlu0 %295 }
  0xad   :  { %366 = vst.msk [vmem:[#allocation2 + $0xd0] sm:$0xff] %vm339_vm3, %v296_v49  ;;  %626 = vrot.lane.b32.xlu1 %v3873_v42, %s3554_s19  ;;  %v4402_v49 = vld [vmem:[%s6468_s0 + $0x188] sm:$0xff] }
  0xae   :  { %624 = vrot.lane.b32.xlu0 %v3878_v43, %s3554_s19 }
  0xaf   :  { %v302_v23 = vpop.permute.xlu1 %301 }
  0xb0   :  { %369 = vst.msk [vmem:[#allocation2 + $0xe8] sm:$0xff] %vm339_vm3, %v302_v23  ;;  %v300_v41 = vpop.permute.xlu0 %299 }
  0xb1   :  { %368 = vst.msk [vmem:[#allocation2 + $0xe0] sm:$0xff] %vm339_vm3, %v300_v41  ;;  %630 = vrot.lane.b32.xlu1 %v3883_v45, %s3554_s19  ;;  %v4407_v41 = vld [vmem:[%s6468_s0 + $0x180] sm:$0xff] }
  0xb2   :  { %628 = vrot.lane.b32.xlu0 %v3888_v50, %s3554_s19 }
  0xb3   :  { %v306_v0 = vpop.permute.xlu1 %305 }
  0xb4   :  { %371 = vst.msk [vmem:[#allocation2 + $0xf8] sm:$0xff] %vm339_vm3, %v306_v0  ;;  %v304_v1 = vpop.permute.xlu0 %303 }
  0xb5   :  { %370 = vst.msk [vmem:[#allocation2 + $0xf0] sm:$0xff] %vm339_vm3, %v304_v1  ;;  %634 = vrot.lane.b32.xlu1 %v3895_v51, %s3554_s19 }
  0xb6   :  { %632 = vrot.lane.b32.xlu0 %v3900_v53, %s3554_s19 }
  0xb7   :  { %v456_v39 = vpop.permute.xlu1 %455 }
  0xb8   :  { %551 = vst.msk [vmem:[#allocation2 + $0x8] sm:$0xff] %vm549_vm4, %v456_v39  ;;  %v454_v47 = vpop.permute.xlu0 %453 }
  0xb9   :  { %550 = vst.msk [vmem:[#allocation2] sm:$0xff] %vm549_vm4, %v454_v47  ;;  %638 = vrot.lane.b32.xlu1 %v3905_v58, %s3554_s19 }
  0xba   :  { %636 = vrot.lane.b32.xlu0 %v3917_v8, %s3554_s19 }
  0xbb   :  { %v460_v63 = vpop.permute.xlu1 %459 }
  0xbc   :  { %553 = vst.msk [vmem:[#allocation2 + $0x18] sm:$0xff] %vm549_vm4, %v460_v63  ;;  %v458_v44 = vpop.permute.xlu0 %457 }
  0xbd   :  { %552 = vst.msk [vmem:[#allocation2 + $0x10] sm:$0xff] %vm549_vm4, %v458_v44  ;;  %642 = vrot.lane.b32.xlu1 %v3922_v13, %s3554_s19 }
  0xbe   :  { %640 = vrot.lane.b32.xlu0 %v3927_v27, %s3554_s19 }
  0xbf   :  { %v464_v23 = vpop.permute.xlu1 %463 }
  0xc0   :  { %555 = vst.msk [vmem:[#allocation2 + $0x28] sm:$0xff] %vm549_vm4, %v464_v23  ;;  %v462_v0 = vpop.permute.xlu0 %461 }
  0xc1   :  { %554 = vst.msk [vmem:[#allocation2 + $0x20] sm:$0xff] %vm549_vm4, %v462_v0  ;;  %646 = vrot.lane.b32.xlu1 %v4402_v49, %s3554_s19 }
  0xc2   :  { %644 = vrot.lane.b32.xlu0 %v4407_v41, %s3554_s19 }
  0xc3   :  { %v468_v1 = vpop.permute.xlu1 %467 }
  0xc4   :  { %557 = vst.msk [vmem:[#allocation2 + $0x38] sm:$0xff] %vm549_vm4, %v468_v1  ;;  %v466_v39 = vpop.permute.xlu0 %465  ;;  %v6597_v1 = vld [vmem:[#allocation7_spill] sm:$0xff] }
  0xc5   :  { %556 = vst.msk [vmem:[#allocation2 + $0x30] sm:$0xff] %vm549_vm4, %v466_v39  ;;  %721 = vrot.lane.b32.xlu1 %v3654_v17, %s3555_s24  ;;  %v6598_v39 = vld [vmem:[#allocation8_spill] sm:$0xff] }
  0xc6   :  { %719 = vrot.lane.b32.xlu0 %v3636_v12, %s3555_s24  ;;  %v6596_v12 = vld [vmem:[#allocation6_spill] sm:$0xff] }
  0xc7   :  { %v472_v47 = vpop.permute.xlu1 %471 }
  0xc8   :  { %559 = vst.msk [vmem:[#allocation2 + $0x48] sm:$0xff] %vm549_vm4, %v472_v47  ;;  %v470_v63 = vpop.permute.xlu0 %469 }
  0xc9   :  { %558 = vst.msk [vmem:[#allocation2 + $0x40] sm:$0xff] %vm549_vm4, %v470_v63  ;;  %725 = vrot.lane.b32.xlu1 %v3679_v25, %s3555_s24 }
  0xca   :  { %723 = vrot.lane.b32.xlu0 %v3684_v28, %s3555_s24 }
  0xcb   :  { %v476_v44 = vpop.permute.xlu1 %475 }
  0xcc   :  { %561 = vst.msk [vmem:[#allocation2 + $0x58] sm:$0xff] %vm549_vm4, %v476_v44  ;;  %v474_v23 = vpop.permute.xlu0 %473  ;;  %v6599_v44 = vld [vmem:[#allocation9_spill] sm:$0xff] }
  0xcd   :  { %560 = vst.msk [vmem:[#allocation2 + $0x50] sm:$0xff] %vm549_vm4, %v474_v23  ;;  %729 = vrot.lane.b32.xlu1 %v3707_v33, %s3555_s24  ;;  %v6600_v23 = vld [vmem:[#allocation10_spill] sm:$0xff] }
  0xce   :  { %727 = vrot.lane.b32.xlu0 %v6596_v12, %s3555_s24 }
  0xcf   :  { %v480_v17 = vpop.permute.xlu1 %479 }
  0xd0   :  { %563 = vst.msk [vmem:[#allocation2 + $0x68] sm:$0xff] %vm549_vm4, %v480_v17  ;;  %v478_v0 = vpop.permute.xlu0 %477 }
  0xd1   :  { %562 = vst.msk [vmem:[#allocation2 + $0x60] sm:$0xff] %vm549_vm4, %v478_v0  ;;  %733 = vrot.lane.b32.xlu1 %v6597_v1, %s3555_s24 }
  0xd2   :  { %731 = vrot.lane.b32.xlu0 %v6598_v39, %s3555_s24  ;;  %v6601_v39 = vld [vmem:[#allocation11_spill] sm:$0xff] }
  0xd3   :  { %v484_v47 = vpop.permute.xlu1 %483 }
  0xd4   :  { %565 = vst.msk [vmem:[#allocation2 + $0x78] sm:$0xff] %vm549_vm4, %v484_v47  ;;  %v482_v63 = vpop.permute.xlu0 %481  ;;  %v6602_v47 = vld [vmem:[#allocation12_spill] sm:$0xff] }
  0xd5   :  { %564 = vst.msk [vmem:[#allocation2 + $0x70] sm:$0xff] %vm549_vm4, %v482_v63  ;;  %737 = vrot.lane.b32.xlu1 %v6599_v44, %s3555_s24 }
  0xd6   :  { %735 = vrot.lane.b32.xlu0 %v6600_v23, %s3555_s24  ;;  %v6603_v23 = vld [vmem:[#allocation13_spill] sm:$0xff] }
  0xd7   :  { %v488_v17 = vpop.permute.xlu1 %487 }
  0xd8   :  { %567 = vst.msk [vmem:[#allocation2 + $0x88] sm:$0xff] %vm549_vm4, %v488_v17  ;;  %v486_v0 = vpop.permute.xlu0 %485  ;;  %v6604_v17 = vld [vmem:[#allocation14_spill] sm:$0xff] }
  0xd9   :  { %566 = vst.msk [vmem:[#allocation2 + $0x80] sm:$0xff] %vm549_vm4, %v486_v0  ;;  %741 = vrot.lane.b32.xlu1 %v6601_v39, %s3555_s24 }
  0xda   :  { %739 = vrot.lane.b32.xlu0 %v6602_v47, %s3555_s24  ;;  %v6605_v47 = vld [vmem:[#allocation15_spill] sm:$0xff] }
  0xdb   :  { %v492_v1 = vpop.permute.xlu1 %491 }
  0xdc   :  { %569 = vst.msk [vmem:[#allocation2 + $0x98] sm:$0xff] %vm549_vm4, %v492_v1  ;;  %v490_v63 = vpop.permute.xlu0 %489  ;;  %v6606_v1 = vld [vmem:[#allocation16_spill] sm:$0xff] }
  0xdd   :  { %568 = vst.msk [vmem:[#allocation2 + $0x90] sm:$0xff] %vm549_vm4, %v490_v63  ;;  %745 = vrot.lane.b32.xlu1 %v6603_v23, %s3555_s24 }
  0xde   :  { %743 = vrot.lane.b32.xlu0 %v6604_v17, %s3555_s24  ;;  %v6607_v17 = vld [vmem:[#allocation17_spill] sm:$0xff] }
  0xdf   :  { %v496_v44 = vpop.permute.xlu1 %495 }
  0xe0   :  { %571 = vst.msk [vmem:[#allocation2 + $0xa8] sm:$0xff] %vm549_vm4, %v496_v44  ;;  %v494_v0 = vpop.permute.xlu0 %493  ;;  %v6608_v44 = vld [vmem:[#allocation18_spill] sm:$0xff] }
  0xe1   :  { %570 = vst.msk [vmem:[#allocation2 + $0xa0] sm:$0xff] %vm549_vm4, %v494_v0  ;;  %749 = vrot.lane.b32.xlu1 %v6605_v47, %s3555_s24 }
  0xe2   :  { %747 = vrot.lane.b32.xlu0 %v6606_v1, %s3555_s24  ;;  %v6609_v1 = vld [vmem:[#allocation19_spill] sm:$0xff] }
  0xe3   :  { %v500_v39 = vpop.permute.xlu1 %499 }
  0xe4   :  { %573 = vst.msk [vmem:[#allocation2 + $0xb8] sm:$0xff] %vm549_vm4, %v500_v39  ;;  %v498_v63 = vpop.permute.xlu0 %497  ;;  %v6610_v39 = vld [vmem:[#allocation20_spill] sm:$0xff] }
  0xe5   :  { %572 = vst.msk [vmem:[#allocation2 + $0xb0] sm:$0xff] %vm549_vm4, %v498_v63  ;;  %753 = vrot.lane.b32.xlu1 %v6607_v17, %s3555_s24 }
  0xe6   :  { %751 = vrot.lane.b32.xlu0 %v6608_v44, %s3555_s24  ;;  %v6611_v44 = vld [vmem:[#allocation21_spill] sm:$0xff] }
  0xe7   :  { %v504_v23 = vpop.permute.xlu1 %503 }
  0xe8   :  { %575 = vst.msk [vmem:[#allocation2 + $0xc8] sm:$0xff] %vm549_vm4, %v504_v23  ;;  %v502_v0 = vpop.permute.xlu0 %501  ;;  %v6612_v23 = vld [vmem:[#allocation22_spill] sm:$0xff] }
  0xe9   :  { %574 = vst.msk [vmem:[#allocation2 + $0xc0] sm:$0xff] %vm549_vm4, %v502_v0  ;;  %757 = vrot.lane.b32.xlu1 %v6609_v1, %s3555_s24 }
  0xea   :  { %755 = vrot.lane.b32.xlu0 %v6610_v39, %s3555_s24  ;;  %v6613_v39 = vld [vmem:[#allocation23_spill] sm:$0xff] }
  0xeb   :  { %v508_v47 = vpop.permute.xlu1 %507 }
  0xec   :  { %577 = vst.msk [vmem:[#allocation2 + $0xd8] sm:$0xff] %vm549_vm4, %v508_v47  ;;  %v506_v63 = vpop.permute.xlu0 %505  ;;  %v6614_v47 = vld [vmem:[#allocation24_spill] sm:$0xff] }
  0xed   :  { %576 = vst.msk [vmem:[#allocation2 + $0xd0] sm:$0xff] %vm549_vm4, %v506_v63  ;;  %761 = vrot.lane.b32.xlu1 %v6611_v44, %s3555_s24 }
  0xee   :  { %759 = vrot.lane.b32.xlu0 %v6612_v23, %s3555_s24  ;;  %v6615_v23 = vld [vmem:[#allocation25_spill] sm:$0xff] }
  0xef   :  { %v512_v17 = vpop.permute.xlu1 %511 }
  0xf0   :  { %579 = vst.msk [vmem:[#allocation2 + $0xe8] sm:$0xff] %vm549_vm4, %v512_v17  ;;  %v510_v0 = vpop.permute.xlu0 %509  ;;  %v6616_v17 = vld [vmem:[#allocation26_spill] sm:$0xff] }
  0xf1   :  { %578 = vst.msk [vmem:[#allocation2 + $0xe0] sm:$0xff] %vm549_vm4, %v510_v0  ;;  %765 = vrot.lane.b32.xlu1 %v6613_v39, %s3555_s24  ;;  %v4496_v39 = vld [vmem:[%s6468_s0 + $0x190] sm:$0x3] }
  0xf2   :  { %763 = vrot.lane.b32.xlu0 %v6614_v47, %s3555_s24 }
  0xf3   :  { %v516_v1 = vpop.permute.xlu1 %515 }
  0xf4   :  { %581 = vst.msk [vmem:[#allocation2 + $0xf8] sm:$0xff] %vm549_vm4, %v516_v1  ;;  %v514_v63 = vpop.permute.xlu0 %513  ;;  %v715_v1 = vrot.slane %v4402_v49, 1 }
  0xf5   :  { %580 = vst.msk [vmem:[#allocation2 + $0xf0] sm:$0xff] %vm549_vm4, %v514_v63  ;;  %769 = vrot.lane.b32.xlu1 %v6615_v23, %s3555_s24  ;;  %v717_v63 = vrot.slane %v4496_v39, 1 }
  0xf6   :  { %767 = vrot.lane.b32.xlu0 %v6616_v17, %s3555_s24  ;;  %v714_v17 = vrot.slane %v4407_v41, 1 }
  0xf7   :  { %v587_v0 = vpop.permute.xlu1 %586 }
  0xf8   :  { %682 = vst.msk [vmem:[#allocation2 + $0x8] sm:$0xff] %vm680_vm5, %v587_v0  ;;  %v585_v47 = vpop.permute.xlu0 %584  ;;  %v4514_v0 = vsel %vm162_vm0, %v715_v1, %v717_v63 }
  0xf9   :  { %681 = vst.msk [vmem:[#allocation2] sm:$0xff] %vm680_vm5, %v585_v47  ;;  %773 = vrot.lane.b32.xlu1 %v4079_v57, %s3555_s24  ;;  %v6617_v47 = vld [vmem:[#allocation30_spill] sm:$0xff]  ;;  %6618 = vst [vmem:[#allocation49_spill] sm:$0xff] %v4514_v0 }
  0xfa   :  { %771 = vrot.lane.b32.xlu0 %v4084_v21, %s3555_s24  ;;  %v4517_v21 = vsel %vm162_vm0, %v714_v17, %v715_v1 }
  0xfb   :  { %v591_v23 = vpop.permute.xlu1 %590  ;;  %6619 = vst [vmem:[#allocation50_spill] sm:$0xff] %v4517_v21 }
  0xfc   :  { %684 = vst.msk [vmem:[#allocation2 + $0x18] sm:$0xff] %vm680_vm5, %v591_v23  ;;  %v589_v44 = vpop.permute.xlu0 %588 }
  0xfd   :  { %683 = vst.msk [vmem:[#allocation2 + $0x10] sm:$0xff] %vm680_vm5, %v589_v44  ;;  %777 = vrot.lane.b32.xlu1 %v4092_v26, %s3555_s24 }
  0xfe   :  { %775 = vrot.lane.b32.xlu0 %v6617_v47, %s3555_s24 }
  0xff   :  { %v595_v57 = vpop.permute.xlu1 %594 }
 0x100   :  { %686 = vst.msk [vmem:[#allocation2 + $0x28] sm:$0xff] %vm680_vm5, %v595_v57  ;;  %v593_v12 = vpop.permute.xlu0 %592 }
 0x101   :  { %685 = vst.msk [vmem:[#allocation2 + $0x20] sm:$0xff] %vm680_vm5, %v593_v12  ;;  %781 = vrot.lane.b32.xlu1 %v4514_v0, %s3555_s24 }
 0x102   :  { %779 = vrot.lane.b32.xlu0 %v4517_v21, %s3555_s24 }
 0x103   :  { %v599_v44 = vpop.permute.xlu1 %598 }
 0x104   :  { %688 = vst.msk [vmem:[#allocation2 + $0x38] sm:$0xff] %vm680_vm5, %v599_v44  ;;  %v597_v23 = vpop.permute.xlu0 %596  ;;  %v6621_v44 = vld [vmem:[#allocation32_spill] sm:$0xff] }
 0x105   :  { %687 = vst.msk [vmem:[#allocation2 + $0x30] sm:$0xff] %vm680_vm5, %v597_v23  ;;  %855 = vrot.lane.b32.xlu1 %v4112_v2, %s3556_s27 }
 0x106   :  { %853 = vrot.lane.b32.xlu0 %v4117_v36, %s3556_s27  ;;  %v6620_v36 = vld [vmem:[#allocation31_spill] sm:$0xff] }
 0x107   :  { %v603_v57 = vpop.permute.xlu1 %602 }
 0x108   :  { %690 = vst.msk [vmem:[#allocation2 + $0x48] sm:$0xff] %vm680_vm5, %v603_v57  ;;  %v601_v12 = vpop.permute.xlu0 %600 }
 0x109   :  { %689 = vst.msk [vmem:[#allocation2 + $0x40] sm:$0xff] %vm680_vm5, %v601_v12  ;;  %859 = vrot.lane.b32.xlu1 %v4125_v59, %s3556_s27  ;;  %v6622_v12 = vld [vmem:[#allocation34_spill] sm:$0xff] }
 0x10a   :  { %857 = vrot.lane.b32.xlu0 %v4130_v14, %s3556_s27 }
 0x10b   :  { %v607_v17 = vpop.permute.xlu1 %606 }
 0x10c   :  { %692 = vst.msk [vmem:[#allocation2 + $0x58] sm:$0xff] %vm680_vm5, %v607_v17  ;;  %v605_v1 = vpop.permute.xlu0 %604 }
 0x10d   :  { %691 = vst.msk [vmem:[#allocation2 + $0x50] sm:$0xff] %vm680_vm5, %v605_v1  ;;  %863 = vrot.lane.b32.xlu1 %v4138_v5, %s3556_s27 }
 0x10e   :  { %861 = vrot.lane.b32.xlu0 %v6620_v36, %s3556_s27 }
 0x10f   :  { %v611_v2 = vpop.permute.xlu1 %610 }
 0x110   :  { %694 = vst.msk [vmem:[#allocation2 + $0x68] sm:$0xff] %vm680_vm5, %v611_v2  ;;  %v609_v63 = vpop.permute.xlu0 %608  ;;  %v6623_v2 = vld [vmem:[#allocation36_spill] sm:$0xff] }
 0x111   :  { %693 = vst.msk [vmem:[#allocation2 + $0x60] sm:$0xff] %vm680_vm5, %v609_v63  ;;  %867 = vrot.lane.b32.xlu1 %v4151_v20, %s3556_s27 }
 0x112   :  { %865 = vrot.lane.b32.xlu0 %v6621_v44, %s3556_s27 }
 0x113   :  { %v615_v23 = vpop.permute.xlu1 %614 }
 0x114   :  { %696 = vst.msk [vmem:[#allocation2 + $0x78] sm:$0xff] %vm680_vm5, %v615_v23  ;;  %v613_v57 = vpop.permute.xlu0 %612 }
 0x115   :  { %695 = vst.msk [vmem:[#allocation2 + $0x70] sm:$0xff] %vm680_vm5, %v613_v57  ;;  %871 = vrot.lane.b32.xlu1 %v4164_v60, %s3556_s27  ;;  %v6624_v57 = vld [vmem:[#allocation38_spill] sm:$0xff]  ;;  %v851_v60 = vrot.slane %v4496_v39, 2 }
 0x116   :  { %869 = vrot.lane.b32.xlu0 %v6622_v12, %s3556_s27 }
 0x117   :  { %v619_v17 = vpop.permute.xlu1 %618 }
 0x118   :  { %698 = vst.msk [vmem:[#allocation2 + $0x88] sm:$0xff] %vm680_vm5, %v619_v17  ;;  %v617_v1 = vpop.permute.xlu0 %616 }
 0x119   :  { %697 = vst.msk [vmem:[#allocation2 + $0x80] sm:$0xff] %vm680_vm5, %v617_v1  ;;  %875 = vrot.lane.b32.xlu1 %v4177_v29, %s3556_s27  ;;  %v849_v29 = vrot.slane %v4402_v49, 2 }
 0x11a   :  { %873 = vrot.lane.b32.xlu0 %v6623_v2, %s3556_s27 }
 0x11b   :  { %v623_v63 = vpop.permute.xlu1 %622 }
 0x11c   :  { %700 = vst.msk [vmem:[#allocation2 + $0x98] sm:$0xff] %vm680_vm5, %v623_v63  ;;  %v621_v23 = vpop.permute.xlu0 %620  ;;  %v6625_v63 = vld [vmem:[#allocation40_spill] sm:$0xff] }
 0x11d   :  { %699 = vst.msk [vmem:[#allocation2 + $0x90] sm:$0xff] %vm680_vm5, %v621_v23  ;;  %879 = vrot.lane.b32.xlu1 %v4190_v6, %s3556_s27  ;;  %v4623_v6 = vld [vmem:[%s6468_s0 + $0x1b8] sm:$0xff] }
 0x11e   :  { %877 = vrot.lane.b32.xlu0 %v6624_v57, %s3556_s27  ;;  %v3260_v57 = vld [vmem:[%s6468_s0 + $0x1b0] sm:$0xff]  ;;  %1662 = vst.msk [vmem:[#allocation2 + $0x108] sm:$0xff] %vm81_vm1, %v4623_v6 }
 0x11f   :  { %v627_v17 = vpop.permute.xlu1 %626  ;;  %v1741_v47 = vrot.slane %v3260_v57, 1  ;;  %1661 = vst.msk [vmem:[#allocation2 + $0x100] sm:$0xff] %vm81_vm1, %v3260_v57 }
 0x120   :  { %702 = vst.msk [vmem:[#allocation2 + $0xa8] sm:$0xff] %vm680_vm5, %v627_v17  ;;  %v625_v1 = vpop.permute.xlu0 %624  ;;  %v6626_v17 = vld [vmem:[#allocation42_spill] sm:$0xff] }
 0x121   :  { %701 = vst.msk [vmem:[#allocation2 + $0xa0] sm:$0xff] %vm680_vm5, %v625_v1  ;;  %883 = vrot.lane.b32.xlu1 %v4203_v10, %s3556_s27  ;;  %v4605_v10 = vld [vmem:[%s6468_s0 + $0x278] sm:$0xff] }
 0x122   :  { %881 = vrot.lane.b32.xlu0 %v6625_v63, %s3556_s27  ;;  %1678 = vst.msk [vmem:[#allocation2 + $0x188] sm:$0xff] %vm81_vm1, %v4605_v10 }
 0x123   :  { %v631_v21 = vpop.permute.xlu1 %630 }
 0x124   :  { %704 = vst.msk [vmem:[#allocation2 + $0xb8] sm:$0xff] %vm680_vm5, %v631_v21  ;;  %v629_v23 = vpop.permute.xlu0 %628  ;;  %v6627_v21 = vld [vmem:[#allocation43_spill] sm:$0xff] }
 0x125   :  { %703 = vst.msk [vmem:[#allocation2 + $0xb0] sm:$0xff] %vm680_vm5, %v629_v23  ;;  %887 = vrot.lane.b32.xlu1 %v4216_v7, %s3556_s27  ;;  %v6629_v7 = vld [vmem:[#allocation45_spill] sm:$0xff] }
 0x126   :  { %885 = vrot.lane.b32.xlu0 %v6626_v17, %s3556_s27 }
 0x127   :  { %v635_v0 = vpop.permute.xlu1 %634 }
 0x128   :  { %706 = vst.msk [vmem:[#allocation2 + $0xc8] sm:$0xff] %vm680_vm5, %v635_v0  ;;  %v633_v1 = vpop.permute.xlu0 %632  ;;  %v6628_v0 = vld [vmem:[#allocation44_spill] sm:$0xff] }
 0x129   :  { %705 = vst.msk [vmem:[#allocation2 + $0xc0] sm:$0xff] %vm680_vm5, %v633_v1  ;;  %891 = vrot.lane.b32.xlu1 %v4229_v4, %s3556_s27 }
 0x12a   :  { %889 = vrot.lane.b32.xlu0 %v6627_v21, %s3556_s27 }
 0x12b   :  { %v639_v63 = vpop.permute.xlu1 %638 }
 0x12c   :  { %708 = vst.msk [vmem:[#allocation2 + $0xd8] sm:$0xff] %vm680_vm5, %v639_v63  ;;  %v637_v23 = vpop.permute.xlu0 %636  ;;  %v6630_v63 = vld [vmem:[#allocation46_spill] sm:$0xff] }
 0x12d   :  { %707 = vst.msk [vmem:[#allocation2 + $0xd0] sm:$0xff] %vm680_vm5, %v637_v23  ;;  %895 = vrot.lane.b32.xlu1 %v4242_v61, %s3556_s27  ;;  %v4600_v23 = vld [vmem:[%s6468_s0 + $0x270] sm:$0xff] }
 0x12e   :  { %893 = vrot.lane.b32.xlu0 %v6628_v0, %s3556_s27  ;;  %1677 = vst.msk [vmem:[#allocation2 + $0x180] sm:$0xff] %vm81_vm1, %v4600_v23 }
 0x12f   :  { %v643_v17 = vpop.permute.xlu1 %642 }
 0x130   :  { %710 = vst.msk [vmem:[#allocation2 + $0xe8] sm:$0xff] %vm680_vm5, %v643_v17  ;;  %v641_v1 = vpop.permute.xlu0 %640 }
 0x131   :  { %709 = vst.msk [vmem:[#allocation2 + $0xe0] sm:$0xff] %vm680_vm5, %v641_v1  ;;  %899 = vrot.lane.b32.xlu1 %v6629_v7, %s3556_s27 }
 0x132   :  { %897 = vrot.lane.b32.xlu0 %v6630_v63, %s3556_s27 }
 0x133   :  { %v647_v17 = vpop.permute.xlu1 %646 }
 0x134   :  { %712 = vst.msk [vmem:[#allocation2 + $0xf8] sm:$0xff] %vm680_vm5, %v647_v17  ;;  %v645_v1 = vpop.permute.xlu0 %644 }
 0x135   :  { %711 = vst.msk [vmem:[#allocation2 + $0xf0] sm:$0xff] %vm680_vm5, %v645_v1  ;;  %903 = vrot.lane.b32.xlu1 %v4268_v31, %s3556_s27  ;;  %v6550_v1 = vrot.slane %v4623_v6, 1 }
 0x136   :  { %901 = vrot.lane.b32.xlu0 %v4273_v55, %s3556_s27 }
 0x137   :  { %v722_v17 = vpop.permute.xlu1 %721  ;;  %v4636_v2 = vsel %vm162_vm0, %v1741_v47, %v6550_v1  ;;  %v4650_v47 = vsel %vm372_vm2, %v849_v29, %v851_v60 }
 0x138   :  { %817 = vst.msk [vmem:[#allocation2 + $0x8] sm:$0xff] %vm815_vm6, %v722_v17  ;;  %v720_v26 = vpop.permute.xlu0 %719  ;;  %v848_v17 = vrot.slane %v4407_v41, 2 }
 0x139   :  { %816 = vst.msk [vmem:[#allocation2] sm:$0xff] %vm815_vm6, %v720_v26  ;;  %907 = vrot.lane.b32.xlu1 %v4283_v35, %s3556_s27  ;;  %v1950_v35 = vrot.slane %v4623_v6, 2 }
 0x13a   :  { %905 = vrot.lane.b32.xlu0 %v4288_v52, %s3556_s27  ;;  %v4653_v39 = vsel %vm372_vm2, %v848_v17, %v849_v29  ;;  %v1949_v52 = vrot.slane %v3260_v57, 2 }
 0x13b   :  { %v726_v12 = vpop.permute.xlu1 %725 }
 0x13c   :  { %819 = vst.msk [vmem:[#allocation2 + $0x18] sm:$0xff] %vm815_vm6, %v726_v12  ;;  %v724_v26 = vpop.permute.xlu0 %723  ;;  %v4663_v60 = vsel %vm372_vm2, %v1949_v52, %v1950_v35 }
 0x13d   :  { %818 = vst.msk [vmem:[#allocation2 + $0x10] sm:$0xff] %vm815_vm6, %v724_v26  ;;  %911 = vrot.lane.b32.xlu1 %v4298_v9, %s3556_s27 }
 0x13e   :  { %909 = vrot.lane.b32.xlu0 %v4301_v18, %s3556_s27 }
 0x13f   :  { %v730_v1 = vpop.permute.xlu1 %729 }
 0x140   :  { %821 = vst.msk [vmem:[#allocation2 + $0x28] sm:$0xff] %vm815_vm6, %v730_v1  ;;  %v728_v12 = vpop.permute.xlu0 %727  ;;  %v4674_v1 = vld [vmem:[%s6468_s0 + $0x288] sm:$0xff] }
 0x141   :  { %820 = vst.msk [vmem:[#allocation2 + $0x20] sm:$0xff] %vm815_vm6, %v728_v12  ;;  %915 = vrot.lane.b32.xlu1 %v4650_v47, %s3556_s27  ;;  %v4707_v12 = vld [vmem:[%s6468_s0 + $0x1d0] sm:$0xff] }
 0x142   :  { %913 = vrot.lane.b32.xlu0 %v4653_v39, %s3556_s27  ;;  %1679 = vst.msk [vmem:[#allocation2 + $0x190] sm:$0xff] %vm81_vm1, %v4674_v1  ;;  %1664 = vst.msk [vmem:[#allocation2 + $0x118] sm:$0xff] %vm81_vm1, %v4707_v12 }
 0x143   :  { %v734_v29 = vpop.permute.xlu1 %733 }
 0x144   :  { %823 = vst.msk [vmem:[#allocation2 + $0x38] sm:$0xff] %vm815_vm6, %v734_v29  ;;  %v732_v57 = vpop.permute.xlu0 %731 }
 0x145   :  { %822 = vst.msk [vmem:[#allocation2 + $0x30] sm:$0xff] %vm815_vm6, %v732_v57  ;;  %986 = vrot.lane.b32.xlu1 %v3633_v11, %s3557_s12  ;;  %v4687_v11 = vld [vmem:[%s6468_s0 + $0x1c8] sm:$0xff] }
 0x146   :  { %984 = vrot.lane.b32.xlu0 %v3647_v15, %s3557_s12  ;;  %v4692_v15 = vld [vmem:[%s6468_s0 + $0x290] sm:$0xff]  ;;  %1663 = vst.msk [vmem:[#allocation2 + $0x110] sm:$0xff] %vm81_vm1, %v4687_v11 }
 0x147   :  { %v738_v52 = vpop.permute.xlu1 %737  ;;  %1680 = vst.msk [vmem:[#allocation2 + $0x198] sm:$0xff] %vm81_vm1, %v4692_v15 }
 0x148   :  { %825 = vst.msk [vmem:[#allocation2 + $0x48] sm:$0xff] %vm815_vm6, %v738_v52  ;;  %v736_v17 = vpop.permute.xlu0 %735 }
 0x149   :  { %824 = vst.msk [vmem:[#allocation2 + $0x40] sm:$0xff] %vm815_vm6, %v736_v17  ;;  %990 = vrot.lane.b32.xlu1 %v3663_v22, %s3557_s12  ;;  %v4771_v17 = vld [vmem:[%s6468_s0 + $0x1e8] sm:$0xff] }
 0x14a   :  { %988 = vrot.lane.b32.xlu0 %v3673_v24, %s3557_s12  ;;  %1666 = vst.msk [vmem:[#allocation2 + $0x128] sm:$0xff] %vm81_vm1, %v4771_v17 }
 0x14b   :  { %v742_v22 = vpop.permute.xlu1 %741 }
 0x14c   :  { %827 = vst.msk [vmem:[#allocation2 + $0x58] sm:$0xff] %vm815_vm6, %v742_v22  ;;  %v740_v26 = vpop.permute.xlu0 %739 }
 0x14d   :  { %826 = vst.msk [vmem:[#allocation2 + $0x50] sm:$0xff] %vm815_vm6, %v740_v26  ;;  %994 = vrot.lane.b32.xlu1 %v3690_v30, %s3557_s12 }
 0x14e   :  { %992 = vrot.lane.b32.xlu0 %v3700_v32, %s3557_s12 }
 0x14f   :  { %v746_v24 = vpop.permute.xlu1 %745 }
 0x150   :  { %829 = vst.msk [vmem:[#allocation2 + $0x68] sm:$0xff] %vm815_vm6, %v746_v24  ;;  %v744_v29 = vpop.permute.xlu0 %743 }
 0x151   :  { %828 = vst.msk [vmem:[#allocation2 + $0x60] sm:$0xff] %vm815_vm6, %v744_v29  ;;  %998 = vrot.lane.b32.xlu1 %v3718_v38, %s3557_s12 }
 0x152   :  { %996 = vrot.lane.b32.xlu0 %v3728_v40, %s3557_s12 }
 0x153   :  { %v750_v30 = vpop.permute.xlu1 %749 }
 0x154   :  { %831 = vst.msk [vmem:[#allocation2 + $0x78] sm:$0xff] %vm815_vm6, %v750_v30  ;;  %v748_v57 = vpop.permute.xlu0 %747 }
 0x155   :  { %830 = vst.msk [vmem:[#allocation2 + $0x70] sm:$0xff] %vm815_vm6, %v748_v57  ;;  %1002 = vrot.lane.b32.xlu1 %v3746_v46, %s3557_s12  ;;  %v4738_v46 = vld [vmem:[%s6468_s0 + $0x2a0] sm:$0xff]  ;;  %v6631_v57 = vld [vmem:[#allocation6_spill] sm:$0xff] }
 0x156   :  { %1000 = vrot.lane.b32.xlu0 %v3756_v48, %s3557_s12  ;;  %1681 = vst.msk [vmem:[#allocation2 + $0x1a0] sm:$0xff] %vm81_vm1, %v4738_v46 }
 0x157   :  { %v754_v32 = vpop.permute.xlu1 %753 }
 0x158   :  { %833 = vst.msk [vmem:[#allocation2 + $0x88] sm:$0xff] %vm815_vm6, %v754_v32  ;;  %v752_v52 = vpop.permute.xlu0 %751 }
 0x159   :  { %832 = vst.msk [vmem:[#allocation2 + $0x80] sm:$0xff] %vm815_vm6, %v752_v52  ;;  %1006 = vrot.lane.b32.xlu1 %v3774_v54, %s3557_s12 }
 0x15a   :  { %1004 = vrot.lane.b32.xlu0 %v3784_v56, %s3557_s12  ;;  %v4751_v56 = vld [vmem:[%s6468_s0 + $0x1e0] sm:$0xff] }
 0x15b   :  { %v758_v38 = vpop.permute.xlu1 %757  ;;  %1665 = vst.msk [vmem:[#allocation2 + $0x120] sm:$0xff] %vm81_vm1, %v4751_v56 }
 0x15c   :  { %835 = vst.msk [vmem:[#allocation2 + $0x98] sm:$0xff] %vm815_vm6, %v758_v38  ;;  %v756_v40 = vpop.permute.xlu0 %755 }
 0x15d   :  { %834 = vst.msk [vmem:[#allocation2 + $0x90] sm:$0xff] %vm815_vm6, %v756_v40  ;;  %1010 = vrot.lane.b32.xlu1 %v3802_v62, %s3557_s12  ;;  %v4756_v62 = vld [vmem:[%s6468_s0 + $0x2a8] sm:$0xff] }
 0x15e   :  { %1008 = vrot.lane.b32.xlu0 %v3812_v3, %s3557_s12  ;;  %1682 = vst.msk [vmem:[#allocation2 + $0x1a8] sm:$0xff] %vm81_vm1, %v4756_v62 }
 0x15f   :  { %v762_v48 = vpop.permute.xlu1 %761 }
 0x160   :  { %837 = vst.msk [vmem:[#allocation2 + $0xa8] sm:$0xff] %vm815_vm6, %v762_v48  ;;  %v760_v54 = vpop.permute.xlu0 %759  ;;  %v6635_v48 = vld [vmem:[#allocation10_spill] sm:$0xff] }
 0x161   :  { %836 = vst.msk [vmem:[#allocation2 + $0xa0] sm:$0xff] %vm815_vm6, %v760_v54  ;;  %1014 = vrot.lane.b32.xlu1 %v3830_v16, %s3557_s12 }
 0x162   :  { %1012 = vrot.lane.b32.xlu0 %v3840_v19, %s3557_s12 }
 0x163   :  { %v766_v3 = vpop.permute.xlu1 %765 }
 0x164   :  { %839 = vst.msk [vmem:[#allocation2 + $0xb8] sm:$0xff] %vm815_vm6, %v766_v3  ;;  %v764_v16 = vpop.permute.xlu0 %763 }
 0x165   :  { %838 = vst.msk [vmem:[#allocation2 + $0xb0] sm:$0xff] %vm815_vm6, %v764_v16  ;;  %1018 = vrot.lane.b32.xlu1 %v3858_v34, %s3557_s12  ;;  %v6636_v16 = vld [vmem:[#allocation11_spill] sm:$0xff] }
 0x166   :  { %1016 = vrot.lane.b32.xlu0 %v3868_v37, %s3557_s12 }
 0x167   :  { %v770_v19 = vpop.permute.xlu1 %769 }
 0x168   :  { %841 = vst.msk [vmem:[#allocation2 + $0xc8] sm:$0xff] %vm815_vm6, %v770_v19  ;;  %v768_v22 = vpop.permute.xlu0 %767  ;;  %v6637_v19 = vld [vmem:[#allocation12_spill] sm:$0xff] }
 0x169   :  { %840 = vst.msk [vmem:[#allocation2 + $0xc0] sm:$0xff] %vm815_vm6, %v768_v22  ;;  %1022 = vrot.lane.b32.xlu1 %v3873_v42, %s3557_s12 }
 0x16a   :  { %1020 = vrot.lane.b32.xlu0 %v3878_v43, %s3557_s12 }
 0x16b   :  { %v774_v34 = vpop.permute.xlu1 %773 }
 0x16c   :  { %843 = vst.msk [vmem:[#allocation2 + $0xd8] sm:$0xff] %vm815_vm6, %v774_v34  ;;  %v772_v26 = vpop.permute.xlu0 %771 }
 0x16d   :  { %842 = vst.msk [vmem:[#allocation2 + $0xd0] sm:$0xff] %vm815_vm6, %v772_v26  ;;  %1026 = vrot.lane.b32.xlu1 %v3883_v45, %s3557_s12  ;;  %v6638_v26 = vld [vmem:[#allocation13_spill] sm:$0xff] }
 0x16e   :  { %1024 = vrot.lane.b32.xlu0 %v3888_v50, %s3557_s12 }
 0x16f   :  { %v778_v37 = vpop.permute.xlu1 %777 }
 0x170   :  { %845 = vst.msk [vmem:[#allocation2 + $0xe8] sm:$0xff] %vm815_vm6, %v778_v37  ;;  %v776_v24 = vpop.permute.xlu0 %775  ;;  %v6639_v37 = vld [vmem:[#allocation14_spill] sm:$0xff] }
 0x171   :  { %844 = vst.msk [vmem:[#allocation2 + $0xe0] sm:$0xff] %vm815_vm6, %v776_v24  ;;  %1030 = vrot.lane.b32.xlu1 %v3895_v51, %s3557_s12 }
 0x172   :  { %1028 = vrot.lane.b32.xlu0 %v3900_v53, %s3557_s12 }
 0x173   :  { %v782_v42 = vpop.permute.xlu1 %781 }
 0x174   :  { %847 = vst.msk [vmem:[#allocation2 + $0xf8] sm:$0xff] %vm815_vm6, %v782_v42  ;;  %v780_v43 = vpop.permute.xlu0 %779 }
 0x175   :  { %846 = vst.msk [vmem:[#allocation2 + $0xf0] sm:$0xff] %vm815_vm6, %v780_v43  ;;  %1034 = vrot.lane.b32.xlu1 %v3905_v58, %s3557_s12  ;;  %v79_v58 = vld [vmem:[%s6468_s0 + $0x1a0] sm:$0xff]  ;;  %v6640_v43 = vld [vmem:[#allocation15_spill] sm:$0xff] }
 0x176   :  { %1032 = vrot.lane.b32.xlu0 %v3917_v8, %s3557_s12 }
 0x177   :  { %v856_v45 = vpop.permute.xlu1 %855 }
 0x178   :  { %951 = vst.msk [vmem:[#allocation2 + $0x8] sm:$0xff] %vm949_vm7, %v856_v45  ;;  %v854_v50 = vpop.permute.xlu0 %853  ;;  %v6641_v45 = vld [vmem:[#allocation16_spill] sm:$0xff] }
 0x179   :  { %950 = vst.msk [vmem:[#allocation2] sm:$0xff] %vm949_vm7, %v854_v50  ;;  %1038 = vrot.lane.b32.xlu1 %v3922_v13, %s3557_s12 }
 0x17a   :  { %1036 = vrot.lane.b32.xlu0 %v3927_v27, %s3557_s12  ;;  %v78_v27 = vld [vmem:[%s6468_s0 + $0x198] sm:$0xff] }
 0x17b   :  { %v860_v51 = vpop.permute.xlu1 %859 }
 0x17c   :  { %953 = vst.msk [vmem:[#allocation2 + $0x18] sm:$0xff] %vm949_vm7, %v860_v51  ;;  %v858_v53 = vpop.permute.xlu0 %857 }
 0x17d   :  { %952 = vst.msk [vmem:[#allocation2 + $0x10] sm:$0xff] %vm949_vm7, %v858_v53  ;;  %1042 = vrot.lane.b32.xlu1 %v4402_v49, %s3557_s12  ;;  %v6642_v53 = vld [vmem:[#allocation17_spill] sm:$0xff] }
 0x17e   :  { %1040 = vrot.lane.b32.xlu0 %v4407_v41, %s3557_s12 }
 0x17f   :  { %v864_v8 = vpop.permute.xlu1 %863 }
 0x180   :  { %955 = vst.msk [vmem:[#allocation2 + $0x28] sm:$0xff] %vm949_vm7, %v864_v8  ;;  %v862_v13 = vpop.permute.xlu0 %861 }
 0x181   :  { %954 = vst.msk [vmem:[#allocation2 + $0x20] sm:$0xff] %vm949_vm7, %v862_v13  ;;  %1046 = vrot.lane.b32.xlu1 %v79_v58, %s3557_s12  ;;  %v6643_v58 = vld [vmem:[#allocation18_spill] sm:$0xff]  ;;  %v6644_v13 = vld [vmem:[#allocation19_spill] sm:$0xff] }
 0x182   :  { %1044 = vrot.lane.b32.xlu0 %v78_v27, %s3557_s12 }
 0x183   :  { %v868_v49 = vpop.permute.xlu1 %867 }
 0x184   :  { %957 = vst.msk [vmem:[#allocation2 + $0x38] sm:$0xff] %vm949_vm7, %v868_v49  ;;  %v866_v41 = vpop.permute.xlu0 %865  ;;  %v4878_v49 = vld [vmem:[%s6468_s0 + $0x2b8] sm:$0xff] }
 0x185   :  { %956 = vst.msk [vmem:[#allocation2 + $0x30] sm:$0xff] %vm949_vm7, %v866_v41  ;;  %1121 = vrot.lane.b32.xlu1 %v3679_v25, %s3558_s14  ;;  %v6632_v25 = vld [vmem:[#allocation7_spill] sm:$0xff]  ;;  %v6645_v41 = vld [vmem:[#allocation20_spill] sm:$0xff] }
 0x186   :  { %1119 = vrot.lane.b32.xlu0 %v3684_v28, %s3558_s14  ;;  %v6633_v28 = vld [vmem:[#allocation8_spill] sm:$0xff]  ;;  %1683 = vst.msk [vmem:[#allocation2 + $0x1b0] sm:$0xff] %vm81_vm1, %v4878_v49 }
 0x187   :  { %v872_v29 = vpop.permute.xlu1 %871 }
 0x188   :  { %959 = vst.msk [vmem:[#allocation2 + $0x48] sm:$0xff] %vm949_vm7, %v872_v29  ;;  %v870_v30 = vpop.permute.xlu0 %869 }
 0x189   :  { %958 = vst.msk [vmem:[#allocation2 + $0x40] sm:$0xff] %vm949_vm7, %v870_v30  ;;  %1125 = vrot.lane.b32.xlu1 %v3707_v33, %s3558_s14  ;;  %v6634_v33 = vld [vmem:[#allocation9_spill] sm:$0xff] }
 0x18a   :  { %1123 = vrot.lane.b32.xlu0 %v6631_v57, %s3558_s14  ;;  %v6646_v57 = vld [vmem:[#allocation21_spill] sm:$0xff] }
 0x18b   :  { %v876_v32 = vpop.permute.xlu1 %875 }
 0x18c   :  { %961 = vst.msk [vmem:[#allocation2 + $0x58] sm:$0xff] %vm949_vm7, %v876_v32  ;;  %v874_v52 = vpop.permute.xlu0 %873  ;;  %v4891_v32 = vld [vmem:[%s6468_s0 + $0x1f8] sm:$0xff] }
 0x18d   :  { %960 = vst.msk [vmem:[#allocation2 + $0x50] sm:$0xff] %vm949_vm7, %v874_v52  ;;  %1129 = vrot.lane.b32.xlu1 %v6632_v25, %s3558_s14  ;;  %v4896_v52 = vld [vmem:[%s6468_s0 + $0x2c0] sm:$0xff]  ;;  %v6647_v25 = vld [vmem:[#allocation22_spill] sm:$0xff] }
 0x18e   :  { %1127 = vrot.lane.b32.xlu0 %v6633_v28, %s3558_s14  ;;  %1667 = vst.msk [vmem:[#allocation2 + $0x130] sm:$0xff] %vm81_vm1, %v4891_v32  ;;  %1684 = vst.msk [vmem:[#allocation2 + $0x1b8] sm:$0xff] %vm81_vm1, %v4896_v52 }
 0x18f   :  { %v880_v38 = vpop.permute.xlu1 %879 }
 0x190   :  { %963 = vst.msk [vmem:[#allocation2 + $0x68] sm:$0xff] %vm949_vm7, %v880_v38  ;;  %v878_v40 = vpop.permute.xlu0 %877 }
 0x191   :  { %962 = vst.msk [vmem:[#allocation2 + $0x60] sm:$0xff] %vm949_vm7, %v878_v40  ;;  %1133 = vrot.lane.b32.xlu1 %v6634_v33, %s3558_s14  ;;  %v6648_v40 = vld [vmem:[#allocation23_spill] sm:$0xff]  ;;  %v4911_v33 = vld [vmem:[%s6468_s0 + $0x200] sm:$0xff] }
 0x192   :  { %1131 = vrot.lane.b32.xlu0 %v6635_v48, %s3558_s14  ;;  %v6649_v48 = vld [vmem:[#allocation24_spill] sm:$0xff]  ;;  %1668 = vst.msk [vmem:[#allocation2 + $0x138] sm:$0xff] %vm81_vm1, %v4911_v33 }
 0x193   :  { %v884_v54 = vpop.permute.xlu1 %883 }
 0x194   :  { %965 = vst.msk [vmem:[#allocation2 + $0x78] sm:$0xff] %vm949_vm7, %v884_v54  ;;  %v882_v3 = vpop.permute.xlu0 %881  ;;  %v1781_v54 = vrot.slane %v4600_v23, 1 }
 0x195   :  { %964 = vst.msk [vmem:[#allocation2 + $0x70] sm:$0xff] %vm949_vm7, %v882_v3  ;;  %1137 = vrot.lane.b32.xlu1 %v6636_v16, %s3558_s14  ;;  %v1782_v3 = vrot.slane %v4605_v10, 1 }
 0x196   :  { %1135 = vrot.lane.b32.xlu0 %v6637_v19, %s3558_s14 }
 0x197   :  { %v888_v22 = vpop.permute.xlu1 %887 }
 0x198   :  { %967 = vst.msk [vmem:[#allocation2 + $0x88] sm:$0xff] %vm949_vm7, %v888_v22  ;;  %v886_v34 = vpop.permute.xlu0 %885  ;;  %v3286_v22 = vld [vmem:[%s6468_s0 + $0x280] sm:$0x3] }
 0x199   :  { %966 = vst.msk [vmem:[#allocation2 + $0x80] sm:$0xff] %vm949_vm7, %v886_v34  ;;  %1141 = vrot.lane.b32.xlu1 %v6638_v26, %s3558_s14  ;;  %v6650_v34 = vld [vmem:[#allocation25_spill] sm:$0xff]  ;;  %v6651_v26 = vld [vmem:[#allocation26_spill] sm:$0xff] }
 0x19a   :  { %1139 = vrot.lane.b32.xlu0 %v6639_v37, %s3558_s14  ;;  %v4929_v37 = vsel %vm162_vm0, %v1781_v54, %v1782_v3 }
 0x19b   :  { %v892_v24 = vpop.permute.xlu1 %891 }
 0x19c   :  { %969 = vst.msk [vmem:[#allocation2 + $0x98] sm:$0xff] %vm949_vm7, %v892_v24  ;;  %v890_v42 = vpop.permute.xlu0 %889 }
 0x19d   :  { %968 = vst.msk [vmem:[#allocation2 + $0x90] sm:$0xff] %vm949_vm7, %v890_v42  ;;  %1145 = vrot.lane.b32.xlu1 %v6640_v43, %s3558_s14  ;;  %v1784_v42 = vrot.slane %v3286_v22, 1 }
 0x19e   :  { %1143 = vrot.lane.b32.xlu0 %v6641_v45, %s3558_s14  ;;  %v3262_v45 = vld [vmem:[%s6468_s0 + $0x1c0] sm:$0x3] }
 0x19f   :  { %v896_v50 = vpop.permute.xlu1 %895 }
 0x1a0   :  { %971 = vst.msk [vmem:[#allocation2 + $0xa8] sm:$0xff] %vm949_vm7, %v896_v50  ;;  %v894_v51 = vpop.permute.xlu0 %893  ;;  %v6652_v50 = vld [vmem:[#allocation28_spill] sm:$0xff] }
 0x1a1   :  { %970 = vst.msk [vmem:[#allocation2 + $0xa0] sm:$0xff] %vm949_vm7, %v894_v51  ;;  %1149 = vrot.lane.b32.xlu1 %v6642_v53, %s3558_s14  ;;  %v1989_v51 = vrot.slane %v4600_v23, 2  ;;  %v1990_v53 = vrot.slane %v4605_v10, 2 }
 0x1a2   :  { %1147 = vrot.lane.b32.xlu0 %v6643_v58, %s3558_s14 }
 0x1a3   :  { %v900_v8 = vpop.permute.xlu1 %899 }
 0x1a4   :  { %973 = vst.msk [vmem:[#allocation2 + $0xb8] sm:$0xff] %vm949_vm7, %v900_v8  ;;  %v898_v27 = vpop.permute.xlu0 %897  ;;  %v4943_v8 = vsel %vm162_vm0, %v1782_v3, %v1784_v42 }
 0x1a5   :  { %972 = vst.msk [vmem:[#allocation2 + $0xb0] sm:$0xff] %vm949_vm7, %v898_v27  ;;  %1153 = vrot.lane.b32.xlu1 %v6644_v13, %s3558_s14  ;;  %v1744_v27 = vrot.slane %v3262_v45, 1 }
 0x1a6   :  { %1151 = vrot.lane.b32.xlu0 %v6645_v41, %s3558_s14  ;;  %v4952_v41 = vsel %vm372_vm2, %v1989_v51, %v1990_v53 }
 0x1a7   :  { %v904_v29 = vpop.permute.xlu1 %903 }
 0x1a8   :  { %975 = vst.msk [vmem:[#allocation2 + $0xc8] sm:$0xff] %vm949_vm7, %v904_v29  ;;  %v902_v30 = vpop.permute.xlu0 %901 }
 0x1a9   :  { %974 = vst.msk [vmem:[#allocation2 + $0xc0] sm:$0xff] %vm949_vm7, %v902_v30  ;;  %1157 = vrot.lane.b32.xlu1 %v6646_v57, %s3558_s14  ;;  %v6653_v30 = vrot.slane %v4623_v6, 1 }
 0x1aa   :  { %1155 = vrot.lane.b32.xlu0 %v6647_v25, %s3558_s14  ;;  %v1992_v25 = vrot.slane %v3286_v22, 2 }
 0x1ab   :  { %v908_v28 = vpop.permute.xlu1 %907  ;;  %v1745_v57 = vsel %vm162_vm0, %v6653_v30, %v1744_v27 }
 0x1ac   :  { %977 = vst.msk [vmem:[#allocation2 + $0xd8] sm:$0xff] %vm949_vm7, %v908_v28  ;;  %v906_v38 = vpop.permute.xlu0 %905 }
 0x1ad   :  { %976 = vst.msk [vmem:[#allocation2 + $0xd0] sm:$0xff] %vm949_vm7, %v906_v38  ;;  %1161 = vrot.lane.b32.xlu1 %v6648_v40, %s3558_s14  ;;  %v4963_v38 = vsel %vm372_vm2, %v1990_v53, %v1992_v25  ;;  %v1952_v40 = vrot.slane %v3262_v45, 2  ;;  %v1994_v53 = vrot.slane %v4674_v1, 2  ;;  %v1955_v25 = vrot.slane %v4707_v12, 2 }
 0x1ae   :  { %1159 = vrot.lane.b32.xlu0 %v6649_v48, %s3558_s14 }
 0x1af   :  { %v912_v16 = vpop.permute.xlu1 %911  ;;  %v1953_v3 = vsel %vm372_vm2, %v1950_v35, %v1952_v40  ;;  %v3289_v35 = vld [vmem:[%s6468_s0 + $0x298] sm:$0x3] }
 0x1b0   :  { %979 = vst.msk [vmem:[#allocation2 + $0xe8] sm:$0xff] %vm949_vm7, %v912_v16  ;;  %v910_v19 = vpop.permute.xlu0 %909 }
 0x1b1   :  { %978 = vst.msk [vmem:[#allocation2 + $0xe0] sm:$0xff] %vm949_vm7, %v910_v19  ;;  %1165 = vrot.lane.b32.xlu1 %v6650_v34, %s3558_s14  ;;  %v1787_v19 = vrot.slane %v4692_v15, 1  ;;  %v1746_v34 = vrot.slane %v4687_v11, 1 }
 0x1b2   :  { %1163 = vrot.lane.b32.xlu0 %v6651_v26, %s3558_s14 }
 0x1b3   :  { %v916_v24 = vpop.permute.xlu1 %915 }
 0x1b4   :  { %981 = vst.msk [vmem:[#allocation2 + $0xf8] sm:$0xff] %vm949_vm7, %v916_v24  ;;  %v914_v43 = vpop.permute.xlu0 %913  ;;  %v1747_v24 = vrot.slane %v4707_v12, 1 }
 0x1b5   :  { %980 = vst.msk [vmem:[#allocation2 + $0xf0] sm:$0xff] %vm949_vm7, %v914_v43  ;;  %1853 = vrot.lane.b32.xlu1 %v4929_v37, %s3552_s11  ;;  %v1789_v43 = vrot.slane %v3289_v35, 1 }
 0x1b6   :  { %1167 = vrot.lane.b32.xlu0 %v6652_v50, %s3558_s14  ;;  %v3265_v50 = vld [vmem:[%s6468_s0 + $0x1d8] sm:$0x3]  ;;  %v5005_v51 = vsel %vm162_vm0, %v1746_v34, %v1747_v24  ;;  %v1792_v34 = vrot.slane %v4756_v62, 1 }
 0x1b7   :  { %v987_v58 = vpop.permute.xlu1 %986 }
 0x1b8   :  { %1082 = vst.msk [vmem:[#allocation2 + $0x8] sm:$0xff] %vm1080_vm8, %v987_v58  ;;  %v985_v13 = vpop.permute.xlu0 %984  ;;  %v1995_v58 = vrot.slane %v4692_v15, 2 }
 0x1b9   :  { %1081 = vst.msk [vmem:[#allocation2] sm:$0xff] %vm1080_vm8, %v985_v13  ;;  %1821 = vrot.lane.b32.xlu1 %v4636_v2, %s3552_s11  ;;  %v5010_v13 = vsel %vm162_vm0, %v1787_v19, %v1789_v43  ;;  %v3292_v43 = vld [vmem:[%s6468_s0 + $0x2b0] sm:$0x3] }
 0x1ba   :  { %1855 = vrot.lane.b32.xlu0 %v4943_v8, %s3552_s11 }
 0x1bb   :  { %v991_v29 = vpop.permute.xlu1 %990 }
 0x1bc   :  { %1084 = vst.msk [vmem:[#allocation2 + $0x18] sm:$0xff] %vm1080_vm8, %v991_v29  ;;  %v989_v28 = vpop.permute.xlu0 %988  ;;  %v1749_v29 = vrot.slane %v3265_v50, 1 }
 0x1bd   :  { %1083 = vst.msk [vmem:[#allocation2 + $0x10] sm:$0xff] %vm1080_vm8, %v989_v28  ;;  %2061 = vrot.lane.b32.xlu1 %v4952_v41, %s3553_s18  ;;  %v5021_v28 = vsel %vm372_vm2, %v1994_v53, %v1995_v58  ;;  %v1794_v53 = vrot.slane %v3292_v43, 1 }
 0x1be   :  { %1823 = vrot.lane.b32.xlu0 %v1745_v57, %s3552_s11  ;;  %v1954_v57 = vrot.slane %v4687_v11, 2  ;;  %v5024_v40 = vsel %vm162_vm0, %v1747_v24, %v1749_v29  ;;  %v1752_v29 = vrot.slane %v4771_v17, 1 }
 0x1bf   :  { %v995_v2 = vpop.permute.xlu1 %994 }
 0x1c0   :  { %1086 = vst.msk [vmem:[#allocation2 + $0x28] sm:$0xff] %vm1080_vm8, %v995_v2  ;;  %v993_v48 = vpop.permute.xlu0 %992 }
 0x1c1   :  { %1085 = vst.msk [vmem:[#allocation2 + $0x20] sm:$0xff] %vm1080_vm8, %v993_v48  ;;  %2029 = vrot.lane.b32.xlu1 %v4663_v60, %s3553_s18  ;;  %v1786_v60 = vrot.slane %v4674_v1, 1  ;;  %v1997_v48 = vrot.slane %v3289_v35, 2  ;;  %v1791_v35 = vrot.slane %v4738_v46, 1 }
 0x1c2   :  { %2063 = vrot.lane.b32.xlu0 %v4963_v38, %s3553_s18 }
 0x1c3   :  { %v999_v54 = vpop.permute.xlu1 %998  ;;  %v4992_v26 = vsel %vm162_vm0, %v1786_v60, %v1787_v19 }
 0x1c4   :  { %1088 = vst.msk [vmem:[#allocation2 + $0x38] sm:$0xff] %vm1080_vm8, %v999_v54  ;;  %v997_v16 = vpop.permute.xlu0 %996 }
 0x1c5   :  { %1087 = vst.msk [vmem:[#allocation2 + $0x30] sm:$0xff] %vm1080_vm8, %v997_v16  ;;  %2191 = vrot.lane.b32.xlu1 %v4674_v1, %s3554_s19  ;;  %v1957_v16 = vrot.slane %v3265_v50, 2 }
 0x1c6   :  { %2031 = vrot.lane.b32.xlu0 %v1953_v3, %s3553_s18  ;;  %v5036_v3 = vsel %vm372_vm2, %v1995_v58, %v1997_v48 }
 0x1c7   :  { %v1003_v22 = vpop.permute.xlu1 %1002 }
 0x1c8   :  { %1090 = vst.msk [vmem:[#allocation2 + $0x48] sm:$0xff] %vm1080_vm8, %v1003_v22  ;;  %v1001_v6 = vpop.permute.xlu0 %1000  ;;  %v5045_v22 = vsel %vm372_vm2, %v1955_v25, %v1957_v16 }
 0x1c9   :  { %1089 = vst.msk [vmem:[#allocation2 + $0x40] sm:$0xff] %vm1080_vm8, %v1001_v6  ;;  %2159 = vrot.lane.b32.xlu1 %v4687_v11, %s3554_s19  ;;  %v5033_v11 = vsel %vm372_vm2, %v1954_v57, %v1955_v25  ;;  %v5076_v57 = vsel %vm162_vm0, %v1792_v34, %v1794_v53 }
 0x1ca   :  { %2193 = vrot.lane.b32.xlu0 %v4692_v15, %s3554_s19 }
 0x1cb   :  { %v1007_v42 = vpop.permute.xlu1 %1006 }
 0x1cc   :  { %1092 = vst.msk [vmem:[#allocation2 + $0x58] sm:$0xff] %vm1080_vm8, %v1007_v42  ;;  %v1005_v45 = vpop.permute.xlu0 %1004 }
 0x1cd   :  { %1091 = vst.msk [vmem:[#allocation2 + $0x50] sm:$0xff] %vm1080_vm8, %v1005_v45  ;;  %2325 = vrot.lane.b32.xlu1 %v4992_v26, %s3555_s24  ;;  %v5065_v45 = vsel %vm162_vm0, %v1791_v35, %v1792_v34 }
 0x1ce   :  { %2161 = vrot.lane.b32.xlu0 %v4707_v12, %s3554_s19 }
 0x1cf   :  { %v1011_v27 = vpop.permute.xlu1 %1010 }
 0x1d0   :  { %1094 = vst.msk [vmem:[#allocation2 + $0x68] sm:$0xff] %vm1080_vm8, %v1011_v27  ;;  %v1009_v30 = vpop.permute.xlu0 %1008  ;;  %v1751_v27 = vrot.slane %v4751_v56, 1 }
 0x1d1   :  { %1093 = vst.msk [vmem:[#allocation2 + $0x60] sm:$0xff] %vm1080_vm8, %v1009_v30  ;;  %2293 = vrot.lane.b32.xlu1 %v5005_v51, %s3555_s24 }
 0x1d2   :  { %2327 = vrot.lane.b32.xlu0 %v5010_v13, %s3555_s24  ;;  %v5088_v48 = vsel %vm162_vm0, %v1751_v27, %v1752_v29  ;;  %v5141_v27 = vld [vmem:[%s6468_s0 + $0x218] sm:$0xff] }
 0x1d3   :  { %v1015_v2 = vpop.permute.xlu1 %1014  ;;  %1670 = vst.msk [vmem:[#allocation2 + $0x148] sm:$0xff] %vm81_vm1, %v5141_v27 }
 0x1d4   :  { %1096 = vst.msk [vmem:[#allocation2 + $0x78] sm:$0xff] %vm1080_vm8, %v1015_v2  ;;  %v1013_v54 = vpop.permute.xlu0 %1012  ;;  %v3268_v2 = vld [vmem:[%s6468_s0 + $0x1f0] sm:$0x3] }
 0x1d5   :  { %1095 = vst.msk [vmem:[#allocation2 + $0x70] sm:$0xff] %vm1080_vm8, %v1013_v54  ;;  %2458 = vrot.lane.b32.xlu1 %v5021_v28, %s3556_s27  ;;  %v1999_v54 = vrot.slane %v4738_v46, 2 }
 0x1d6   :  { %2295 = vrot.lane.b32.xlu0 %v5024_v40, %s3555_s24 }
 0x1d7   :  { %v1019_v12 = vpop.permute.xlu1 %1018 }
 0x1d8   :  { %1098 = vst.msk [vmem:[#allocation2 + $0x88] sm:$0xff] %vm1080_vm8, %v1019_v12  ;;  %v1017_v60 = vpop.permute.xlu0 %1016  ;;  %v2000_v12 = vrot.slane %v4756_v62, 2 }
 0x1d9   :  { %1097 = vst.msk [vmem:[#allocation2 + $0x80] sm:$0xff] %vm1080_vm8, %v1017_v60  ;;  %2426 = vrot.lane.b32.xlu1 %v5033_v11, %s3556_s27  ;;  %v1754_v60 = vrot.slane %v3268_v2, 1 }
 0x1da   :  { %2460 = vrot.lane.b32.xlu0 %v5036_v3, %s3556_s27 }
 0x1db   :  { %v1023_v19 = vpop.permute.xlu1 %1022  ;;  %v5109_v34 = vsel %vm162_vm0, %v1752_v29, %v1754_v60  ;;  %v1959_v29 = vrot.slane %v4751_v56, 2 }
 0x1dc   :  { %1100 = vst.msk [vmem:[#allocation2 + $0x98] sm:$0xff] %vm1080_vm8, %v1023_v19  ;;  %v1021_v6 = vpop.permute.xlu0 %1020 }
 0x1dd   :  { %1099 = vst.msk [vmem:[#allocation2 + $0x90] sm:$0xff] %vm1080_vm8, %v1021_v6  ;;  %2588 = vrot.lane.b32.xlu1 %v4738_v46, %s3557_s12  ;;  %v5104_v6 = vsel %vm372_vm2, %v1999_v54, %v2000_v12 }
 0x1de   :  { %2428 = vrot.lane.b32.xlu0 %v5045_v22, %s3556_s27 }
 0x1df   :  { %v1027_v24 = vpop.permute.xlu1 %1026 }
 0x1e0   :  { %1102 = vst.msk [vmem:[#allocation2 + $0xa8] sm:$0xff] %vm1080_vm8, %v1027_v24  ;;  %v1025_v42 = vpop.permute.xlu0 %1024  ;;  %v2002_v24 = vrot.slane %v3292_v43, 2 }
 0x1e1   :  { %1101 = vst.msk [vmem:[#allocation2 + $0xa0] sm:$0xff] %vm1080_vm8, %v1025_v42  ;;  %2556 = vrot.lane.b32.xlu1 %v4751_v56, %s3557_s12 }
 0x1e2   :  { %2590 = vrot.lane.b32.xlu0 %v4756_v62, %s3557_s12  ;;  %v5132_v53 = vsel %vm372_vm2, %v2000_v12, %v2002_v24 }
 0x1e3   :  { %v1031_v50 = vpop.permute.xlu1 %1030 }
 0x1e4   :  { %1104 = vst.msk [vmem:[#allocation2 + $0xb8] sm:$0xff] %vm1080_vm8, %v1031_v50  ;;  %v1029_v58 = vpop.permute.xlu0 %1028  ;;  %v5123_v50 = vld [vmem:[%s6468_s0 + $0x2d8] sm:$0xff] }
 0x1e5   :  { %1103 = vst.msk [vmem:[#allocation2 + $0xb0] sm:$0xff] %vm1080_vm8, %v1029_v58  ;;  %2722 = vrot.lane.b32.xlu1 %v5065_v45, %s3558_s14 }
 0x1e6   :  { %2558 = vrot.lane.b32.xlu0 %v4771_v17, %s3557_s12  ;;  %1686 = vst.msk [vmem:[#allocation2 + $0x1c8] sm:$0xff] %vm81_vm1, %v5123_v50 }
 0x1e7   :  { %v1035_v30 = vpop.permute.xlu1 %1034 }
 0x1e8   :  { %1106 = vst.msk [vmem:[#allocation2 + $0xc8] sm:$0xff] %vm1080_vm8, %v1035_v30  ;;  %v1033_v25 = vpop.permute.xlu0 %1032  ;;  %v1960_v30 = vrot.slane %v4771_v17, 2 }
 0x1e9   :  { %1105 = vst.msk [vmem:[#allocation2 + $0xc0] sm:$0xff] %vm1080_vm8, %v1033_v25  ;;  %1285 = vrot.lane.b32.xlu1 %v6627_v21, %s3559_s17  ;;  %v5099_v21 = vld [vmem:[%s6468_s0 + $0x2d0] sm:$0xff] }
 0x1ea   :  { %2724 = vrot.lane.b32.xlu0 %v5076_v57, %s3558_s14  ;;  %1685 = vst.msk [vmem:[#allocation2 + $0x1c0] sm:$0xff] %vm81_vm1, %v5099_v21  ;;  %v5156_v54 = vsel %vm372_vm2, %v1959_v29, %v1960_v30 }
 0x1eb   :  { %v1039_v16 = vpop.permute.xlu1 %1038 }
 0x1ec   :  { %1108 = vst.msk [vmem:[#allocation2 + $0xd8] sm:$0xff] %vm1080_vm8, %v1039_v16  ;;  %v1037_v19 = vpop.permute.xlu0 %1036  ;;  %v1962_v16 = vrot.slane %v3268_v2, 2 }
 0x1ed   :  { %1107 = vst.msk [vmem:[#allocation2 + $0xd0] sm:$0xff] %vm1080_vm8, %v1037_v19  ;;  %2690 = vrot.lane.b32.xlu1 %v5088_v48, %s3558_s14 }
 0x1ee   :  { %1287 = vrot.lane.b32.xlu0 %v4229_v4, %s3559_s17  ;;  %v5118_v4 = vld [vmem:[%s6468_s0 + $0x210] sm:$0xff] }
 0x1ef   :  { %v1043_v35 = vpop.permute.xlu1 %1042  ;;  %1669 = vst.msk [vmem:[#allocation2 + $0x140] sm:$0xff] %vm81_vm1, %v5118_v4 }
 0x1f0   :  { %1110 = vst.msk [vmem:[#allocation2 + $0xe8] sm:$0xff] %vm1080_vm8, %v1043_v35  ;;  %v1041_v42 = vpop.permute.xlu0 %1040  ;;  %v5165_v35 = vsel %vm372_vm2, %v1960_v30, %v1962_v16  ;;  %v1796_v16 = vrot.slane %v4878_v49, 1 }
 0x1f1   :  { %1109 = vst.msk [vmem:[#allocation2 + $0xe0] sm:$0xff] %vm1080_vm8, %v1041_v42  ;;  %2855 = vrot.lane.b32.xlu1 %v5104_v6, %s3559_s17 }
 0x1f2   :  { %2692 = vrot.lane.b32.xlu0 %v5109_v34, %s3558_s14 }
 0x1f3   :  { %v1047_v43 = vpop.permute.xlu1 %1046 }
 0x1f4   :  { %1112 = vst.msk [vmem:[#allocation2 + $0xf8] sm:$0xff] %vm1080_vm8, %v1047_v43  ;;  %v1045_v58 = vpop.permute.xlu0 %1044 }
 0x1f5   :  { %1111 = vst.msk [vmem:[#allocation2 + $0xf0] sm:$0xff] %vm1080_vm8, %v1045_v58  ;;  %1253 = vrot.lane.b32.xlu1 %v4130_v14, %s3559_s17 }
 0x1f6   :  { %2857 = vrot.lane.b32.xlu0 %v5132_v53, %s3559_s17 }
 0x1f7   :  { %v1122_v25 = vpop.permute.xlu1 %1121 }
 0x1f8   :  { %1217 = vst.msk [vmem:[#allocation2 + $0x8] sm:$0xff] %vm1215_vm9, %v1122_v25  ;;  %v1120_v14 = vpop.permute.xlu0 %1119 }
 0x1f9   :  { %1216 = vst.msk [vmem:[#allocation2] sm:$0xff] %vm1215_vm9, %v1120_v14  ;;  %1857 = vrot.lane.b32.xlu1 %v4992_v26, %s3552_s11 }
 0x1fa   :  { %1255 = vrot.lane.b32.xlu0 %v4125_v59, %s3559_s17 }
 0x1fb   :  { %v1126_v12 = vpop.permute.xlu1 %1125 }
 0x1fc   :  { %1219 = vst.msk [vmem:[#allocation2 + $0x18] sm:$0xff] %vm1215_vm9, %v1126_v12  ;;  %v1124_v60 = vpop.permute.xlu0 %1123 }
 0x1fd   :  { %1218 = vst.msk [vmem:[#allocation2 + $0x10] sm:$0xff] %vm1215_vm9, %v1124_v60  ;;  %2823 = vrot.lane.b32.xlu1 %v5156_v54, %s3559_s17  ;;  %v1797_v60 = vrot.slane %v4896_v52, 1 }
 0x1fe   :  { %1859 = vrot.lane.b32.xlu0 %v5010_v13, %s3552_s11 }
 0x1ff   :  { %v1130_v19 = vpop.permute.xlu1 %1129 }
 0x200   :  { %1221 = vst.msk [vmem:[#allocation2 + $0x28] sm:$0xff] %vm1215_vm9, %v1130_v19  ;;  %v1128_v59 = vpop.permute.xlu0 %1127 }
 0x201   :  { %1220 = vst.msk [vmem:[#allocation2 + $0x20] sm:$0xff] %vm1215_vm9, %v1128_v59  ;;  %1825 = vrot.lane.b32.xlu1 %v5005_v51, %s3552_s11 }
 0x202   :  { %2825 = vrot.lane.b32.xlu0 %v5165_v35, %s3559_s17 }
 0x203   :  { %v1134_v2 = vpop.permute.xlu1 %1133 }
 0x204   :  { %1223 = vst.msk [vmem:[#allocation2 + $0x38] sm:$0xff] %vm1215_vm9, %v1134_v2  ;;  %v1132_v24 = vpop.permute.xlu0 %1131  ;;  %v3295_v2 = vld [vmem:[%s6468_s0 + $0x2c8] sm:$0x3] }
 0x205   :  { %1222 = vst.msk [vmem:[#allocation2 + $0x30] sm:$0xff] %vm1215_vm9, %v1132_v24  ;;  %2065 = vrot.lane.b32.xlu1 %v5021_v28, %s3553_s18  ;;  %v5239_v24 = vsel %vm162_vm0, %v1796_v16, %v1797_v60 }
 0x206   :  { %1827 = vrot.lane.b32.xlu0 %v5024_v40, %s3552_s11 }
 0x207   :  { %v1138_v42 = vpop.permute.xlu1 %1137 }
 0x208   :  { %1225 = vst.msk [vmem:[#allocation2 + $0x48] sm:$0xff] %vm1215_vm9, %v1138_v42  ;;  %v1136_v43 = vpop.permute.xlu0 %1135 }
 0x209   :  { %1224 = vst.msk [vmem:[#allocation2 + $0x40] sm:$0xff] %vm1215_vm9, %v1136_v43  ;;  %2033 = vrot.lane.b32.xlu1 %v5033_v11, %s3553_s18  ;;  %v1799_v43 = vrot.slane %v3295_v2, 1 }
 0x20a   :  { %2067 = vrot.lane.b32.xlu0 %v5036_v3, %s3553_s18 }
 0x20b   :  { %v1142_v51 = vpop.permute.xlu1 %1141 }
 0x20c   :  { %1227 = vst.msk [vmem:[#allocation2 + $0x58] sm:$0xff] %vm1215_vm9, %v1142_v51  ;;  %v1140_v58 = vpop.permute.xlu0 %1139 }
 0x20d   :  { %1226 = vst.msk [vmem:[#allocation2 + $0x50] sm:$0xff] %vm1215_vm9, %v1140_v58  ;;  %2195 = vrot.lane.b32.xlu1 %v4738_v46, %s3554_s19  ;;  %v1756_v58 = vrot.slane %v4891_v32, 1 }
 0x20e   :  { %2035 = vrot.lane.b32.xlu0 %v5045_v22, %s3553_s18 }
 0x20f   :  { %v1146_v40 = vpop.permute.xlu1 %1145 }
 0x210   :  { %1229 = vst.msk [vmem:[#allocation2 + $0x68] sm:$0xff] %vm1215_vm9, %v1146_v40  ;;  %v1144_v29 = vpop.permute.xlu0 %1143  ;;  %v1757_v40 = vrot.slane %v4911_v33, 1 }
 0x211   :  { %1228 = vst.msk [vmem:[#allocation2 + $0x60] sm:$0xff] %vm1215_vm9, %v1144_v29  ;;  %2163 = vrot.lane.b32.xlu1 %v4751_v56, %s3554_s19 }
 0x212   :  { %2197 = vrot.lane.b32.xlu0 %v4756_v62, %s3554_s19 }
 0x213   :  { %v1150_v11 = vpop.permute.xlu1 %1149 }
 0x214   :  { %1231 = vst.msk [vmem:[#allocation2 + $0x78] sm:$0xff] %vm1215_vm9, %v1150_v11  ;;  %v1148_v30 = vpop.permute.xlu0 %1147  ;;  %v5250_v11 = vsel %vm162_vm0, %v1797_v60, %v1799_v43 }
 0x215   :  { %1230 = vst.msk [vmem:[#allocation2 + $0x70] sm:$0xff] %vm1215_vm9, %v1148_v30  ;;  %2329 = vrot.lane.b32.xlu1 %v5065_v45, %s3555_s24 }
 0x216   :  { %2165 = vrot.lane.b32.xlu0 %v4771_v17, %s3554_s19 }
 0x217   :  { %v1154_v46 = vpop.permute.xlu1 %1153 }
 0x218   :  { %1233 = vst.msk [vmem:[#allocation2 + $0x88] sm:$0xff] %vm1215_vm9, %v1154_v46  ;;  %v1152_v22 = vpop.permute.xlu0 %1151  ;;  %v3271_v46 = vld [vmem:[%s6468_s0 + $0x208] sm:$0x3] }
 0x219   :  { %1232 = vst.msk [vmem:[#allocation2 + $0x80] sm:$0xff] %vm1215_vm9, %v1152_v22  ;;  %2297 = vrot.lane.b32.xlu1 %v5088_v48, %s3555_s24  ;;  %v5262_v22 = vsel %vm162_vm0, %v1756_v58, %v1757_v40  ;;  %v5315_v58 = vld [vmem:[%s6468_s0 + $0x230] sm:$0xff] }
 0x21a   :  { %2331 = vrot.lane.b32.xlu0 %v5076_v57, %s3555_s24  ;;  %1672 = vst.msk [vmem:[#allocation2 + $0x158] sm:$0xff] %vm81_vm1, %v5315_v58 }
 0x21b   :  { %v1158_v56 = vpop.permute.xlu1 %1157 }
 0x21c   :  { %1235 = vst.msk [vmem:[#allocation2 + $0x98] sm:$0xff] %vm1215_vm9, %v1158_v56  ;;  %v1156_v62 = vpop.permute.xlu0 %1155  ;;  %v2004_v56 = vrot.slane %v4878_v49, 2 }
 0x21d   :  { %1234 = vst.msk [vmem:[#allocation2 + $0x90] sm:$0xff] %vm1215_vm9, %v1156_v62  ;;  %2462 = vrot.lane.b32.xlu1 %v5104_v6, %s3556_s27  ;;  %v2005_v62 = vrot.slane %v4896_v52, 2 }
 0x21e   :  { %2299 = vrot.lane.b32.xlu0 %v5109_v34, %s3555_s24 }
 0x21f   :  { %v1162_v17 = vpop.permute.xlu1 %1161 }
 0x220   :  { %1237 = vst.msk [vmem:[#allocation2 + $0xa8] sm:$0xff] %vm1215_vm9, %v1162_v17  ;;  %v1160_v25 = vpop.permute.xlu0 %1159 }
 0x221   :  { %1236 = vst.msk [vmem:[#allocation2 + $0xa0] sm:$0xff] %vm1215_vm9, %v1160_v25  ;;  %2430 = vrot.lane.b32.xlu1 %v5156_v54, %s3556_s27  ;;  %v1759_v25 = vrot.slane %v3271_v46, 1 }
 0x222   :  { %2464 = vrot.lane.b32.xlu0 %v5132_v53, %s3556_s27 }
 0x223   :  { %v1166_v14 = vpop.permute.xlu1 %1165  ;;  %v5283_v60 = vsel %vm162_vm0, %v1757_v40, %v1759_v25  ;;  %v1964_v40 = vrot.slane %v4891_v32, 2 }
 0x224   :  { %1239 = vst.msk [vmem:[#allocation2 + $0xb8] sm:$0xff] %vm1215_vm9, %v1166_v14  ;;  %v1164_v12 = vpop.permute.xlu0 %1163 }
 0x225   :  { %1238 = vst.msk [vmem:[#allocation2 + $0xb0] sm:$0xff] %vm1215_vm9, %v1164_v12  ;;  %2592 = vrot.lane.b32.xlu1 %v4878_v49, %s3557_s12  ;;  %v5278_v12 = vsel %vm372_vm2, %v2004_v56, %v2005_v62 }
 0x226   :  { %2432 = vrot.lane.b32.xlu0 %v5165_v35, %s3556_s27 }
 0x227   :  { %v1854_v19 = vpop.permute.xlu1 %1853 }
 0x228   :  { %1933 = vst.msk [vmem:[#allocation2 + $0x180] sm:$0xff] %vm339_vm3, %v1854_v19  ;;  %v1168_v59 = vpop.permute.xlu0 %1167  ;;  %v2007_v19 = vrot.slane %v3295_v2, 2 }
 0x229   :  { %1240 = vst.msk [vmem:[#allocation2 + $0xc0] sm:$0xff] %vm1215_vm9, %v1168_v59  ;;  %2560 = vrot.lane.b32.xlu1 %v4891_v32, %s3557_s12 }
 0x22a   :  { %2594 = vrot.lane.b32.xlu0 %v4896_v52, %s3557_s12  ;;  %v5306_v43 = vsel %vm372_vm2, %v2005_v62, %v2007_v19 }
 0x22b   :  { %v1822_v42 = vpop.permute.xlu1 %1821 }
 0x22c   :  { %1917 = vst.msk [vmem:[#allocation2 + $0x100] sm:$0xff] %vm339_vm3, %v1822_v42  ;;  %v1856_v51 = vpop.permute.xlu0 %1855  ;;  %v5297_v42 = vld [vmem:[%s6468_s0 + $0x2f0] sm:$0xff] }
 0x22d   :  { %1934 = vst.msk [vmem:[#allocation2 + $0x188] sm:$0xff] %vm339_vm3, %v1856_v51  ;;  %2726 = vrot.lane.b32.xlu1 %v5239_v24, %s3558_s14 }
 0x22e   :  { %2562 = vrot.lane.b32.xlu0 %v4911_v33, %s3557_s12  ;;  %1688 = vst.msk [vmem:[#allocation2 + $0x1d8] sm:$0xff] %vm81_vm1, %v5297_v42 }
 0x22f   :  { %v2062_v29 = vpop.permute.xlu1 %2061 }
 0x230   :  { %2141 = vst.msk [vmem:[#allocation2 + $0x180] sm:$0xff] %vm549_vm4, %v2062_v29  ;;  %v1824_v30 = vpop.permute.xlu0 %1823  ;;  %v1965_v29 = vrot.slane %v4911_v33, 2 }
 0x231   :  { %1918 = vst.msk [vmem:[#allocation2 + $0x108] sm:$0xff] %vm339_vm3, %v1824_v30  ;;  %1289 = vrot.lane.b32.xlu1 %v6628_v0, %s3559_s17  ;;  %v5273_v0 = vld [vmem:[%s6468_s0 + $0x2e8] sm:$0xff] }
 0x232   :  { %2728 = vrot.lane.b32.xlu0 %v5250_v11, %s3558_s14  ;;  %1687 = vst.msk [vmem:[#allocation2 + $0x1d0] sm:$0xff] %vm81_vm1, %v5273_v0 }
 0x233   :  { %v2030_v17 = vpop.permute.xlu1 %2029 }
 0x234   :  { %2125 = vst.msk [vmem:[#allocation2 + $0x100] sm:$0xff] %vm549_vm4, %v2030_v17  ;;  %v2064_v14 = vpop.permute.xlu0 %2063  ;;  %v1967_v17 = vrot.slane %v3271_v46, 2 }
 0x235   :  { %2142 = vst.msk [vmem:[#allocation2 + $0x188] sm:$0xff] %vm549_vm4, %v2064_v14  ;;  %2694 = vrot.lane.b32.xlu1 %v5262_v22, %s3558_s14 }
 0x236   :  { %1291 = vrot.lane.b32.xlu0 %v4242_v61, %s3559_s17  ;;  %v5292_v61 = vld [vmem:[%s6468_s0 + $0x228] sm:$0xff]  ;;  %v5339_v14 = vsel %vm372_vm2, %v1965_v29, %v1967_v17  ;;  %v1801_v17 = vrot.slane %v5099_v21, 1 }
 0x237   :  { %v2192_v16 = vpop.permute.xlu1 %2191  ;;  %1671 = vst.msk [vmem:[#allocation2 + $0x150] sm:$0xff] %vm81_vm1, %v5292_v61 }
 0x238   :  { %2271 = vst.msk [vmem:[#allocation2 + $0x180] sm:$0xff] %vm680_vm5, %v2192_v16  ;;  %v2032_v59 = vpop.permute.xlu0 %2031 }
 0x239   :  { %2126 = vst.msk [vmem:[#allocation2 + $0x108] sm:$0xff] %vm549_vm4, %v2032_v59  ;;  %2859 = vrot.lane.b32.xlu1 %v5278_v12, %s3559_s17 }
 0x23a   :  { %2696 = vrot.lane.b32.xlu0 %v5283_v60, %s3558_s14 }
 0x23b   :  { %v2160_v2 = vpop.permute.xlu1 %2159 }
 0x23c   :  { %2255 = vst.msk [vmem:[#allocation2 + $0x100] sm:$0xff] %vm680_vm5, %v2160_v2  ;;  %v2194_v51 = vpop.permute.xlu0 %2193 }
 0x23d   :  { %2272 = vst.msk [vmem:[#allocation2 + $0x188] sm:$0xff] %vm680_vm5, %v2194_v51  ;;  %1257 = vrot.lane.b32.xlu1 %v6620_v36, %s3559_s17  ;;  %v5330_v36 = vsel %vm372_vm2, %v1964_v40, %v1965_v29 }
 0x23e   :  { %2861 = vrot.lane.b32.xlu0 %v5306_v43, %s3559_s17 }
 0x23f   :  { %v2326_v30 = vpop.permute.xlu1 %2325 }
 0x240   :  { %2405 = vst.msk [vmem:[#allocation2 + $0x180] sm:$0xff] %vm815_vm6, %v2326_v30  ;;  %v2162_v56 = vpop.permute.xlu0 %2161 }
 0x241   :  { %2256 = vst.msk [vmem:[#allocation2 + $0x108] sm:$0xff] %vm680_vm5, %v2162_v56  ;;  %1861 = vrot.lane.b32.xlu1 %v5065_v45, %s3552_s11 }
 0x242   :  { %1259 = vrot.lane.b32.xlu0 %v4138_v5, %s3559_s17 }
 0x243   :  { %v2294_v62 = vpop.permute.xlu1 %2293 }
 0x244   :  { %2389 = vst.msk [vmem:[#allocation2 + $0x100] sm:$0xff] %vm815_vm6, %v2294_v62  ;;  %v2328_v25 = vpop.permute.xlu0 %2327 }
 0x245   :  { %2406 = vst.msk [vmem:[#allocation2 + $0x188] sm:$0xff] %vm815_vm6, %v2328_v25  ;;  %2827 = vrot.lane.b32.xlu1 %v5330_v36, %s3559_s17  ;;  %v1802_v25 = vrot.slane %v5123_v50, 1 }
 0x246   :  { %1863 = vrot.lane.b32.xlu0 %v5076_v57, %s3552_s11 }
 0x247   :  { %v2459_v45 = vpop.permute.xlu1 %2458 }
 0x248   :  { %2538 = vst.msk [vmem:[#allocation2 + $0x180] sm:$0xff] %vm949_vm7, %v2459_v45  ;;  %v2296_v5 = vpop.permute.xlu0 %2295 }
 0x249   :  { %2390 = vst.msk [vmem:[#allocation2 + $0x108] sm:$0xff] %vm815_vm6, %v2296_v5  ;;  %1829 = vrot.lane.b32.xlu1 %v5088_v48, %s3552_s11 }
 0x24a   :  { %2829 = vrot.lane.b32.xlu0 %v5339_v14, %s3559_s17 }
 0x24b   :  { %v2427_v46 = vpop.permute.xlu1 %2426 }
 0x24c   :  { %2522 = vst.msk [vmem:[#allocation2 + $0x100] sm:$0xff] %vm949_vm7, %v2427_v46  ;;  %v2461_v16 = vpop.permute.xlu0 %2460 }
 0x24d   :  { %2539 = vst.msk [vmem:[#allocation2 + $0x188] sm:$0xff] %vm949_vm7, %v2461_v16  ;;  %2069 = vrot.lane.b32.xlu1 %v5104_v6, %s3553_s18 }
 0x24e   :  { %1831 = vrot.lane.b32.xlu0 %v5109_v34, %s3552_s11 }
 0x24f   :  { %v2589_v57 = vpop.permute.xlu1 %2588 }
 0x250   :  { %2668 = vst.msk [vmem:[#allocation2 + $0x180] sm:$0xff] %vm1080_vm8, %v2589_v57  ;;  %v2429_v19 = vpop.permute.xlu0 %2428  ;;  %v3298_v57 = vld [vmem:[%s6468_s0 + $0x2e0] sm:$0x3] }
 0x251   :  { %2523 = vst.msk [vmem:[#allocation2 + $0x108] sm:$0xff] %vm949_vm7, %v2429_v19  ;;  %2037 = vrot.lane.b32.xlu1 %v5156_v54, %s3553_s18 }
 0x252   :  { %2071 = vrot.lane.b32.xlu0 %v5132_v53, %s3553_s18 }
 0x253   :  { %v2557_v48 = vpop.permute.xlu1 %2556 }
 0x254   :  { %2652 = vst.msk [vmem:[#allocation2 + $0x100] sm:$0xff] %vm1080_vm8, %v2557_v48  ;;  %v2591_v59 = vpop.permute.xlu0 %2590  ;;  %v5421_v48 = vsel %vm162_vm0, %v1801_v17, %v1802_v25 }
 0x255   :  { %2669 = vst.msk [vmem:[#allocation2 + $0x188] sm:$0xff] %vm1080_vm8, %v2591_v59  ;;  %2199 = vrot.lane.b32.xlu1 %v4878_v49, %s3554_s19 }
 0x256   :  { %2039 = vrot.lane.b32.xlu0 %v5165_v35, %s3553_s18 }
 0x257   :  { %v2723_v6 = vpop.permute.xlu1 %2722 }
 0x258   :  { %2802 = vst.msk [vmem:[#allocation2 + $0x180] sm:$0xff] %vm1215_vm9, %v2723_v6  ;;  %v2559_v34 = vpop.permute.xlu0 %2558  ;;  %v1804_v6 = vrot.slane %v3298_v57, 1 }
 0x259   :  { %2653 = vst.msk [vmem:[#allocation2 + $0x108] sm:$0xff] %vm1080_vm8, %v2559_v34  ;;  %2167 = vrot.lane.b32.xlu1 %v4891_v32, %s3554_s19 }
 0x25a   :  { %2201 = vrot.lane.b32.xlu0 %v4896_v52, %s3554_s19 }
 0x25b   :  { %v1286_v53 = vpop.permute.xlu1 %1285 }
 0x25c   :  { %1366 = vst.msk [vmem:[#allocation2 + $0x80] sm:$0xff] %vm1349_vm10, %v1286_v53  ;;  %v2725_v49 = vpop.permute.xlu0 %2724 }
 0x25d   :  { %2803 = vst.msk [vmem:[#allocation2 + $0x188] sm:$0xff] %vm1215_vm9, %v2725_v49  ;;  %2333 = vrot.lane.b32.xlu1 %v5239_v24, %s3555_s24 }
 0x25e   :  { %2169 = vrot.lane.b32.xlu0 %v4911_v33, %s3554_s19 }
 0x25f   :  { %v2691_v54 = vpop.permute.xlu1 %2690 }
 0x260   :  { %2786 = vst.msk [vmem:[#allocation2 + $0x100] sm:$0xff] %vm1215_vm9, %v2691_v54  ;;  %v1288_v32 = vpop.permute.xlu0 %1287 }
 0x261   :  { %1367 = vst.msk [vmem:[#allocation2 + $0x88] sm:$0xff] %vm1349_vm10, %v1288_v32  ;;  %2301 = vrot.lane.b32.xlu1 %v5262_v22, %s3555_s24  ;;  %v1761_v32 = vrot.slane %v5118_v4, 1 }
 0x262   :  { %2335 = vrot.lane.b32.xlu0 %v5250_v11, %s3555_s24 }
 0x263   :  { %v2856_v52 = vpop.permute.xlu1 %2855  ;;  %v1398_v51 = vld [vmem:[#allocation2 + $0x80] sm:$0xff] }
 0x264   :  { %2935 = vst.msk [vmem:[#allocation2 + $0x180] sm:$0xff] %vm1349_vm10, %v2856_v52  ;;  %v2693_v35 = vpop.permute.xlu0 %2692  ;;  %v1762_v52 = vrot.slane %v5141_v27, 1 }
 0x265   :  { %2787 = vst.msk [vmem:[#allocation2 + $0x108] sm:$0xff] %vm1215_vm9, %v2693_v35  ;;  %2466 = vrot.lane.b32.xlu1 %v5278_v12, %s3556_s27 }
 0x266   :  { %2303 = vrot.lane.b32.xlu0 %v5283_v60, %s3555_s24 }
 0x267   :  { %v1254_v33 = vpop.permute.xlu1 %1253 }
 0x268   :  { %1350 = vst.msk [vmem:[#allocation2] sm:$0xff] %vm1349_vm10, %v1254_v33  ;;  %v2858_v2 = vpop.permute.xlu0 %2857  ;;  %v1399_v40 = vld [vmem:[#allocation2 + $0x88] sm:$0xff]  ;;  %v5436_v33 = vsel %vm162_vm0, %v1802_v25, %v1804_v6  ;;  %v2012_v6 = vrot.slane %v3298_v57, 2 }
 0x269   :  { %2936 = vst.msk [vmem:[#allocation2 + $0x188] sm:$0xff] %vm1349_vm10, %v2858_v2  ;;  %2434 = vrot.lane.b32.xlu1 %v5330_v36, %s3556_s27  ;;  %v3415_v30 = vpack.c.bf16 %v1399_v40, %v1398_v51  ;;  %v3274_v51 = vld [vmem:[%s6468_s0 + $0x220] sm:$0x3]  ;;  %v5448_v40 = vsel %vm162_vm0, %v1761_v32, %v1762_v52 }
 0x26a   :  { %2468 = vrot.lane.b32.xlu0 %v5306_v43, %s3556_s27  ;;  %v1764_v17 = vrot.slane %v3274_v51, 1  ;;  %v5501_v32 = vld [vmem:[%s6468_s0 + $0x240] sm:$0xff] }
 0x26b   :  { %3417 = vmatprep.subr.msk.bf16.mxu0 %vm5392_vm12, %v3415_v30  ;;  %v1858_v56 = vpop.permute.xlu1 %1857  ;;  %v2967_v46 = vld [vmem:[#allocation2 + $0x180] sm:$0xff]  ;;  %v2009_v30 = vrot.slane %v5099_v21, 2  ;;  %1673 = vst.msk [vmem:[#allocation2 + $0x160] sm:$0xff] %vm81_vm1, %v5501_v32 }
 0x26c   :  { %1935 = vst.msk [vmem:[#allocation2 + $0x190] sm:$0xff] %vm339_vm3, %v1858_v56  ;;  %v1256_v62 = vpop.permute.xlu0 %1255  ;;  %v2010_v56 = vrot.slane %v5123_v50, 2 }
 0x26d   :  { %1351 = vst.msk [vmem:[#allocation2 + $0x8] sm:$0xff] %vm1349_vm10, %v1256_v62  ;;  %2596 = vrot.lane.b32.xlu1 %v5099_v21, %s3557_s12 }
 0x26e   :  { %2436 = vrot.lane.b32.xlu0 %v5339_v14, %s3556_s27 }
 0x26f   :  { %v2824_v45 = vpop.permute.xlu1 %2823  ;;  %v1382_v53 = vld [vmem:[#allocation2] sm:$0xff] }
 0x270   :  { %2919 = vst.msk [vmem:[#allocation2 + $0x100] sm:$0xff] %vm1349_vm10, %v2824_v45  ;;  %v1860_v5 = vpop.permute.xlu0 %1859  ;;  %v2968_v16 = vld [vmem:[#allocation2 + $0x188] sm:$0xff] }
 0x271   :  { %1936 = vst.msk [vmem:[#allocation2 + $0x198] sm:$0xff] %vm339_vm3, %v1860_v5  ;;  %2564 = vrot.lane.b32.xlu1 %v5118_v4, %s3557_s12  ;;  %v3463_v19 = vpack.c.bf16 %v2968_v16, %v2967_v46  ;;  %v5459_v46 = vld [vmem:[%s6468_s0 + $0x300] sm:$0xff]  ;;  %v5464_v16 = vsel %vm372_vm2, %v2009_v30, %v2010_v56 }
 0x272   :  { %2598 = vrot.lane.b32.xlu0 %v5123_v50, %s3557_s12  ;;  %1689 = vst.msk [vmem:[#allocation2 + $0x1e0] sm:$0xff] %vm81_vm1, %v5459_v46 }
 0x273   :  { %3465 = vmatprep.subr.msk.bf16.mxu1 %vm5392_vm12, %v3463_v19  ;;  %v1826_v59 = vpop.permute.xlu1 %1825 }
 0x274   :  { %1919 = vst.msk [vmem:[#allocation2 + $0x110] sm:$0xff] %vm339_vm3, %v1826_v59  ;;  %v2826_v34 = vpop.permute.xlu0 %2825  ;;  %v1383_v49 = vld [vmem:[#allocation2 + $0x8] sm:$0xff]  ;;  %v5471_v59 = vsel %vm162_vm0, %v1762_v52, %v1764_v17  ;;  %v1969_v52 = vrot.slane %v5118_v4, 2 }
 0x275   :  { %2920 = vst.msk [vmem:[#allocation2 + $0x108] sm:$0xff] %vm1349_vm10, %v2826_v34  ;;  %2730 = vrot.lane.b32.xlu1 %v5421_v48, %s3558_s14  ;;  %v3418_v54 = vpack.c.bf16 %v1383_v49, %v1382_v53  ;;  %v5487_v53 = vsel %vm372_vm2, %v2010_v56, %v2012_v6 }
 0x276   :  { %2566 = vrot.lane.b32.xlu0 %v5141_v27, %s3557_s12 }
 0x277   :  { %3420 = vmatpush3.bf16.xpose.msk.msra.mxu0 %vm5392_vm12, %v3418_v54  ;;  %v2066_v35 = vpop.permute.xlu1 %2065  ;;  %v2951_v45 = vld [vmem:[#allocation2 + $0x100] sm:$0xff]  ;;  %v5496_v54 = vld [vmem:[%s6468_s0 + $0x248] sm:$0xff] }
 0x278   :  { %2143 = vst.msk [vmem:[#allocation2 + $0x190] sm:$0xff] %vm549_vm4, %v2066_v35  ;;  %v1828_v2 = vpop.permute.xlu0 %1827  ;;  %v1970_v35 = vrot.slane %v5141_v27, 2 }
 0x279   :  { %1920 = vst.msk [vmem:[#allocation2 + $0x118] sm:$0xff] %vm339_vm3, %v1828_v2  ;;  %1293 = vrot.lane.b32.xlu1 %v6630_v63, %s3559_s17 }
 0x27a   :  { %2732 = vrot.lane.b32.xlu0 %v5436_v33, %s3558_s14  ;;  %1674 = vst.msk [vmem:[#allocation2 + $0x168] sm:$0xff] %vm81_vm1, %v5496_v54  ;;  %v5518_v30 = vsel %vm372_vm2, %v1969_v52, %v1970_v35 }
 0x27b   :  { %v2034_v62 = vpop.permute.xlu1 %2033 }
 0x27c   :  { %2127 = vst.msk [vmem:[#allocation2 + $0x110] sm:$0xff] %vm549_vm4, %v2034_v62  ;;  %v2068_v25 = vpop.permute.xlu0 %2067  ;;  %v2952_v5 = vld [vmem:[#allocation2 + $0x108] sm:$0xff]  ;;  %v1972_v62 = vrot.slane %v3274_v51, 2 }
 0x27d   :  { %2144 = vst.msk [vmem:[#allocation2 + $0x198] sm:$0xff] %vm549_vm4, %v2068_v25  ;;  %2698 = vrot.lane.b32.xlu1 %v5448_v40, %s3558_s14  ;;  %v3466_v63 = vpack.c.bf16 %v2952_v5, %v2951_v45 }
 0x27e   :  { %1295 = vrot.lane.b32.xlu0 %v6629_v7, %s3559_s17  ;;  %v5480_v7 = vld [vmem:[%s6468_s0 + $0x308] sm:$0xff]  ;;  %v5527_v25 = vsel %vm372_vm2, %v1970_v35, %v1972_v62  ;;  %v1806_v35 = vrot.slane %v5273_v0, 1 }
 0x27f   :  { %3468 = vmatpush3.bf16.xpose.msk.msra.mxu1 %vm5392_vm12, %v3466_v63  ;;  %v2196_v19 = vpop.permute.xlu1 %2195  ;;  %1690 = vst.msk [vmem:[#allocation2 + $0x1e8] sm:$0xff] %vm81_vm1, %v5480_v7 }
 0x280   :  { %2273 = vst.msk [vmem:[#allocation2 + $0x190] sm:$0xff] %vm680_vm5, %v2196_v19  ;;  %v2036_v34 = vpop.permute.xlu0 %2035 }
 0x281   :  { %2128 = vst.msk [vmem:[#allocation2 + $0x118] sm:$0xff] %vm549_vm4, %v2036_v34  ;;  %2863 = vrot.lane.b32.xlu1 %v5464_v16, %s3559_s17 }
 0x282   :  { %2700 = vrot.lane.b32.xlu0 %v5471_v59, %s3558_s14 }
 0x283   :  { %v2164_v57 = vpop.permute.xlu1 %2163 }
 0x284   :  { %2257 = vst.msk [vmem:[#allocation2 + $0x110] sm:$0xff] %vm680_vm5, %v2164_v57  ;;  %v2198_v49 = vpop.permute.xlu0 %2197 }
 0x285   :  { %2274 = vst.msk [vmem:[#allocation2 + $0x198] sm:$0xff] %vm680_vm5, %v2198_v49  ;;  %1261 = vrot.lane.b32.xlu1 %v6621_v44, %s3559_s17 }
 0x286   :  { %2865 = vrot.lane.b32.xlu0 %v5487_v53, %s3559_s17 }
 0x287   :  { %v2330_v44 = vpop.permute.xlu1 %2329 }
 0x288   :  { %2407 = vst.msk [vmem:[#allocation2 + $0x190] sm:$0xff] %vm815_vm6, %v2330_v44  ;;  %v2166_v2 = vpop.permute.xlu0 %2165  ;;  %v1807_v44 = vrot.slane %v5297_v42, 1 }
 0x289   :  { %2258 = vst.msk [vmem:[#allocation2 + $0x118] sm:$0xff] %vm680_vm5, %v2166_v2  ;;  %1865 = vrot.lane.b32.xlu1 %v5239_v24, %s3552_s11 }
 0x28a   :  { %1263 = vrot.lane.b32.xlu0 %v4151_v20, %s3559_s17 }
 0x28b   :  { %v2298_v56 = vpop.permute.xlu1 %2297 }
 0x28c   :  { %2391 = vst.msk [vmem:[#allocation2 + $0x110] sm:$0xff] %vm815_vm6, %v2298_v56  ;;  %v2332_v17 = vpop.permute.xlu0 %2331 }
 0x28d   :  { %2408 = vst.msk [vmem:[#allocation2 + $0x198] sm:$0xff] %vm815_vm6, %v2332_v17  ;;  %2831 = vrot.lane.b32.xlu1 %v5518_v30, %s3559_s17 }
 0x28e   :  { %1867 = vrot.lane.b32.xlu0 %v5250_v11, %s3552_s11 }
 0x28f   :  { %v2463_v24 = vpop.permute.xlu1 %2462 }
 0x290   :  { %2540 = vst.msk [vmem:[#allocation2 + $0x190] sm:$0xff] %vm949_vm7, %v2463_v24  ;;  %v2300_v20 = vpop.permute.xlu0 %2299  ;;  %v3301_v24 = vld [vmem:[%s6468_s0 + $0x2f8] sm:$0x3] }
 0x291   :  { %2392 = vst.msk [vmem:[#allocation2 + $0x118] sm:$0xff] %vm815_vm6, %v2300_v20  ;;  %1833 = vrot.lane.b32.xlu1 %v5262_v22, %s3552_s11 }
 0x292   :  { %2833 = vrot.lane.b32.xlu0 %v5527_v25, %s3559_s17 }
 0x293   :  { %v2431_v51 = vpop.permute.xlu1 %2430 }
 0x294   :  { %2524 = vst.msk [vmem:[#allocation2 + $0x110] sm:$0xff] %vm949_vm7, %v2431_v51  ;;  %v2465_v45 = vpop.permute.xlu0 %2464  ;;  %v5603_v51 = vsel %vm162_vm0, %v1806_v35, %v1807_v44 }
 0x295   :  { %2541 = vst.msk [vmem:[#allocation2 + $0x198] sm:$0xff] %vm949_vm7, %v2465_v45  ;;  %2073 = vrot.lane.b32.xlu1 %v5278_v12, %s3553_s18 }
 0x296   :  { %1835 = vrot.lane.b32.xlu0 %v5283_v60, %s3552_s11 }
 0x297   :  { %v2593_v11 = vpop.permute.xlu1 %2592 }
 0x298   :  { %2670 = vst.msk [vmem:[#allocation2 + $0x190] sm:$0xff] %vm1080_vm8, %v2593_v11  ;;  %v2433_v5 = vpop.permute.xlu0 %2432  ;;  %v1809_v11 = vrot.slane %v3301_v24, 1 }
 0x299   :  { %2525 = vst.msk [vmem:[#allocation2 + $0x118] sm:$0xff] %vm949_vm7, %v2433_v5  ;;  %2041 = vrot.lane.b32.xlu1 %v5330_v36, %s3553_s18 }
 0x29a   :  { %2075 = vrot.lane.b32.xlu0 %v5306_v43, %s3553_s18 }
 0x29b   :  { %v2561_v22 = vpop.permute.xlu1 %2560 }
 0x29c   :  { %2654 = vst.msk [vmem:[#allocation2 + $0x110] sm:$0xff] %vm1080_vm8, %v2561_v22  ;;  %v2595_v63 = vpop.permute.xlu0 %2594 }
 0x29d   :  { %2671 = vst.msk [vmem:[#allocation2 + $0x198] sm:$0xff] %vm1080_vm8, %v2595_v63  ;;  %2203 = vrot.lane.b32.xlu1 %v5099_v21, %s3554_s19 }
 0x29e   :  { %2043 = vrot.lane.b32.xlu0 %v5339_v14, %s3553_s18 }
 0x29f   :  { %v2727_v12 = vpop.permute.xlu1 %2726 }
 0x2a0   :  { %2804 = vst.msk [vmem:[#allocation2 + $0x190] sm:$0xff] %vm1215_vm9, %v2727_v12  ;;  %v2563_v60 = vpop.permute.xlu0 %2562 }
 0x2a1   :  { %2655 = vst.msk [vmem:[#allocation2 + $0x118] sm:$0xff] %vm1080_vm8, %v2563_v60  ;;  %2171 = vrot.lane.b32.xlu1 %v5118_v4, %s3554_s19  ;;  %v1766_v60 = vrot.slane %v5292_v61, 1 }
 0x2a2   :  { %2205 = vrot.lane.b32.xlu0 %v5123_v50, %s3554_s19 }
 0x2a3   :  { %v1290_v43 = vpop.permute.xlu1 %1289 }
 0x2a4   :  { %1368 = vst.msk [vmem:[#allocation2 + $0x90] sm:$0xff] %vm1349_vm10, %v1290_v43  ;;  %v2729_v36 = vpop.permute.xlu0 %2728  ;;  %v1767_v43 = vrot.slane %v5315_v58, 1 }
 0x2a5   :  { %2805 = vst.msk [vmem:[#allocation2 + $0x198] sm:$0xff] %vm1215_vm9, %v2729_v36  ;;  %2337 = vrot.lane.b32.xlu1 %v5421_v48, %s3555_s24 }
 0x2a6   :  { %2173 = vrot.lane.b32.xlu0 %v5141_v27, %s3554_s19 }
 0x2a7   :  { %v2695_v21 = vpop.permute.xlu1 %2694 }
 0x2a8   :  { %2788 = vst.msk [vmem:[#allocation2 + $0x110] sm:$0xff] %vm1215_vm9, %v2695_v21  ;;  %v1292_v14 = vpop.permute.xlu0 %1291  ;;  %v5618_v21 = vsel %vm162_vm0, %v1807_v44, %v1809_v11  ;;  %v6656_v11 = vld [vmem:[#allocation34_spill] sm:$0xff] }
 0x2a9   :  { %1369 = vst.msk [vmem:[#allocation2 + $0x98] sm:$0xff] %vm1349_vm10, %v1292_v14  ;;  %2305 = vrot.lane.b32.xlu1 %v5448_v40, %s3555_s24 }
 0x2aa   :  { %2339 = vrot.lane.b32.xlu0 %v5436_v33, %s3555_s24 }
 0x2ab   :  { %v2860_v4 = vpop.permute.xlu1 %2859  ;;  %v1400_v6 = vld [vmem:[#allocation2 + $0x90] sm:$0xff] }
 0x2ac   :  { %2937 = vst.msk [vmem:[#allocation2 + $0x190] sm:$0xff] %vm1349_vm10, %v2860_v4  ;;  %v2697_v50 = vpop.permute.xlu0 %2696  ;;  %v3277_v4 = vld [vmem:[%s6468_s0 + $0x238] sm:$0x3] }
 0x2ad   :  { %2789 = vst.msk [vmem:[#allocation2 + $0x118] sm:$0xff] %vm1215_vm9, %v2697_v50  ;;  %2470 = vrot.lane.b32.xlu1 %v5464_v16, %s3556_s27  ;;  %v5630_v50 = vsel %vm162_vm0, %v1766_v60, %v1767_v43  ;;  %v5686_v60 = vld [vmem:[%s6468_s0 + $0x260] sm:$0xff] }
 0x2ae   :  { %2307 = vrot.lane.b32.xlu0 %v5471_v59, %s3555_s24  ;;  %1676 = vst.msk [vmem:[#allocation2 + $0x178] sm:$0xff] %vm81_vm1, %v5686_v60 }
 0x2af   :  { %v1258_v27 = vpop.permute.xlu1 %1257 }
 0x2b0   :  { %1352 = vst.msk [vmem:[#allocation2 + $0x10] sm:$0xff] %vm1349_vm10, %v1258_v27  ;;  %v2862_v19 = vpop.permute.xlu0 %2861  ;;  %v1401_v34 = vld [vmem:[#allocation2 + $0x98] sm:$0xff]  ;;  %v2014_v27 = vrot.slane %v5273_v0, 2 }
 0x2b1   :  { %2938 = vst.msk [vmem:[#allocation2 + $0x198] sm:$0xff] %vm1349_vm10, %v2862_v19  ;;  %2438 = vrot.lane.b32.xlu1 %v5518_v30, %s3556_s27  ;;  %v3421_v57 = vpack.c.bf16 %v1401_v34, %v1400_v6  ;;  %v2015_v19 = vrot.slane %v5297_v42, 2  ;;  %v1769_v34 = vrot.slane %v3277_v4, 1 }
 0x2b2   :  { %2472 = vrot.lane.b32.xlu0 %v5487_v53, %s3556_s27 }
 0x2b3   :  { %3423 = vmatprep.subr.msk.bf16.mxu0 %vm5392_vm12, %v3421_v57  ;;  %v1862_v49 = vpop.permute.xlu1 %1861  ;;  %v2969_v62 = vld [vmem:[#allocation2 + $0x190] sm:$0xff]  ;;  %v5641_v35 = vsel %vm372_vm2, %v2014_v27, %v2015_v19  ;;  %v1977_v27 = vrot.slane %v3277_v4, 2 }
 0x2b4   :  { %1937 = vst.msk [vmem:[#allocation2 + $0x1a0] sm:$0xff] %vm339_vm3, %v1862_v49  ;;  %v1260_v52 = vpop.permute.xlu0 %1259 }
 0x2b5   :  { %1353 = vst.msk [vmem:[#allocation2 + $0x18] sm:$0xff] %vm1349_vm10, %v1260_v52  ;;  %2600 = vrot.lane.b32.xlu1 %v5273_v0, %s3557_s12 }
 0x2b6   :  { %2440 = vrot.lane.b32.xlu0 %v5527_v25, %s3556_s27 }
 0x2b7   :  { %v2828_v2 = vpop.permute.xlu1 %2827  ;;  %v1384_v22 = vld [vmem:[#allocation2 + $0x10] sm:$0xff] }
 0x2b8   :  { %2921 = vst.msk [vmem:[#allocation2 + $0x110] sm:$0xff] %vm1349_vm10, %v2828_v2  ;;  %v1864_v56 = vpop.permute.xlu0 %1863  ;;  %v2970_v17 = vld [vmem:[#allocation2 + $0x198] sm:$0xff]  ;;  %v5646_v2 = vsel %vm162_vm0, %v1767_v43, %v1769_v34 }
 0x2b9   :  { %1938 = vst.msk [vmem:[#allocation2 + $0x1a8] sm:$0xff] %vm339_vm3, %v1864_v56  ;;  %2568 = vrot.lane.b32.xlu1 %v5292_v61, %s3557_s12  ;;  %v3469_v20 = vpack.c.bf16 %v2970_v17, %v2969_v62  ;;  %v2017_v56 = vrot.slane %v3301_v24, 2  ;;  %v5660_v17 = vld [vmem:[%s6468_s0 + $0x318] sm:$0xff] }
 0x2ba   :  { %2602 = vrot.lane.b32.xlu0 %v5297_v42, %s3557_s12  ;;  %1691 = vst.msk [vmem:[#allocation2 + $0x1f0] sm:$0xff] %vm81_vm1, %v5660_v17  ;;  %v5691_v43 = vld [vmem:[%s6468_s0 + $0x258] sm:$0xff] }
 0x2bb   :  { %3471 = vmatprep.subr.msk.bf16.mxu1 %vm5392_vm12, %v3469_v20  ;;  %v1830_v45 = vpop.permute.xlu1 %1829  ;;  %v5669_v20 = vsel %vm372_vm2, %v2015_v19, %v2017_v56  ;;  %1675 = vst.msk [vmem:[#allocation2 + $0x170] sm:$0xff] %vm81_vm1, %v5691_v43 }
 0x2bc   :  { %1921 = vst.msk [vmem:[#allocation2 + $0x120] sm:$0xff] %vm339_vm3, %v1830_v45  ;;  %v2830_v5 = vpop.permute.xlu0 %2829  ;;  %v1385_v63 = vld [vmem:[#allocation2 + $0x18] sm:$0xff] }
 0x2bd   :  { %2922 = vst.msk [vmem:[#allocation2 + $0x118] sm:$0xff] %vm1349_vm10, %v2830_v5  ;;  %2734 = vrot.lane.b32.xlu1 %v5603_v51, %s3558_s14  ;;  %v3424_v12 = vpack.c.bf16 %v1385_v63, %v1384_v22  ;;  %v1974_v5 = vrot.slane %v5292_v61, 2  ;;  %v1975_v22 = vrot.slane %v5315_v58, 2 }
 0x2be   :  { %2570 = vrot.lane.b32.xlu0 %v5315_v58, %s3557_s12 }
 0x2bf   :  { %3426 = vmatpush3.bf16.xpose.msk.msra.mxu0 %vm5392_vm12, %v3424_v12  ;;  %v2070_v36 = vpop.permute.xlu1 %2069  ;;  %v2953_v49 = vld [vmem:[#allocation2 + $0x110] sm:$0xff]  ;;  %v5709_v34 = vsel %vm372_vm2, %v1975_v22, %v1977_v27 }
 0x2c0   :  { %2145 = vst.msk [vmem:[#allocation2 + $0x1a0] sm:$0xff] %vm549_vm4, %v2070_v36  ;;  %v1832_v14 = vpop.permute.xlu0 %1831  ;;  %v6657_v36 = vld [vmem:[#allocation33_spill] sm:$0xff] }
 0x2c1   :  { %1922 = vst.msk [vmem:[#allocation2 + $0x128] sm:$0xff] %vm339_vm3, %v1832_v14  ;;  %1297 = vrot.lane.b32.xlu1 %v4273_v55, %s3559_s17  ;;  %v5696_v14 = vsel %vm372_vm2, %v1974_v5, %v1975_v22  ;;  %v3304_v22 = vld [vmem:[%s6468_s0 + $0x310] sm:$0x3] }
 0x2c2   :  { %2736 = vrot.lane.b32.xlu0 %v5618_v21, %s3558_s14 }
 0x2c3   :  { %v2038_v6 = vpop.permute.xlu1 %2037 }
 0x2c4   :  { %2129 = vst.msk [vmem:[#allocation2 + $0x120] sm:$0xff] %vm549_vm4, %v2038_v6  ;;  %v2072_v57 = vpop.permute.xlu0 %2071  ;;  %v2954_v52 = vld [vmem:[#allocation2 + $0x118] sm:$0xff] }
 0x2c5   :  { %2146 = vst.msk [vmem:[#allocation2 + $0x1a8] sm:$0xff] %vm549_vm4, %v2072_v57  ;;  %2702 = vrot.lane.b32.xlu1 %v5630_v50, %s3558_s14  ;;  %v3472_v55 = vpack.c.bf16 %v2954_v52, %v2953_v49 }
 0x2c6   :  { %1299 = vrot.lane.b32.xlu0 %v4268_v31, %s3559_s17  ;;  %v5655_v31 = vld [vmem:[%s6468_s0 + $0x320] sm:$0xff] }
 0x2c7   :  { %3474 = vmatpush3.bf16.xpose.msk.msra.mxu1 %vm5392_vm12, %v3472_v55  ;;  %v2200_v44 = vpop.permute.xlu1 %2199  ;;  %1692 = vst.msk [vmem:[#allocation2 + $0x1f8] sm:$0xff] %vm81_vm1, %v5655_v31 }
 0x2c8   :  { %2275 = vst.msk [vmem:[#allocation2 + $0x1a0] sm:$0xff] %vm680_vm5, %v2200_v44  ;;  %v2040_v62 = vpop.permute.xlu0 %2039 }
 0x2c9   :  { %2130 = vst.msk [vmem:[#allocation2 + $0x128] sm:$0xff] %vm549_vm4, %v2040_v62  ;;  %2867 = vrot.lane.b32.xlu1 %v5641_v35, %s3559_s17 }
 0x2ca   :  { %2704 = vrot.lane.b32.xlu0 %v5646_v2, %s3558_s14 }
 0x2cb   :  { %v2168_v24 = vpop.permute.xlu1 %2167 }
 0x2cc   :  { %2259 = vst.msk [vmem:[#allocation2 + $0x120] sm:$0xff] %vm680_vm5, %v2168_v24  ;;  %v2202_v45 = vpop.permute.xlu0 %2201 }
 0x2cd   :  { %2276 = vst.msk [vmem:[#allocation2 + $0x1a8] sm:$0xff] %vm680_vm5, %v2202_v45  ;;  %1265 = vrot.lane.b32.xlu1 %v6656_v11, %s3559_s17 }
 0x2ce   :  { %2869 = vrot.lane.b32.xlu0 %v5669_v20, %s3559_s17 }
 0x2cf   :  { %v2334_v63 = vpop.permute.xlu1 %2333 }
 0x2d0   :  { %2409 = vst.msk [vmem:[#allocation2 + $0x1a0] sm:$0xff] %vm815_vm6, %v2334_v63  ;;  %v2170_v12 = vpop.permute.xlu0 %2169 }
 0x2d1   :  { %2260 = vst.msk [vmem:[#allocation2 + $0x128] sm:$0xff] %vm680_vm5, %v2170_v12  ;;  %1869 = vrot.lane.b32.xlu1 %v5421_v48, %s3552_s11 }
 0x2d2   :  { %1267 = vrot.lane.b32.xlu0 %v6657_v36, %s3559_s17 }
 0x2d3   :  { %v2302_v48 = vpop.permute.xlu1 %2301 }
 0x2d4   :  { %2393 = vst.msk [vmem:[#allocation2 + $0x120] sm:$0xff] %vm815_vm6, %v2302_v48  ;;  %v2336_v19 = vpop.permute.xlu0 %2335  ;;  %v6658_v48 = vld [vmem:[#allocation27_spill] sm:$0xff] }
 0x2d5   :  { %2410 = vst.msk [vmem:[#allocation2 + $0x1a8] sm:$0xff] %vm815_vm6, %v2336_v19  ;;  %2835 = vrot.lane.b32.xlu1 %v5696_v14, %s3559_s17  ;;  %v1812_v19 = vrot.slane %v5480_v7, 1 }
 0x2d6   :  { %1871 = vrot.lane.b32.xlu0 %v5436_v33, %s3552_s11 }
 0x2d7   :  { %v2467_v6 = vpop.permute.xlu1 %2466 }
 0x2d8   :  { %2542 = vst.msk [vmem:[#allocation2 + $0x1a0] sm:$0xff] %vm949_vm7, %v2467_v6  ;;  %v2304_v57 = vpop.permute.xlu0 %2303  ;;  %v1814_v6 = vrot.slane %v3304_v22, 1 }
 0x2d9   :  { %2394 = vst.msk [vmem:[#allocation2 + $0x128] sm:$0xff] %vm815_vm6, %v2304_v57  ;;  %1837 = vrot.lane.b32.xlu1 %v5448_v40, %s3552_s11 }
 0x2da   :  { %2837 = vrot.lane.b32.xlu0 %v5709_v34, %s3559_s17 }
 0x2db   :  { %v2435_v4 = vpop.permute.xlu1 %2434 }
 0x2dc   :  { %2526 = vst.msk [vmem:[#allocation2 + $0x120] sm:$0xff] %vm949_vm7, %v2435_v4  ;;  %v2469_v49 = vpop.permute.xlu0 %2468  ;;  %v1811_v4 = vrot.slane %v5459_v46, 1 }
 0x2dd   :  { %2543 = vst.msk [vmem:[#allocation2 + $0x1a8] sm:$0xff] %vm949_vm7, %v2469_v49  ;;  %2077 = vrot.lane.b32.xlu1 %v5464_v16, %s3553_s18 }
 0x2de   :  { %1839 = vrot.lane.b32.xlu0 %v5471_v59, %s3552_s11 }
 0x2df   :  { %v2597_v33 = vpop.permute.xlu1 %2596 }
 0x2e0   :  { %2672 = vst.msk [vmem:[#allocation2 + $0x1a0] sm:$0xff] %vm1080_vm8, %v2597_v33  ;;  %v2437_v52 = vpop.permute.xlu0 %2436 }
 0x2e1   :  { %2527 = vst.msk [vmem:[#allocation2 + $0x128] sm:$0xff] %vm949_vm7, %v2437_v52  ;;  %2045 = vrot.lane.b32.xlu1 %v5518_v30, %s3553_s18 }
 0x2e2   :  { %2079 = vrot.lane.b32.xlu0 %v5487_v53, %s3553_s18 }
 0x2e3   :  { %v2565_v40 = vpop.permute.xlu1 %2564 }
 0x2e4   :  { %2656 = vst.msk [vmem:[#allocation2 + $0x120] sm:$0xff] %vm1080_vm8, %v2565_v40  ;;  %v2599_v55 = vpop.permute.xlu0 %2598 }
 0x2e5   :  { %2673 = vst.msk [vmem:[#allocation2 + $0x1a8] sm:$0xff] %vm1080_vm8, %v2599_v55  ;;  %2207 = vrot.lane.b32.xlu1 %v5273_v0, %s3554_s19  ;;  %v5793_v55 = vsel %vm162_vm0, %v1812_v19, %v1814_v6 }
 0x2e6   :  { %2047 = vrot.lane.b32.xlu0 %v5527_v25, %s3553_s18 }
 0x2e7   :  { %v2731_v16 = vpop.permute.xlu1 %2730 }
 0x2e8   :  { %2806 = vst.msk [vmem:[#allocation2 + $0x1a0] sm:$0xff] %vm1215_vm9, %v2731_v16  ;;  %v2567_v59 = vpop.permute.xlu0 %2566 }
 0x2e9   :  { %2657 = vst.msk [vmem:[#allocation2 + $0x128] sm:$0xff] %vm1080_vm8, %v2567_v59  ;;  %2175 = vrot.lane.b32.xlu1 %v5292_v61, %s3554_s19  ;;  %v5798_v59 = vsel %vm162_vm0, %v1811_v4, %v1812_v19 }
 0x2ea   :  { %2209 = vrot.lane.b32.xlu0 %v5297_v42, %s3554_s19 }
 0x2eb   :  { %v1294_v53 = vpop.permute.xlu1 %1293 }
 0x2ec   :  { %1370 = vst.msk [vmem:[#allocation2 + $0xa0] sm:$0xff] %vm1349_vm10, %v1294_v53  ;;  %v2733_v30 = vpop.permute.xlu0 %2732  ;;  %v3280_v53 = vld [vmem:[%s6468_s0 + $0x250] sm:$0x3] }
 0x2ed   :  { %2807 = vst.msk [vmem:[#allocation2 + $0x1a8] sm:$0xff] %vm1215_vm9, %v2733_v30  ;;  %2341 = vrot.lane.b32.xlu1 %v5603_v51, %s3555_s24 }
 0x2ee   :  { %2177 = vrot.lane.b32.xlu0 %v5315_v58, %s3554_s19 }
 0x2ef   :  { %v2699_v0 = vpop.permute.xlu1 %2698 }
 0x2f0   :  { %2790 = vst.msk [vmem:[#allocation2 + $0x120] sm:$0xff] %vm1215_vm9, %v2699_v0  ;;  %v1296_v25 = vpop.permute.xlu0 %1295  ;;  %v1772_v0 = vrot.slane %v5496_v54, 1 }
 0x2f1   :  { %1371 = vst.msk [vmem:[#allocation2 + $0xa8] sm:$0xff] %vm1349_vm10, %v1296_v25  ;;  %2309 = vrot.lane.b32.xlu1 %v5630_v50, %s3555_s24  ;;  %v1774_v25 = vrot.slane %v3280_v53, 1 }
 0x2f2   :  { %2343 = vrot.lane.b32.xlu0 %v5618_v21, %s3555_s24 }
 0x2f3   :  { %v2864_v61 = vpop.permute.xlu1 %2863  ;;  %v1402_v56 = vld [vmem:[#allocation2 + $0xa0] sm:$0xff] }
 0x2f4   :  { %2939 = vst.msk [vmem:[#allocation2 + $0x1a0] sm:$0xff] %vm1349_vm10, %v2864_v61  ;;  %v2701_v42 = vpop.permute.xlu0 %2700 }
 0x2f5   :  { %2791 = vst.msk [vmem:[#allocation2 + $0x128] sm:$0xff] %vm1215_vm9, %v2701_v42  ;;  %2474 = vrot.lane.b32.xlu1 %v5641_v35, %s3556_s27  ;;  %v1771_v42 = vrot.slane %v5501_v32, 1 }
 0x2f6   :  { %2311 = vrot.lane.b32.xlu0 %v5646_v2, %s3555_s24 }
 0x2f7   :  { %v1262_v58 = vpop.permute.xlu1 %1261 }
 0x2f8   :  { %1354 = vst.msk [vmem:[#allocation2 + $0x20] sm:$0xff] %vm1349_vm10, %v1262_v58  ;;  %v2866_v44 = vpop.permute.xlu0 %2865  ;;  %v1403_v62 = vld [vmem:[#allocation2 + $0xa8] sm:$0xff] }
 0x2f9   :  { %2940 = vst.msk [vmem:[#allocation2 + $0x1a8] sm:$0xff] %vm1349_vm10, %v2866_v44  ;;  %2442 = vrot.lane.b32.xlu1 %v5696_v14, %s3556_s27  ;;  %v3427_v24 = vpack.c.bf16 %v1403_v62, %v1402_v56  ;;  %v6659_v62 = vld [vmem:[#allocation47_spill] sm:$0xff] }
 0x2fa   :  { %2476 = vrot.lane.b32.xlu0 %v5669_v20, %s3556_s27 }
 0x2fb   :  { %3429 = vmatprep.subr.msk.bf16.mxu0 %vm5392_vm12, %v3427_v24  ;;  %v1866_v45 = vpop.permute.xlu1 %1865  ;;  %v2971_v12 = vld [vmem:[#allocation2 + $0x1a0] sm:$0xff] }
 0x2fc   :  { %1939 = vst.msk [vmem:[#allocation2 + $0x1b0] sm:$0xff] %vm339_vm3, %v1866_v45  ;;  %v1264_v11 = vpop.permute.xlu0 %1263  ;;  %v6660_v45 = vld [vmem:[#allocation48_spill] sm:$0xff] }
 0x2fd   :  { %1355 = vst.msk [vmem:[#allocation2 + $0x28] sm:$0xff] %vm1349_vm10, %v1264_v11  ;;  %2604 = vrot.lane.b32.xlu1 %v5459_v46, %s3557_s12  ;;  %v5818_v11 = vsel %vm162_vm0, %v1772_v0, %v1774_v25 }
 0x2fe   :  { %2444 = vrot.lane.b32.xlu0 %v5709_v34, %s3556_s27 }
 0x2ff   :  { %v2832_v5 = vpop.permute.xlu1 %2831  ;;  %v1386_v33 = vld [vmem:[#allocation2 + $0x20] sm:$0xff] }
 0x300   :  { %2923 = vst.msk [vmem:[#allocation2 + $0x120] sm:$0xff] %vm1349_vm10, %v2832_v5  ;;  %v1868_v63 = vpop.permute.xlu0 %1867  ;;  %v2972_v36 = vld [vmem:[#allocation2 + $0x1a8] sm:$0xff]  ;;  %v2020_v5 = vrot.slane %v5480_v7, 2 }
 0x301   :  { %1940 = vst.msk [vmem:[#allocation2 + $0x1b8] sm:$0xff] %vm339_vm3, %v1868_v63  ;;  %1169 = vrot.lane.b32.xlu1 %v6658_v48, %s3558_s14  ;;  %v3475_v27 = vpack.c.bf16 %v2972_v36, %v2971_v12  ;;  %v2022_v63 = vrot.slane %v3304_v22, 2  ;;  %v5824_v36 = vsel %vm162_vm0, %v1771_v42, %v1772_v0  ;;  %v2019_v48 = vrot.slane %v5459_v46, 2 }
 0x302   :  { %2606 = vrot.lane.b32.xlu0 %v5480_v7, %s3557_s12  ;;  %v1979_v0 = vrot.slane %v5501_v32, 2 }
 0x303   :  { %3477 = vmatprep.subr.msk.bf16.mxu1 %vm5392_vm12, %v3475_v27  ;;  %v1834_v57 = vpop.permute.xlu1 %1833  ;;  %v5834_v22 = vsel %vm372_vm2, %v2020_v5, %v2022_v63  ;;  %v5837_v6 = vsel %vm372_vm2, %v2019_v48, %v2020_v5 }
 0x304   :  { %1923 = vst.msk [vmem:[#allocation2 + $0x130] sm:$0xff] %vm339_vm3, %v1834_v57  ;;  %v2834_v49 = vpop.permute.xlu0 %2833  ;;  %v1387_v52 = vld [vmem:[#allocation2 + $0x28] sm:$0xff] }
 0x305   :  { %2924 = vst.msk [vmem:[#allocation2 + $0x128] sm:$0xff] %vm1349_vm10, %v2834_v49  ;;  %2574 = vrot.lane.b32.xlu1 %v5496_v54, %s3557_s12  ;;  %v3430_v40 = vpack.c.bf16 %v1387_v52, %v1386_v33  ;;  %v6661_v33 = vld [vmem:[#allocation35_spill] sm:$0xff]  ;;  %v6662_v52 = vld [vmem:[#allocation36_spill] sm:$0xff] }
 0x306   :  { %2572 = vrot.lane.b32.xlu0 %v5501_v32, %s3557_s12 }
 0x307   :  { %3432 = vmatpush3.bf16.xpose.msk.msra.mxu0 %vm5392_vm12, %v3430_v40  ;;  %v2074_v16 = vpop.permute.xlu1 %2073  ;;  %v2955_v44 = vld [vmem:[#allocation2 + $0x120] sm:$0xff]  ;;  %v1980_v40 = vrot.slane %v5496_v54, 2 }
 0x308   :  { %2147 = vst.msk [vmem:[#allocation2 + $0x1b0] sm:$0xff] %vm549_vm4, %v2074_v16  ;;  %v1836_v30 = vpop.permute.xlu0 %1835  ;;  %v1982_v16 = vrot.slane %v3280_v53, 2 }
 0x309   :  { %1924 = vst.msk [vmem:[#allocation2 + $0x138] sm:$0xff] %vm339_vm3, %v1836_v30  ;;  %2740 = vrot.lane.b32.xlu1 %v5793_v55, %s3558_s14  ;;  %v5863_v53 = vsel %vm372_vm2, %v1979_v0, %v1980_v40  ;;  %v6663_v0 = vld [vmem:[#allocation29_spill] sm:$0xff] }
 0x30a   :  { %2738 = vrot.lane.b32.xlu0 %v5798_v59, %s3558_s14 }
 0x30b   :  { %v2042_v61 = vpop.permute.xlu1 %2041 }
 0x30c   :  { %2131 = vst.msk [vmem:[#allocation2 + $0x130] sm:$0xff] %vm549_vm4, %v2042_v61  ;;  %v2076_v58 = vpop.permute.xlu0 %2075  ;;  %v2956_v56 = vld [vmem:[#allocation2 + $0x128] sm:$0xff]  ;;  %v5860_v61 = vsel %vm372_vm2, %v1980_v40, %v1982_v16 }
 0x30d   :  { %2148 = vst.msk [vmem:[#allocation2 + $0x1b8] sm:$0xff] %vm549_vm4, %v2076_v58  ;;  %1303 = vrot.lane.b32.xlu1 %v6659_v62, %s3559_s17  ;;  %v3478_v24 = vpack.c.bf16 %v2956_v56, %v2955_v44 }
 0x30e   :  { %1301 = vrot.lane.b32.xlu0 %v6660_v45, %s3559_s17 }
 0x30f   :  { %3480 = vmatpush3.bf16.xpose.msk.msra.mxu1 %vm5392_vm12, %v3478_v24  ;;  %v2204_v12 = vpop.permute.xlu1 %2203 }
 0x310   :  { %2277 = vst.msk [vmem:[#allocation2 + $0x1b0] sm:$0xff] %vm680_vm5, %v2204_v12  ;;  %v2044_v27 = vpop.permute.xlu0 %2043 }
 0x311   :  { %2132 = vst.msk [vmem:[#allocation2 + $0x138] sm:$0xff] %vm549_vm4, %v2044_v27  ;;  %2708 = vrot.lane.b32.xlu1 %v5818_v11, %s3558_s14 }
 0x312   :  { %2706 = vrot.lane.b32.xlu0 %v5824_v36, %s3558_s14 }
 0x313   :  { %v2172_v19 = vpop.permute.xlu1 %2171 }
 0x314   :  { %2261 = vst.msk [vmem:[#allocation2 + $0x130] sm:$0xff] %vm680_vm5, %v2172_v19  ;;  %v2206_v57 = vpop.permute.xlu0 %2205 }
 0x315   :  { %2278 = vst.msk [vmem:[#allocation2 + $0x1b8] sm:$0xff] %vm680_vm5, %v2206_v57  ;;  %2873 = vrot.lane.b32.xlu1 %v5834_v22, %s3559_s17 }
 0x316   :  { %2871 = vrot.lane.b32.xlu0 %v5837_v6, %s3559_s17 }
 0x317   :  { %v2338_v4 = vpop.permute.xlu1 %2337 }
 0x318   :  { %2411 = vst.msk [vmem:[#allocation2 + $0x1b0] sm:$0xff] %vm815_vm6, %v2338_v4  ;;  %v2174_v49 = vpop.permute.xlu0 %2173 }
 0x319   :  { %2262 = vst.msk [vmem:[#allocation2 + $0x138] sm:$0xff] %vm680_vm5, %v2174_v49  ;;  %1271 = vrot.lane.b32.xlu1 %v6661_v33, %s3559_s17 }
 0x31a   :  { %1269 = vrot.lane.b32.xlu0 %v6662_v52, %s3559_s17  ;;  %v3307_v52 = vld [vmem:[%s6468_s0 + $0x328] sm:$0x3] }
 0x31b   :  { %v2306_v30 = vpop.permute.xlu1 %2305 }
 0x31c   :  { %2395 = vst.msk [vmem:[#allocation2 + $0x130] sm:$0xff] %vm815_vm6, %v2306_v30  ;;  %v2340_v25 = vpop.permute.xlu0 %2339 }
 0x31d   :  { %2412 = vst.msk [vmem:[#allocation2 + $0x1b8] sm:$0xff] %vm815_vm6, %v2340_v25  ;;  %1875 = vrot.lane.b32.xlu1 %v5618_v21, %s3552_s11 }
 0x31e   :  { %1873 = vrot.lane.b32.xlu0 %v5603_v51, %s3552_s11 }
 0x31f   :  { %v2471_v42 = vpop.permute.xlu1 %2470 }
 0x320   :  { %2544 = vst.msk [vmem:[#allocation2 + $0x1b0] sm:$0xff] %vm949_vm7, %v2471_v42  ;;  %v2308_v58 = vpop.permute.xlu0 %2307  ;;  %v6664_v42 = vld [vmem:[#allocation30_spill] sm:$0xff] }
 0x321   :  { %2396 = vst.msk [vmem:[#allocation2 + $0x138] sm:$0xff] %vm815_vm6, %v2308_v58  ;;  %2841 = vrot.lane.b32.xlu1 %v5860_v61, %s3559_s17  ;;  %v1817_v58 = vrot.slane %v5655_v31, 1 }
 0x322   :  { %2839 = vrot.lane.b32.xlu0 %v5863_v53, %s3559_s17 }
 0x323   :  { %v2439_v21 = vpop.permute.xlu1 %2438 }
 0x324   :  { %2528 = vst.msk [vmem:[#allocation2 + $0x130] sm:$0xff] %vm949_vm7, %v2439_v21  ;;  %v2473_v51 = vpop.permute.xlu0 %2472  ;;  %v1819_v21 = vrot.slane %v3307_v52, 1 }
 0x325   :  { %2545 = vst.msk [vmem:[#allocation2 + $0x1b8] sm:$0xff] %vm949_vm7, %v2473_v51  ;;  %1843 = vrot.lane.b32.xlu1 %v5646_v2, %s3552_s11 }
 0x326   :  { %1841 = vrot.lane.b32.xlu0 %v5630_v50, %s3552_s11 }
 0x327   :  { %v2601_v44 = vpop.permute.xlu1 %2600 }
 0x328   :  { %2674 = vst.msk [vmem:[#allocation2 + $0x1b0] sm:$0xff] %vm1080_vm8, %v2601_v44  ;;  %v2441_v56 = vpop.permute.xlu0 %2440  ;;  %v1816_v44 = vrot.slane %v5660_v17, 1 }
 0x329   :  { %2529 = vst.msk [vmem:[#allocation2 + $0x138] sm:$0xff] %vm949_vm7, %v2441_v56  ;;  %2083 = vrot.lane.b32.xlu1 %v5669_v20, %s3553_s18 }
 0x32a   :  { %2081 = vrot.lane.b32.xlu0 %v5641_v35, %s3553_s18 }
 0x32b   :  { %v2569_v62 = vpop.permute.xlu1 %2568 }
 0x32c   :  { %2658 = vst.msk [vmem:[#allocation2 + $0x130] sm:$0xff] %vm1080_vm8, %v2569_v62  ;;  %v2603_v24 = vpop.permute.xlu0 %2602  ;;  %v5955_v62 = vsel %vm162_vm0, %v1817_v58, %v1819_v21 }
 0x32d   :  { %2675 = vst.msk [vmem:[#allocation2 + $0x1b8] sm:$0xff] %vm1080_vm8, %v2603_v24  ;;  %2051 = vrot.lane.b32.xlu1 %v5709_v34, %s3553_s18 }
 0x32e   :  { %2049 = vrot.lane.b32.xlu0 %v5696_v14, %s3553_s18 }
 0x32f   :  { %v2735_v50 = vpop.permute.xlu1 %2734 }
 0x330   :  { %2808 = vst.msk [vmem:[#allocation2 + $0x1b0] sm:$0xff] %vm1215_vm9, %v2735_v50  ;;  %v2571_v2 = vpop.permute.xlu0 %2570  ;;  %v5958_v50 = vsel %vm162_vm0, %v1816_v44, %v1817_v58 }
 0x331   :  { %2659 = vst.msk [vmem:[#allocation2 + $0x138] sm:$0xff] %vm1080_vm8, %v2571_v2  ;;  %2213 = vrot.lane.b32.xlu1 %v5480_v7, %s3554_s19  ;;  %v3283_v2 = vld [vmem:[%s6468_s0 + $0x268] sm:$0x3] }
 0x332   :  { %2211 = vrot.lane.b32.xlu0 %v5459_v46, %s3554_s19 }
 0x333   :  { %v1298_v35 = vpop.permute.xlu1 %1297 }
 0x334   :  { %1372 = vst.msk [vmem:[#allocation2 + $0xb0] sm:$0xff] %vm1349_vm10, %v1298_v35  ;;  %v2737_v20 = vpop.permute.xlu0 %2736 }
 0x335   :  { %2809 = vst.msk [vmem:[#allocation2 + $0x1b8] sm:$0xff] %vm1215_vm9, %v2737_v20  ;;  %2181 = vrot.lane.b32.xlu1 %v5496_v54, %s3554_s19 }
 0x336   :  { %2179 = vrot.lane.b32.xlu0 %v5501_v32, %s3554_s19 }
 0x337   :  { %v2703_v14 = vpop.permute.xlu1 %2702 }
 0x338   :  { %2792 = vst.msk [vmem:[#allocation2 + $0x130] sm:$0xff] %vm1215_vm9, %v2703_v14  ;;  %v1300_v34 = vpop.permute.xlu0 %1299 }
 0x339   :  { %1373 = vst.msk [vmem:[#allocation2 + $0xb8] sm:$0xff] %vm1349_vm10, %v1300_v34  ;;  %2347 = vrot.lane.b32.xlu1 %v5793_v55, %s3555_s24 }
 0x33a   :  { %2345 = vrot.lane.b32.xlu0 %v5798_v59, %s3555_s24 }
 0x33b   :  { %v2868_v46 = vpop.permute.xlu1 %2867  ;;  %v1404_v45 = vld [vmem:[#allocation2 + $0xb0] sm:$0xff] }
 0x33c   :  { %2941 = vst.msk [vmem:[#allocation2 + $0x1b0] sm:$0xff] %vm1349_vm10, %v2868_v46  ;;  %v2705_v7 = vpop.permute.xlu0 %2704  ;;  %v1777_v46 = vrot.slane %v5686_v60, 1 }
 0x33d   :  { %2793 = vst.msk [vmem:[#allocation2 + $0x138] sm:$0xff] %vm1215_vm9, %v2705_v7  ;;  %2315 = vrot.lane.b32.xlu1 %v5818_v11, %s3555_s24  ;;  %v1779_v7 = vrot.slane %v3283_v2, 1 }
 0x33e   :  { %2313 = vrot.lane.b32.xlu0 %v5824_v36, %s3555_s24 }
 0x33f   :  { %v1266_v54 = vpop.permute.xlu1 %1265 }
 0x340   :  { %1356 = vst.msk [vmem:[#allocation2 + $0x30] sm:$0xff] %vm1349_vm10, %v1266_v54  ;;  %v2870_v32 = vpop.permute.xlu0 %2869  ;;  %v1405_v5 = vld [vmem:[#allocation2 + $0xb8] sm:$0xff] }
 0x341   :  { %2942 = vst.msk [vmem:[#allocation2 + $0x1b8] sm:$0xff] %vm1349_vm10, %v2870_v32  ;;  %2480 = vrot.lane.b32.xlu1 %v5834_v22, %s3556_s27  ;;  %v3433_v63 = vpack.c.bf16 %v1405_v5, %v1404_v45  ;;  %v1776_v32 = vrot.slane %v5691_v43, 1  ;;  %v5980_v5 = vsel %vm162_vm0, %v1777_v46, %v1779_v7 }
 0x342   :  { %2478 = vrot.lane.b32.xlu0 %v5837_v6, %s3556_s27 }
 0x343   :  { %3435 = vmatprep.subr.msk.bf16.mxu0 %vm5392_vm12, %v3433_v63  ;;  %v1870_v12 = vpop.permute.xlu1 %1869  ;;  %v2973_v57 = vld [vmem:[#allocation2 + $0x1b0] sm:$0xff]  ;;  %v2025_v63 = vrot.slane %v5655_v31, 2 }
 0x344   :  { %1941 = vst.msk [vmem:[#allocation2 + $0x1c0] sm:$0xff] %vm339_vm3, %v1870_v12  ;;  %v1268_v48 = vpop.permute.xlu0 %1267  ;;  %v2027_v12 = vrot.slane %v3307_v52, 2 }
 0x345   :  { %1357 = vst.msk [vmem:[#allocation2 + $0x38] sm:$0xff] %vm1349_vm10, %v1268_v48  ;;  %2448 = vrot.lane.b32.xlu1 %v5860_v61, %s3556_s27 }
 0x346   :  { %2446 = vrot.lane.b32.xlu0 %v5863_v53, %s3556_s27 }
 0x347   :  { %v2836_v27 = vpop.permute.xlu1 %2835  ;;  %v1388_v16 = vld [vmem:[#allocation2 + $0x30] sm:$0xff] }
 0x348   :  { %2925 = vst.msk [vmem:[#allocation2 + $0x130] sm:$0xff] %vm1349_vm10, %v2836_v27  ;;  %v1872_v19 = vpop.permute.xlu0 %1871  ;;  %v2974_v4 = vld [vmem:[#allocation2 + $0x1b8] sm:$0xff]  ;;  %v5984_v27 = vsel %vm162_vm0, %v1776_v32, %v1777_v46 }
 0x349   :  { %1942 = vst.msk [vmem:[#allocation2 + $0x1c8] sm:$0xff] %vm339_vm3, %v1872_v19  ;;  %2610 = vrot.lane.b32.xlu1 %v5655_v31, %s3557_s12  ;;  %v3481_v49 = vpack.c.bf16 %v2974_v4, %v2973_v57  ;;  %v2024_v19 = vrot.slane %v5660_v17, 2 }
 0x34a   :  { %2608 = vrot.lane.b32.xlu0 %v5660_v17, %s3557_s12 }
 0x34b   :  { %3483 = vmatprep.subr.msk.bf16.mxu1 %vm5392_vm12, %v3481_v49  ;;  %v1838_v33 = vpop.permute.xlu1 %1837  ;;  %v5997_v4 = vsel %vm372_vm2, %v2024_v19, %v2025_v63  ;;  %v6097_v19 = vld [vmem:[%s6468_s0 + $0x330] sm:$0xff] }
 0x34c   :  { %1925 = vst.msk [vmem:[#allocation2 + $0x140] sm:$0xff] %vm339_vm3, %v1838_v33  ;;  %v2838_v40 = vpop.permute.xlu0 %2837  ;;  %v1389_v30 = vld [vmem:[#allocation2 + $0x38] sm:$0xff] }
 0x34d   :  { %2926 = vst.msk [vmem:[#allocation2 + $0x138] sm:$0xff] %vm1349_vm10, %v2838_v40  ;;  %1173 = vrot.lane.b32.xlu1 %v6663_v0, %s3558_s14  ;;  %v3436_v25 = vpack.c.bf16 %v1389_v30, %v1388_v16  ;;  %v6665_v40 = vld [vmem:[#allocation37_spill] sm:$0xff]  ;;  %v6666_v16 = vld [vmem:[#allocation38_spill] sm:$0xff]  ;;  %v1985_v30 = vrot.slane %v5686_v60, 2  ;;  %v1987_v0 = vrot.slane %v3283_v2, 2 }
 0x34e   :  { %1171 = vrot.lane.b32.xlu0 %v6664_v42, %s3558_s14  ;;  %v1984_v42 = vrot.slane %v5691_v43, 2 }
 0x34f   :  { %3438 = vmatpush3.bf16.xpose.msk.msra.mxu0 %vm5392_vm12, %v3436_v25  ;;  %v2078_v51 = vpop.permute.xlu1 %2077  ;;  %v2957_v20 = vld [vmem:[#allocation2 + $0x130] sm:$0xff]  ;;  %v6020_v21 = vsel %vm372_vm2, %v1985_v30, %v1987_v0 }
 0x350   :  { %2149 = vst.msk [vmem:[#allocation2 + $0x1c0] sm:$0xff] %vm549_vm4, %v2078_v51  ;;  %v1840_v56 = vpop.permute.xlu0 %1839  ;;  %v6023_v44 = vsel %vm372_vm2, %v1984_v42, %v1985_v30  ;;  %v6667_v30 = vld [vmem:[#allocation49_spill] sm:$0xff] }
 0x351   :  { %1926 = vst.msk [vmem:[#allocation2 + $0x148] sm:$0xff] %vm339_vm3, %v1840_v56  ;;  %2578 = vrot.lane.b32.xlu1 %v5686_v60, %s3557_s12 }
 0x352   :  { %2576 = vrot.lane.b32.xlu0 %v5691_v43, %s3557_s12 }
 0x353   :  { %v2046_v24 = vpop.permute.xlu1 %2045 }
 0x354   :  { %2133 = vst.msk [vmem:[#allocation2 + $0x140] sm:$0xff] %vm549_vm4, %v2046_v24  ;;  %v2080_v35 = vpop.permute.xlu0 %2079  ;;  %v2958_v14 = vld [vmem:[#allocation2 + $0x138] sm:$0xff] }
 0x355   :  { %2150 = vst.msk [vmem:[#allocation2 + $0x1c8] sm:$0xff] %vm549_vm4, %v2080_v35  ;;  %2744 = vrot.lane.b32.xlu1 %v5955_v62, %s3558_s14  ;;  %v3484_v34 = vpack.c.bf16 %v2958_v14, %v2957_v20 }
 0x356   :  { %2742 = vrot.lane.b32.xlu0 %v5958_v50, %s3558_s14 }
 0x357   :  { %3486 = vmatpush3.bf16.xpose.msk.msra.mxu1 %vm5392_vm12, %v3484_v34  ;;  %v2208_v54 = vpop.permute.xlu1 %2207 }
 0x358   :  { %2279 = vst.msk [vmem:[#allocation2 + $0x1c0] sm:$0xff] %vm680_vm5, %v2208_v54  ;;  %v2048_v45 = vpop.permute.xlu0 %2047 }
 0x359   :  { %2134 = vst.msk [vmem:[#allocation2 + $0x148] sm:$0xff] %vm549_vm4, %v2048_v45  ;;  %1307 = vrot.lane.b32.xlu1 %v4298_v9, %s3559_s17  ;;  %v5994_v9 = vsel %vm372_vm2, %v2025_v63, %v2027_v12  ;;  %v6090_v12 = vld [vmem:[%s6468_s0 + $0x338] sm:$0xff] }
 0x35a   :  { %1305 = vrot.lane.b32.xlu0 %v4301_v18, %s3559_s17  ;;  %v2289_v0 = vrot.slane %v6090_v12, 1 }
 0x35b   :  { %v2176_v48 = vpop.permute.xlu1 %2175 }
 0x35c   :  { %2263 = vst.msk [vmem:[#allocation2 + $0x140] sm:$0xff] %vm680_vm5, %v2176_v48  ;;  %v2210_v57 = vpop.permute.xlu0 %2209 }
 0x35d   :  { %2280 = vst.msk [vmem:[#allocation2 + $0x1c8] sm:$0xff] %vm680_vm5, %v2210_v57  ;;  %2712 = vrot.lane.b32.xlu1 %v5980_v5, %s3558_s14 }
 0x35e   :  { %2710 = vrot.lane.b32.xlu0 %v5984_v27, %s3558_s14 }
 0x35f   :  { %v2342_v18 = vpop.permute.xlu1 %2341 }
 0x360   :  { %2413 = vst.msk [vmem:[#allocation2 + $0x1c0] sm:$0xff] %vm815_vm6, %v2342_v18  ;;  %v2178_v49 = vpop.permute.xlu0 %2177 }
 0x361   :  { %2264 = vst.msk [vmem:[#allocation2 + $0x148] sm:$0xff] %vm680_vm5, %v2178_v49  ;;  %2877 = vrot.lane.b32.xlu1 %v5994_v9, %s3559_s17 }
 0x362   :  { %2875 = vrot.lane.b32.xlu0 %v5997_v4, %s3559_s17 }
 0x363   :  { %v2310_v33 = vpop.permute.xlu1 %2309 }
 0x364   :  { %2397 = vst.msk [vmem:[#allocation2 + $0x140] sm:$0xff] %vm815_vm6, %v2310_v33  ;;  %v2344_v52 = vpop.permute.xlu0 %2343 }
 0x365   :  { %2414 = vst.msk [vmem:[#allocation2 + $0x1c8] sm:$0xff] %vm815_vm6, %v2344_v52  ;;  %1275 = vrot.lane.b32.xlu1 %v6665_v40, %s3559_s17  ;;  %v3310_v40 = vld [vmem:[%s6468_s0 + $0x340] sm:$0x3] }
 0x366   :  { %1273 = vrot.lane.b32.xlu0 %v6666_v16, %s3559_s17  ;;  %v2291_v42 = vrot.slane %v3310_v40, 1 }
 0x367   :  { %v2475_v25 = vpop.permute.xlu1 %2474 }
 0x368   :  { %2546 = vst.msk [vmem:[#allocation2 + $0x1c0] sm:$0xff] %vm949_vm7, %v2475_v25  ;;  %v2312_v58 = vpop.permute.xlu0 %2311  ;;  %v6668_v25 = vld [vmem:[#allocation50_spill] sm:$0xff] }
 0x369   :  { %2398 = vst.msk [vmem:[#allocation2 + $0x148] sm:$0xff] %vm815_vm6, %v2312_v58  ;;  %1879 = vrot.lane.b32.xlu1 %v5793_v55, %s3552_s11  ;;  %v2288_v58 = vrot.slane %v6097_v19, 1 }
 0x36a   :  { %1877 = vrot.lane.b32.xlu0 %v5798_v59, %s3552_s11 }
 0x36b   :  { %v2443_v51 = vpop.permute.xlu1 %2442 }
 0x36c   :  { %2530 = vst.msk [vmem:[#allocation2 + $0x140] sm:$0xff] %vm949_vm7, %v2443_v51  ;;  %v2477_v56 = vpop.permute.xlu0 %2476 }
 0x36d   :  { %2547 = vst.msk [vmem:[#allocation2 + $0x1c8] sm:$0xff] %vm949_vm7, %v2477_v56  ;;  %2845 = vrot.lane.b32.xlu1 %v6020_v21, %s3559_s17 }
 0x36e   :  { %2843 = vrot.lane.b32.xlu0 %v6023_v44, %s3559_s17 }
 0x36f   :  { %v2605_v55 = vpop.permute.xlu1 %2604 }
 0x370   :  { %2676 = vst.msk [vmem:[#allocation2 + $0x1c0] sm:$0xff] %vm1080_vm8, %v2605_v55  ;;  %v2445_v59 = vpop.permute.xlu0 %2444 }
 0x371   :  { %2531 = vst.msk [vmem:[#allocation2 + $0x148] sm:$0xff] %vm949_vm7, %v2445_v59  ;;  %1847 = vrot.lane.b32.xlu1 %v5818_v11, %s3552_s11 }
 0x372   :  { %1845 = vrot.lane.b32.xlu0 %v5824_v36, %s3552_s11 }
 0x373   :  { %v1170_v24 = vpop.permute.xlu1 %1169 }
 0x374   :  { %1241 = vst.msk [vmem:[#allocation2 + $0xc8] sm:$0xff] %vm1215_vm9, %v1170_v24  ;;  %v2607_v2 = vpop.permute.xlu0 %2606 }
 0x375   :  { %2677 = vst.msk [vmem:[#allocation2 + $0x1c8] sm:$0xff] %vm1080_vm8, %v2607_v2  ;;  %2087 = vrot.lane.b32.xlu1 %v5834_v22, %s3553_s18  ;;  %v6125_v2 = vsel %vm162_vm0, %v2289_v0, %v2291_v42  ;;  %v3526_v42 = vld [vmem:[%s6468_s0 + $0x1a0] sm:$0xff] }
 0x376   :  { %2085 = vrot.lane.b32.xlu0 %v5837_v6, %s3553_s18 }
 0x377   :  { %v2575_v35 = vpop.permute.xlu1 %2574 }
 0x378   :  { %2661 = vst.msk [vmem:[#allocation2 + $0x148] sm:$0xff] %vm1080_vm8, %v2575_v35  ;;  %v2573_v20 = vpop.permute.xlu0 %2572 }
 0x379   :  { %2660 = vst.msk [vmem:[#allocation2 + $0x140] sm:$0xff] %vm1080_vm8, %v2573_v20  ;;  %2055 = vrot.lane.b32.xlu1 %v5860_v61, %s3553_s18  ;;  %v6130_v20 = vsel %vm162_vm0, %v2288_v58, %v2289_v0  ;;  %v1115_v58 = vrot.slane %v3526_v42, 1 }
 0x37a   :  { %2053 = vrot.lane.b32.xlu0 %v5863_v53, %s3553_s18 }
 0x37b   :  { %v2741_v11 = vpop.permute.xlu1 %2740 }
 0x37c   :  { %2811 = vst.msk [vmem:[#allocation2 + $0x1c8] sm:$0xff] %vm1215_vm9, %v2741_v11  ;;  %v2739_v36 = vpop.permute.xlu0 %2738 }
 0x37d   :  { %2810 = vst.msk [vmem:[#allocation2 + $0x1c0] sm:$0xff] %vm1215_vm9, %v2739_v36  ;;  %2217 = vrot.lane.b32.xlu1 %v5655_v31, %s3554_s19 }
 0x37e   :  { %2215 = vrot.lane.b32.xlu0 %v5660_v17, %s3554_s19 }
 0x37f   :  { %v1304_v22 = vpop.permute.xlu1 %1303 }
 0x380   :  { %1375 = vst.msk [vmem:[#allocation2 + $0xc8] sm:$0xff] %vm1349_vm10, %v1304_v22  ;;  %v1302_v6 = vpop.permute.xlu0 %1301 }
 0x381   :  { %1374 = vst.msk [vmem:[#allocation2 + $0xc0] sm:$0xff] %vm1349_vm10, %v1302_v6  ;;  %2185 = vrot.lane.b32.xlu1 %v5686_v60, %s3554_s19  ;;  %v2422_v6 = vrot.slane %v6090_v12, 2 }
 0x382   :  { %2183 = vrot.lane.b32.xlu0 %v5691_v43, %s3554_s19 }
 0x383   :  { %v2709_v61 = vpop.permute.xlu1 %2708 }
 0x384   :  { %2795 = vst.msk [vmem:[#allocation2 + $0x148] sm:$0xff] %vm1215_vm9, %v2709_v61  ;;  %v2707_v53 = vpop.permute.xlu0 %2706  ;;  %v2424_v61 = vrot.slane %v3310_v40, 2 }
 0x385   :  { %2794 = vst.msk [vmem:[#allocation2 + $0x140] sm:$0xff] %vm1215_vm9, %v2707_v53  ;;  %2351 = vrot.lane.b32.xlu1 %v5955_v62, %s3555_s24  ;;  %v2421_v53 = vrot.slane %v6097_v19, 2 }
 0x386   :  { %2349 = vrot.lane.b32.xlu0 %v5958_v50, %s3555_s24 }
 0x387   :  { %v2874_v31 = vpop.permute.xlu1 %2873  ;;  %v1407_v17 = vld [vmem:[#allocation2 + $0xc8] sm:$0xff] }
 0x388   :  { %2944 = vst.msk [vmem:[#allocation2 + $0x1c8] sm:$0xff] %vm1349_vm10, %v2874_v31  ;;  %v2872_v60 = vpop.permute.xlu0 %2871  ;;  %v1406_v14 = vld [vmem:[#allocation2 + $0xc0] sm:$0xff] }
 0x389   :  { %2943 = vst.msk [vmem:[#allocation2 + $0x1c0] sm:$0xff] %vm1349_vm10, %v2872_v60  ;;  %2319 = vrot.lane.b32.xlu1 %v5980_v5, %s3555_s24  ;;  %v3439_v43 = vpack.c.bf16 %v1407_v17, %v1406_v14 }
 0x38a   :  { %2317 = vrot.lane.b32.xlu0 %v5984_v27, %s3555_s24 }
 0x38b   :  { %3441 = vmatprep.subr.msk.bf16.mxu0 %vm5392_vm12, %v3439_v43  ;;  %v1272_v34 = vpop.permute.xlu1 %1271 }
 0x38c   :  { %1359 = vst.msk [vmem:[#allocation2 + $0x48] sm:$0xff] %vm1349_vm10, %v1272_v34  ;;  %v1270_v46 = vpop.permute.xlu0 %1269 }
 0x38d   :  { %1358 = vst.msk [vmem:[#allocation2 + $0x40] sm:$0xff] %vm1349_vm10, %v1270_v46  ;;  %2484 = vrot.lane.b32.xlu1 %v5994_v9, %s3556_s27  ;;  %v6669_v46 = vld [vmem:[#allocation39_spill] sm:$0xff] }
 0x38e   :  { %2482 = vrot.lane.b32.xlu0 %v5997_v4, %s3556_s27 }
 0x38f   :  { %v1876_v7 = vpop.permute.xlu1 %1875  ;;  %v2976_v54 = vld [vmem:[#allocation2 + $0x1c8] sm:$0xff] }
 0x390   :  { %1944 = vst.msk [vmem:[#allocation2 + $0x1d8] sm:$0xff] %vm339_vm3, %v1876_v7  ;;  %v1874_v32 = vpop.permute.xlu0 %1873  ;;  %v2975_v45 = vld [vmem:[#allocation2 + $0x1c0] sm:$0xff] }
 0x391   :  { %1943 = vst.msk [vmem:[#allocation2 + $0x1d0] sm:$0xff] %vm339_vm3, %v1874_v32  ;;  %2452 = vrot.lane.b32.xlu1 %v6020_v21, %s3556_s27  ;;  %v3487_v63 = vpack.c.bf16 %v2976_v54, %v2975_v45  ;;  %v6670_v7 = vld [vmem:[#allocation40_spill] sm:$0xff] }
 0x392   :  { %2450 = vrot.lane.b32.xlu0 %v6023_v44, %s3556_s27 }
 0x393   :  { %3489 = vmatprep.subr.msk.bf16.mxu1 %vm5392_vm12, %v3487_v63  ;;  %v2842_v48 = vpop.permute.xlu1 %2841  ;;  %v1391_v57 = vld [vmem:[#allocation2 + $0x48] sm:$0xff] }
 0x394   :  { %2928 = vst.msk [vmem:[#allocation2 + $0x148] sm:$0xff] %vm1349_vm10, %v2842_v48  ;;  %v2840_v18 = vpop.permute.xlu0 %2839  ;;  %v1390_v49 = vld [vmem:[#allocation2 + $0x40] sm:$0xff] }
 0x395   :  { %2927 = vst.msk [vmem:[#allocation2 + $0x140] sm:$0xff] %vm1349_vm10, %v2840_v18  ;;  %2614 = vrot.lane.b32.xlu1 %v6090_v12, %s3557_s12  ;;  %v3442_v33 = vpack.c.bf16 %v1391_v57, %v1390_v49 }
 0x396   :  { %2612 = vrot.lane.b32.xlu0 %v6097_v19, %s3557_s12 }
 0x397   :  { %3444 = vmatpush3.bf16.xpose.msk.msra.mxu0 %vm5392_vm12, %v3442_v33  ;;  %v1844_v52 = vpop.permute.xlu1 %1843 }
 0x398   :  { %1928 = vst.msk [vmem:[#allocation2 + $0x158] sm:$0xff] %vm339_vm3, %v1844_v52  ;;  %v1842_v16 = vpop.permute.xlu0 %1841 }
 0x399   :  { %1927 = vst.msk [vmem:[#allocation2 + $0x150] sm:$0xff] %vm339_vm3, %v1842_v16  ;;  %1177 = vrot.lane.b32.xlu1 %v6667_v30, %s3558_s14 }
 0x39a   :  { %1175 = vrot.lane.b32.xlu0 %v6668_v25, %s3558_s14 }
 0x39b   :  { %v2084_v51 = vpop.permute.xlu1 %2083  ;;  %v2960_v56 = vld [vmem:[#allocation2 + $0x148] sm:$0xff] }
 0x39c   :  { %2152 = vst.msk [vmem:[#allocation2 + $0x1d8] sm:$0xff] %vm549_vm4, %v2084_v51  ;;  %v2082_v55 = vpop.permute.xlu0 %2081  ;;  %v2959_v59 = vld [vmem:[#allocation2 + $0x140] sm:$0xff]  ;;  %v6247_v51 = vld [vmem:[%s6468_s0 + $0x350] sm:$0xff] }
 0x39d   :  { %2151 = vst.msk [vmem:[#allocation2 + $0x1d0] sm:$0xff] %vm549_vm4, %v2082_v55  ;;  %2582 = vrot.lane.b32.xlu1 %v4605_v10, %s3557_s12  ;;  %v3490_v24 = vpack.c.bf16 %v2960_v56, %v2959_v59  ;;  %v3527_v55 = vld [vmem:[%s6468_s0 + $0x198] sm:$0xff] }
 0x39e   :  { %2580 = vrot.lane.b32.xlu0 %v4600_v23, %s3557_s12 }
 0x39f   :  { %3492 = vmatpush3.bf16.xpose.msk.msra.mxu1 %vm5392_vm12, %v3490_v24  ;;  %v2052_v35 = vpop.permute.xlu1 %2051  ;;  %v6257_v24 = vld [vmem:[%s6468_s0 + $0x348] sm:$0xff] }
 0x3a0   :  { %2136 = vst.msk [vmem:[#allocation2 + $0x158] sm:$0xff] %vm549_vm4, %v2052_v35  ;;  %v2050_v11 = vpop.permute.xlu0 %2049 }
 0x3a1   :  { %2135 = vst.msk [vmem:[#allocation2 + $0x150] sm:$0xff] %vm549_vm4, %v2050_v11  ;;  %2748 = vrot.lane.b32.xlu1 %v6125_v2, %s3558_s14 }
 0x3a2   :  { %2746 = vrot.lane.b32.xlu0 %v6130_v20, %s3558_s14 }
 0x3a3   :  { %v2214_v36 = vpop.permute.xlu1 %2213 }
 0x3a4   :  { %2282 = vst.msk [vmem:[#allocation2 + $0x1d8] sm:$0xff] %vm680_vm5, %v2214_v36  ;;  %v2212_v22 = vpop.permute.xlu0 %2211 }
 0x3a5   :  { %2281 = vst.msk [vmem:[#allocation2 + $0x1d0] sm:$0xff] %vm680_vm5, %v2212_v22  ;;  %1311 = vrot.lane.b32.xlu1 %v4650_v47, %s3559_s17  ;;  %v6153_v47 = vsel %vm372_vm2, %v2422_v6, %v2424_v61 }
 0x3a6   :  { %1309 = vrot.lane.b32.xlu0 %v4653_v39, %s3559_s17  ;;  %v6156_v39 = vsel %vm372_vm2, %v2421_v53, %v2422_v6  ;;  %v3313_v6 = vld [vmem:[%s6468_s0 + $0x358] sm:$0x3]  ;;  %v2686_v53 = vrot.slane %v6247_v51, 1 }
 0x3a7   :  { %v2182_v31 = vpop.permute.xlu1 %2181 }
 0x3a8   :  { %2266 = vst.msk [vmem:[#allocation2 + $0x158] sm:$0xff] %vm680_vm5, %v2182_v31  ;;  %v2180_v17 = vpop.permute.xlu0 %2179  ;;  %v2688_v31 = vrot.slane %v3313_v6, 1 }
 0x3a9   :  { %2265 = vst.msk [vmem:[#allocation2 + $0x150] sm:$0xff] %vm680_vm5, %v2180_v17  ;;  %2716 = vrot.lane.b32.xlu1 %v4943_v8, %s3558_s14  ;;  %v2685_v17 = vrot.slane %v6257_v24, 1 }
 0x3aa   :  { %2714 = vrot.lane.b32.xlu0 %v4929_v37, %s3558_s14 }
 0x3ab   :  { %v2348_v60 = vpop.permute.xlu1 %2347 }
 0x3ac   :  { %2416 = vst.msk [vmem:[#allocation2 + $0x1d8] sm:$0xff] %vm815_vm6, %v2348_v60  ;;  %v2346_v14 = vpop.permute.xlu0 %2345 }
 0x3ad   :  { %2415 = vst.msk [vmem:[#allocation2 + $0x1d0] sm:$0xff] %vm815_vm6, %v2346_v14  ;;  %2881 = vrot.lane.b32.xlu1 %v6153_v47, %s3559_s17 }
 0x3ae   :  { %2879 = vrot.lane.b32.xlu0 %v6156_v39, %s3559_s17 }
 0x3af   :  { %v2316_v43 = vpop.permute.xlu1 %2315 }
 0x3b0   :  { %2400 = vst.msk [vmem:[#allocation2 + $0x158] sm:$0xff] %vm815_vm6, %v2316_v43  ;;  %v2314_v34 = vpop.permute.xlu0 %2313 }
 0x3b1   :  { %2399 = vst.msk [vmem:[#allocation2 + $0x150] sm:$0xff] %vm815_vm6, %v2314_v34  ;;  %1279 = vrot.lane.b32.xlu1 %v6669_v46, %s3559_s17  ;;  %v1249_v34 = vrot.slane %v3526_v42, 2  ;;  %v2689_v46 = vsel %vm162_vm0, %v2686_v53, %v2688_v31 }
 0x3b2   :  { %1277 = vrot.lane.b32.xlu0 %v6670_v7, %s3559_s17 }
 0x3b3   :  { %v2481_v54 = vpop.permute.xlu1 %2480 }
 0x3b4   :  { %2549 = vst.msk [vmem:[#allocation2 + $0x1d8] sm:$0xff] %vm949_vm7, %v2481_v54  ;;  %v2479_v32 = vpop.permute.xlu0 %2478  ;;  %v1248_v54 = vrot.slane %v3527_v55, 2 }
 0x3b5   :  { %2548 = vst.msk [vmem:[#allocation2 + $0x1d0] sm:$0xff] %vm949_vm7, %v2479_v32  ;;  %1883 = vrot.lane.b32.xlu1 %v5955_v62, %s3552_s11 }
 0x3b6   :  { %1881 = vrot.lane.b32.xlu0 %v5958_v50, %s3552_s11 }
 0x3b7   :  { %v2449_v45 = vpop.permute.xlu1 %2448 }
 0x3b8   :  { %2533 = vst.msk [vmem:[#allocation2 + $0x158] sm:$0xff] %vm949_vm7, %v2449_v45  ;;  %v2447_v63 = vpop.permute.xlu0 %2446  ;;  %v2687_v45 = vsel %vm162_vm0, %v2685_v17, %v2686_v53 }
 0x3b9   :  { %2532 = vst.msk [vmem:[#allocation2 + $0x150] sm:$0xff] %vm949_vm7, %v2447_v63  ;;  %2849 = vrot.lane.b32.xlu1 %v4963_v38, %s3559_s17 }
 0x3ba   :  { %2847 = vrot.lane.b32.xlu0 %v4952_v41, %s3559_s17 }
 0x3bb   :  { %v2611_v48 = vpop.permute.xlu1 %2610 }
 0x3bc   :  { %2679 = vst.msk [vmem:[#allocation2 + $0x1d8] sm:$0xff] %vm1080_vm8, %v2611_v48  ;;  %v2609_v57 = vpop.permute.xlu0 %2608  ;;  %v1250_v48 = vsel %vm372_vm2, %v1248_v54, %v1249_v34 }
 0x3bd   :  { %2678 = vst.msk [vmem:[#allocation2 + $0x1d0] sm:$0xff] %vm1080_vm8, %v2609_v57  ;;  %1851 = vrot.lane.b32.xlu1 %v5980_v5, %s3552_s11 }
 0x3be   :  { %1849 = vrot.lane.b32.xlu0 %v5984_v27, %s3552_s11  ;;  %s3561_s11 = smov 1  }
 0x3bf   :  { %v1174_v62 = vpop.permute.xlu1 %1173 }
 0x3c0   :  { %1243 = vst.msk [vmem:[#allocation2 + $0xd8] sm:$0xff] %vm1215_vm9, %v1174_v62  ;;  %v1172_v50 = vpop.permute.xlu0 %1171  ;;  %v2819_v62 = vrot.slane %v6247_v51, 2 }
 0x3c1   :  { %1242 = vst.msk [vmem:[#allocation2 + $0xd0] sm:$0xff] %vm1215_vm9, %v1172_v50  ;;  %2091 = vrot.lane.b32.xlu1 %v5994_v9, %s3553_s18  ;;  %v2821_v50 = vrot.slane %v3313_v6, 2 }
 0x3c2   :  { %2089 = vrot.lane.b32.xlu0 %v5997_v4, %s3553_s18 }
 0x3c3   :  { %v2579_v18 = vpop.permute.xlu1 %2578 }
 0x3c4   :  { %2663 = vst.msk [vmem:[#allocation2 + $0x158] sm:$0xff] %vm1080_vm8, %v2579_v18  ;;  %v2577_v49 = vpop.permute.xlu0 %2576  ;;  %v2818_v18 = vrot.slane %v6257_v24, 2 }
 0x3c5   :  { %2662 = vst.msk [vmem:[#allocation2 + $0x150] sm:$0xff] %vm1080_vm8, %v2577_v49  ;;  %2059 = vrot.lane.b32.xlu1 %v6020_v21, %s3553_s18 }
 0x3c6   :  { %2057 = vrot.lane.b32.xlu0 %v6023_v44, %s3553_s18 }
 0x3c7   :  { %v2745_v5 = vpop.permute.xlu1 %2744 }
 0x3c8   :  { %2813 = vst.msk [vmem:[#allocation2 + $0x1d8] sm:$0xff] %vm1215_vm9, %v2745_v5  ;;  %v2743_v27 = vpop.permute.xlu0 %2742 }
 0x3c9   :  { %2812 = vst.msk [vmem:[#allocation2 + $0x1d0] sm:$0xff] %vm1215_vm9, %v2743_v27  ;;  %2221 = vrot.lane.b32.xlu1 %v6090_v12, %s3554_s19  ;;  %v2822_v27 = vsel %vm372_vm2, %v2819_v62, %v2821_v50 }
 0x3ca   :  { %2219 = vrot.lane.b32.xlu0 %v6097_v19, %s3554_s19 }
 0x3cb   :  { %v1308_v9 = vpop.permute.xlu1 %1307 }
 0x3cc   :  { %1377 = vst.msk [vmem:[#allocation2 + $0xd8] sm:$0xff] %vm1349_vm10, %v1308_v9  ;;  %v1306_v4 = vpop.permute.xlu0 %1305 }
 0x3cd   :  { %1376 = vst.msk [vmem:[#allocation2 + $0xd0] sm:$0xff] %vm1349_vm10, %v1306_v4  ;;  %2189 = vrot.lane.b32.xlu1 %v4605_v10, %s3554_s19  ;;  %v2820_v4 = vsel %vm372_vm2, %v2818_v18, %v2819_v62 }
 0x3ce   :  { %2187 = vrot.lane.b32.xlu0 %v4600_v23, %s3554_s19  ;;  %s3562_s19 = smov 127  }
 0x3cf   :  { %v2713_v21 = vpop.permute.xlu1 %2712 }
 0x3d0   :  { %2797 = vst.msk [vmem:[#allocation2 + $0x158] sm:$0xff] %vm1215_vm9, %v2713_v21  ;;  %v2711_v44 = vpop.permute.xlu0 %2710 }
 0x3d1   :  { %2796 = vst.msk [vmem:[#allocation2 + $0x150] sm:$0xff] %vm1215_vm9, %v2711_v44  ;;  %2355 = vrot.lane.b32.xlu1 %v6125_v2, %s3555_s24 }
 0x3d2   :  { %2353 = vrot.lane.b32.xlu0 %v6130_v20, %s3555_s24 }
 0x3d3   :  { %v2878_v12 = vpop.permute.xlu1 %2877  ;;  %v1409_v19 = vld [vmem:[#allocation2 + $0xd8] sm:$0xff] }
 0x3d4   :  { %2946 = vst.msk [vmem:[#allocation2 + $0x1d8] sm:$0xff] %vm1349_vm10, %v2878_v12  ;;  %v2876_v10 = vpop.permute.xlu0 %2875  ;;  %v1408_v33 = vld [vmem:[#allocation2 + $0xd0] sm:$0xff] }
 0x3d5   :  { %2945 = vst.msk [vmem:[#allocation2 + $0x1d0] sm:$0xff] %vm1349_vm10, %v2876_v10  ;;  %2323 = vrot.lane.b32.xlu1 %v4943_v8, %s3555_s24  ;;  %v3445_v23 = vpack.c.bf16 %v1409_v19, %v1408_v33  ;;  %v6672_v12 = vld [vmem:[#allocation42_spill] sm:$0xff]  ;;  %v6321_v10 = vld [vmem:[%s6469_s1] sm:$0xf] }
 0x3d6   :  { %2321 = vrot.lane.b32.xlu0 %v4929_v37, %s3555_s24  ;;  %v80_v37 = vld [vmem:[%s6468_s0 + $0x1a8] sm:$0x3]  ;;  %3379 = vmatprep.mubr.msk.f32.mxu0 %vm1414_vm11, %v6321_v10  ;;  %s3563_s24 = smov [#allocation3]  }
 0x3d7   :  { %3447 = vmatprep.subr.msk.bf16.mxu0 %vm5392_vm12, %v3445_v23  ;;  %v1276_v52 = vpop.permute.xlu1 %1275  ;;  %v1117_v56 = vrot.slane %v80_v37, 1  ;;  %v1251_v7 = vrot.slane %v80_v37, 2  ;;  %3413 = vmatprep.mubr.msk.f32.mxu1 %vm1414_vm11, %v6321_v10  ;;  %s3212_s29 = sshll.u32 %s3563_s24, 4  ;;  %s3213_s29 = int_to_ptr.vmem [resolvable:$true] %s3212_s29 }
 0x3d8   :  { %1361 = vst.msk [vmem:[#allocation2 + $0x58] sm:$0xff] %vm1349_vm10, %v1276_v52  ;;  %v1274_v40 = vpop.permute.xlu0 %1273  ;;  %s3528_s30 = scalar_lea.vmem %s3213_s29, 256  ;;  %p3533_p1 = scmp.lt.s32.totalorder %s3213_s29, %s3213_s29 }
 0x3d9   :  { %1360 = vst.msk [vmem:[#allocation2 + $0x50] sm:$0xff] %vm1349_vm10, %v1274_v40  ;;  %2488 = vrot.lane.b32.xlu1 %v6153_v47, %s3556_s27  ;;  %v1118_v11 = vsel %vm162_vm0, %v1115_v58, %v1117_v56  ;;  %p3529_p0 = scmp.ne.s32.totalorder %s3213_s29, %s3528_s30  ;;  %p3534_p2 = scmp.lt.s32.totalorder %s3528_s30, %s3528_s30 }
 0x3da   :  { %2486 = vrot.lane.b32.xlu0 %v6156_v39, %s3556_s27 }
 0x3db   :  { %v1880_v8 = vpop.permute.xlu1 %1879  ;;  %v2978_v16 = vld [vmem:[#allocation2 + $0x1d8] sm:$0xff]  ;;  %p3535_p3 = por %p3534_p2, %p3533_p1 }
 0x3dc   :  { %1946 = vst.msk [vmem:[#allocation2 + $0x1e8] sm:$0xff] %vm339_vm3, %v1880_v8  ;;  %v1878_v30 = vpop.permute.xlu0 %1877  ;;  %v2977_v0 = vld [vmem:[#allocation2 + $0x1d0] sm:$0xff] }
 0x3dd   :  { %1945 = vst.msk [vmem:[#allocation2 + $0x1e0] sm:$0xff] %vm339_vm3, %v1878_v30  ;;  %2456 = vrot.lane.b32.xlu1 %v4963_v38, %s3556_s27  ;;  %v3493_v25 = vpack.c.bf16 %v2978_v16, %v2977_v0  ;;  %v1114_v38 = vrot.slane %v3527_v55, 1  ;;  %p3536_p4 = pnand %p3535_p3, %p3529_p0 }
 0x3de   :  { %2454 = vrot.lane.b32.xlu0 %v4952_v41, %s3556_s27 }
 0x3df   :  { %3495 = vmatprep.subr.msk.bf16.mxu1 %vm5392_vm12, %v3493_v25  ;;  %v2846_v59 = vpop.permute.xlu1 %2845  ;;  %v1393_v41 = vld [vmem:[#allocation2 + $0x58] sm:$0xff]  ;;  %v1116_v22 = vsel %vm162_vm0, %v1114_v38, %v1115_v58  ;;  %vm3176_vm0 = vcmask 11272  }
 0x3e0   :  { %2930 = vst.msk [vmem:[#allocation2 + $0x158] sm:$0xff] %vm1349_vm10, %v2846_v59  ;;  %v2844_v2 = vpop.permute.xlu0 %2843  ;;  %v1392_v35 = vld [vmem:[#allocation2 + $0x50] sm:$0xff] }
 0x3e1   :  { %2929 = vst.msk [vmem:[#allocation2 + $0x150] sm:$0xff] %vm1349_vm10, %v2844_v2  ;;  %2618 = vrot.lane.b32.xlu1 %v6247_v51, %s3557_s12  ;;  %v3448_v20 = vpack.c.bf16 %v1393_v41, %v1392_v35 }
 0x3e2   :  { %2616 = vrot.lane.b32.xlu0 %v6257_v24, %s3557_s12 }
 0x3e3   :  { %3450 = vmatpush3.bf16.xpose.msk.msra.mxu0 %vm5392_vm12, %v3448_v20  ;;  %v1848_v36 = vpop.permute.xlu1 %1847 }
 0x3e4   :  { %1930 = vst.msk [vmem:[#allocation2 + $0x168] sm:$0xff] %vm339_vm3, %v1848_v36  ;;  %v1846_v61 = vpop.permute.xlu0 %1845 }
 0x3e5   :  { %1929 = vst.msk [vmem:[#allocation2 + $0x160] sm:$0xff] %vm339_vm3, %v1846_v61  ;;  %1181 = vrot.lane.b32.xlu1 %v1118_v11, %s3558_s14 }
 0x3e6   :  { %1179 = vrot.lane.b32.xlu0 %v1116_v22, %s3558_s14 }
 0x3e7   :  { %v2088_v47 = vpop.permute.xlu1 %2087  ;;  %v2962_v60 = vld [vmem:[#allocation2 + $0x158] sm:$0xff] }
 0x3e8   :  { %2154 = vst.msk [vmem:[#allocation2 + $0x1e8] sm:$0xff] %vm549_vm4, %v2088_v47  ;;  %v2086_v39 = vpop.permute.xlu0 %2085  ;;  %v2961_v14 = vld [vmem:[#allocation2 + $0x150] sm:$0xff] }
 0x3e9   :  { %2153 = vst.msk [vmem:[#allocation2 + $0x1e0] sm:$0xff] %vm549_vm4, %v2086_v39  ;;  %2586 = vrot.lane.b32.xlu1 %v4692_v15, %s3557_s12  ;;  %v3496_v43 = vpack.c.bf16 %v2962_v60, %v2961_v14 }
 0x3ea   :  { %2584 = vrot.lane.b32.xlu0 %v4674_v1, %s3557_s12  ;;  %v1252_v1 = vsel %vm372_vm2, %v1249_v34, %v1251_v7 }
 0x3eb   :  { %3498 = vmatpush3.bf16.xpose.msk.msra.mxu1 %vm5392_vm12, %v3496_v43  ;;  %v2056_v32 = vpop.permute.xlu1 %2055 }
 0x3ec   :  { %2138 = vst.msk [vmem:[#allocation2 + $0x168] sm:$0xff] %vm549_vm4, %v2056_v32  ;;  %v2054_v63 = vpop.permute.xlu0 %2053 }
 0x3ed   :  { %2137 = vst.msk [vmem:[#allocation2 + $0x160] sm:$0xff] %vm549_vm4, %v2054_v63  ;;  %2752 = vrot.lane.b32.xlu1 %v2689_v46, %s3558_s14 }
 0x3ee   :  { %2750 = vrot.lane.b32.xlu0 %v2687_v45, %s3558_s14 }
 0x3ef   :  { %v2218_v15 = vpop.permute.xlu1 %2217 }
 0x3f0   :  { %2284 = vst.msk [vmem:[#allocation2 + $0x1e8] sm:$0xff] %vm680_vm5, %v2218_v15  ;;  %v2216_v57 = vpop.permute.xlu0 %2215 }
 0x3f1   :  { %2283 = vst.msk [vmem:[#allocation2 + $0x1e0] sm:$0xff] %vm680_vm5, %v2216_v57  ;;  %1315 = vrot.lane.b32.xlu1 %v1252_v1, %s3559_s17 }
 0x3f2   :  { %1313 = vrot.lane.b32.xlu0 %v1250_v48, %s3559_s17 }
 0x3f3   :  { %v2186_v49 = vpop.permute.xlu1 %2185 }
 0x3f4   :  { %2268 = vst.msk [vmem:[#allocation2 + $0x168] sm:$0xff] %vm680_vm5, %v2186_v49  ;;  %v2184_v5 = vpop.permute.xlu0 %2183 }
 0x3f5   :  { %2267 = vst.msk [vmem:[#allocation2 + $0x160] sm:$0xff] %vm680_vm5, %v2184_v5  ;;  %2720 = vrot.lane.b32.xlu1 %v5010_v13, %s3558_s14 }
 0x3f6   :  { %2718 = vrot.lane.b32.xlu0 %v4992_v26, %s3558_s14  ;;  %v6671_v26 = vld [vmem:[#allocation41_spill] sm:$0xff] }
 0x3f7   :  { %v2352_v9 = vpop.permute.xlu1 %2351 }
 0x3f8   :  { %2418 = vst.msk [vmem:[#allocation2 + $0x1e8] sm:$0xff] %vm815_vm6, %v2352_v9  ;;  %v2350_v21 = vpop.permute.xlu0 %2349 }
 0x3f9   :  { %2417 = vst.msk [vmem:[#allocation2 + $0x1e0] sm:$0xff] %vm815_vm6, %v2350_v21  ;;  %2885 = vrot.lane.b32.xlu1 %v2822_v27, %s3559_s17 }
 0x3fa   :  { %2883 = vrot.lane.b32.xlu0 %v2820_v4, %s3559_s17 }
 0x3fb   :  { %v2320_v44 = vpop.permute.xlu1 %2319 }
 0x3fc   :  { %2402 = vst.msk [vmem:[#allocation2 + $0x168] sm:$0xff] %vm815_vm6, %v2320_v44  ;;  %v2318_v13 = vpop.permute.xlu0 %2317 }
 0x3fd   :  { %2401 = vst.msk [vmem:[#allocation2 + $0x160] sm:$0xff] %vm815_vm6, %v2318_v13  ;;  %1283 = vrot.lane.b32.xlu1 %v6671_v26, %s3559_s17 }
 0x3fe   :  { %1281 = vrot.lane.b32.xlu0 %v6672_v12, %s3559_s17 }
 0x3ff   :  { %v2485_v19 = vpop.permute.xlu1 %2484 }
 0x400   :  { %2551 = vst.msk [vmem:[#allocation2 + $0x1e8] sm:$0xff] %vm949_vm7, %v2485_v19  ;;  %v2483_v33 = vpop.permute.xlu0 %2482 }
 0x401   :  { %2550 = vst.msk [vmem:[#allocation2 + $0x1e0] sm:$0xff] %vm949_vm7, %v2483_v33  ;;  %2853 = vrot.lane.b32.xlu1 %v5036_v3, %s3559_s17 }
 0x402   :  { %2851 = vrot.lane.b32.xlu0 %v5021_v28, %s3559_s17 }
 0x403   :  { %v2453_v23 = vpop.permute.xlu1 %2452 }
 0x404   :  { %2535 = vst.msk [vmem:[#allocation2 + $0x168] sm:$0xff] %vm949_vm7, %v2453_v23  ;;  %v2451_v52 = vpop.permute.xlu0 %2450 }
 0x405   :  { %2534 = vst.msk [vmem:[#allocation2 + $0x160] sm:$0xff] %vm949_vm7, %v2451_v52 }
 0x407   :  { %v2615_v40 = vpop.permute.xlu1 %2614 }
 0x408   :  { %2681 = vst.msk [vmem:[#allocation2 + $0x1e8] sm:$0xff] %vm1080_vm8, %v2615_v40  ;;  %v2613_v8 = vpop.permute.xlu0 %2612 }
 0x409   :  { %2680 = vst.msk [vmem:[#allocation2 + $0x1e0] sm:$0xff] %vm1080_vm8, %v2613_v8 }
 0x40b   :  { %v1178_v16 = vpop.permute.xlu1 %1177 }
 0x40c   :  { %1245 = vst.msk [vmem:[#allocation2 + $0xe8] sm:$0xff] %vm1215_vm9, %v1178_v16  ;;  %v1176_v37 = vpop.permute.xlu0 %1175 }
 0x40d   :  { %1244 = vst.msk [vmem:[#allocation2 + $0xe0] sm:$0xff] %vm1215_vm9, %v1176_v37 }
 0x40f   :  { %v2583_v3 = vpop.permute.xlu1 %2582 }
 0x410   :  { %2665 = vst.msk [vmem:[#allocation2 + $0x168] sm:$0xff] %vm1080_vm8, %v2583_v3  ;;  %v2581_v28 = vpop.permute.xlu0 %2580 }
 0x411   :  { %2664 = vst.msk [vmem:[#allocation2 + $0x160] sm:$0xff] %vm1080_vm8, %v2581_v28 }
 0x413   :  { %v2749_v30 = vpop.permute.xlu1 %2748 }
 0x414   :  { %2815 = vst.msk [vmem:[#allocation2 + $0x1e8] sm:$0xff] %vm1215_vm9, %v2749_v30  ;;  %v2747_v0 = vpop.permute.xlu0 %2746 }
 0x415   :  { %2814 = vst.msk [vmem:[#allocation2 + $0x1e0] sm:$0xff] %vm1215_vm9, %v2747_v0 }
 0x417   :  { %v1312_v25 = vpop.permute.xlu1 %1311 }
 0x418   :  { %1379 = vst.msk [vmem:[#allocation2 + $0xe8] sm:$0xff] %vm1349_vm10, %v1312_v25  ;;  %v1310_v42 = vpop.permute.xlu0 %1309 }
 0x419   :  { %1378 = vst.msk [vmem:[#allocation2 + $0xe0] sm:$0xff] %vm1349_vm10, %v1310_v42 }
 0x41b   :  { %v2717_v58 = vpop.permute.xlu1 %2716 }
 0x41c   :  { %2799 = vst.msk [vmem:[#allocation2 + $0x168] sm:$0xff] %vm1215_vm9, %v2717_v58  ;;  %v2715_v51 = vpop.permute.xlu0 %2714 }
 0x41d   :  { %2798 = vst.msk [vmem:[#allocation2 + $0x160] sm:$0xff] %vm1215_vm9, %v2715_v51 }
 0x41f   :  { %v2882_v56 = vpop.permute.xlu1 %2881  ;;  %v1411_v55 = vld [vmem:[#allocation2 + $0xe8] sm:$0xff] }
 0x420   :  { %2948 = vst.msk [vmem:[#allocation2 + $0x1e8] sm:$0xff] %vm1349_vm10, %v2882_v56  ;;  %v2880_v38 = vpop.permute.xlu0 %2879  ;;  %v1410_v59 = vld [vmem:[#allocation2 + $0xe0] sm:$0xff] }
 0x421   :  { %2947 = vst.msk [vmem:[#allocation2 + $0x1e0] sm:$0xff] %vm1349_vm10, %v2880_v38  ;;  %v3451_v24 = vpack.c.bf16 %v1411_v55, %v1410_v59 }
 0x423   :  { %3453 = vmatprep.subr.msk.bf16.mxu0 %vm5392_vm12, %v3451_v24  ;;  %v1280_v41 = vpop.permute.xlu1 %1279 }
 0x424   :  { %1363 = vst.msk [vmem:[#allocation2 + $0x68] sm:$0xff] %vm1349_vm10, %v1280_v41  ;;  %v1278_v2 = vpop.permute.xlu0 %1277 }
 0x425   :  { %1362 = vst.msk [vmem:[#allocation2 + $0x60] sm:$0xff] %vm1349_vm10, %v1278_v2 }
 0x427   :  { %v1884_v35 = vpop.permute.xlu1 %1883  ;;  %v2980_v20 = vld [vmem:[#allocation2 + $0x1e8] sm:$0xff] }
 0x428   :  { %1948 = vst.msk [vmem:[#allocation2 + $0x1f8] sm:$0xff] %vm339_vm3, %v1884_v35  ;;  %v1882_v11 = vpop.permute.xlu0 %1881  ;;  %v2979_v36 = vld [vmem:[#allocation2 + $0x1e0] sm:$0xff] }
 0x429   :  { %1947 = vst.msk [vmem:[#allocation2 + $0x1f0] sm:$0xff] %vm339_vm3, %v1882_v11  ;;  %v3499_v22 = vpack.c.bf16 %v2980_v20, %v2979_v36 }
 0x42b   :  { %3501 = vmatprep.subr.msk.bf16.mxu1 %vm5392_vm12, %v3499_v22  ;;  %v2850_v6 = vpop.permute.xlu1 %2849  ;;  %v1395_v61 = vld [vmem:[#allocation2 + $0x68] sm:$0xff] }
 0x42c   :  { %2932 = vst.msk [vmem:[#allocation2 + $0x168] sm:$0xff] %vm1349_vm10, %v2850_v6  ;;  %v2848_v53 = vpop.permute.xlu0 %2847  ;;  %v1394_v31 = vld [vmem:[#allocation2 + $0x60] sm:$0xff] }
 0x42d   :  { %2931 = vst.msk [vmem:[#allocation2 + $0x160] sm:$0xff] %vm1349_vm10, %v2848_v53  ;;  %v3454_v17 = vpack.c.bf16 %v1395_v61, %v1394_v31 }
 0x42f   :  { %3456 = vmatpush3.bf16.xpose.msk.msra.mxu0 %vm5392_vm12, %v3454_v17  ;;  %v1852_v47 = vpop.permute.xlu1 %1851 }
 0x430   :  { %1932 = vst.msk [vmem:[#allocation2 + $0x178] sm:$0xff] %vm339_vm3, %v1852_v47  ;;  %v1850_v60 = vpop.permute.xlu0 %1849 }
 0x431   :  { %1931 = vst.msk [vmem:[#allocation2 + $0x170] sm:$0xff] %vm339_vm3, %v1850_v60 }
 0x433   :  { %v2092_v39 = vpop.permute.xlu1 %2091  ;;  %v2964_v14 = vld [vmem:[#allocation2 + $0x168] sm:$0xff] }
 0x434   :  { %2156 = vst.msk [vmem:[#allocation2 + $0x1f8] sm:$0xff] %vm549_vm4, %v2092_v39  ;;  %v2090_v43 = vpop.permute.xlu0 %2089  ;;  %v2963_v34 = vld [vmem:[#allocation2 + $0x160] sm:$0xff] }
 0x435   :  { %2155 = vst.msk [vmem:[#allocation2 + $0x1f0] sm:$0xff] %vm549_vm4, %v2090_v43  ;;  %v3502_v46 = vpack.c.bf16 %v2964_v14, %v2963_v34 }
 0x437   :  { %3504 = vmatpush3.bf16.xpose.msk.msra.mxu1 %vm5392_vm12, %v3502_v46  ;;  %v2060_v7 = vpop.permute.xlu1 %2059 }
 0x438   :  { %2140 = vst.msk [vmem:[#allocation2 + $0x178] sm:$0xff] %vm549_vm4, %v2060_v7  ;;  %v2058_v54 = vpop.permute.xlu0 %2057 }
 0x439   :  { %2139 = vst.msk [vmem:[#allocation2 + $0x170] sm:$0xff] %vm549_vm4, %v2058_v54 }
 0x43b   :  { %v2222_v32 = vpop.permute.xlu1 %2221 }
 0x43c   :  { %2286 = vst.msk [vmem:[#allocation2 + $0x1f8] sm:$0xff] %vm680_vm5, %v2222_v32  ;;  %v2220_v45 = vpop.permute.xlu0 %2219  ;;  %v3560_v32 = vmov 0.0  }
 0x43d   :  { %2285 = vst.msk [vmem:[#allocation2 + $0x1f0] sm:$0xff] %vm680_vm5, %v2220_v45 }
 0x43e   :  { %25 = vst.msk [vmem:[%s6473_s5] sm:$0xf] %vm24_vm14, %v3560_v32 }
 0x43f   :  { %v2190_v63 = vpop.permute.xlu1 %2189 }
 0x440   :  { %2270 = vst.msk [vmem:[#allocation2 + $0x178] sm:$0xff] %vm680_vm5, %v2190_v63  ;;  %v2188_v1 = vpop.permute.xlu0 %2187 }
 0x441   :  { %2269 = vst.msk [vmem:[#allocation2 + $0x170] sm:$0xff] %vm680_vm5, %v2188_v1 }
 0x443   :  { %v2356_v15 = vpop.permute.xlu1 %2355 }
 0x444   :  { %2420 = vst.msk [vmem:[#allocation2 + $0x1f8] sm:$0xff] %vm815_vm6, %v2356_v15  ;;  %v2354_v48 = vpop.permute.xlu0 %2353 }
 0x445   :  { %2419 = vst.msk [vmem:[#allocation2 + $0x1f0] sm:$0xff] %vm815_vm6, %v2354_v48  ;;  %v3170_v1 = vld [vmem:[%s6473_s5] sm:$0xf] }
 0x447   :  { %v2324_v57 = vpop.permute.xlu1 %2323 }
 0x448   :  { %2404 = vst.msk [vmem:[#allocation2 + $0x178] sm:$0xff] %vm815_vm6, %v2324_v57  ;;  %v2322_v62 = vpop.permute.xlu0 %2321 }
 0x449   :  { %2403 = vst.msk [vmem:[#allocation2 + $0x170] sm:$0xff] %vm815_vm6, %v2322_v62 }
 0x44b   :  { %v2489_v50 = vpop.permute.xlu1 %2488 }
 0x44c   :  { %2553 = vst.msk [vmem:[#allocation2 + $0x1f8] sm:$0xff] %vm949_vm7, %v2489_v50  ;;  %v2487_v18 = vpop.permute.xlu0 %2486 }
 0x44d   :  { %2552 = vst.msk [vmem:[#allocation2 + $0x1f0] sm:$0xff] %vm949_vm7, %v2487_v18 }
 0x44f   :  { %v2457_v49 = vpop.permute.xlu1 %2456 }
 0x450   :  { %2537 = vst.msk [vmem:[#allocation2 + $0x178] sm:$0xff] %vm949_vm7, %v2457_v49  ;;  %v2455_v5 = vpop.permute.xlu0 %2454 }
 0x451   :  { %2536 = vst.msk [vmem:[#allocation2 + $0x170] sm:$0xff] %vm949_vm7, %v2455_v5 }
 0x453   :  { %v2619_v27 = vpop.permute.xlu1 %2618 }
 0x454   :  { %2683 = vst.msk [vmem:[#allocation2 + $0x1f8] sm:$0xff] %vm1080_vm8, %v2619_v27  ;;  %v2617_v9 = vpop.permute.xlu0 %2616 }
 0x455   :  { %2682 = vst.msk [vmem:[#allocation2 + $0x1f0] sm:$0xff] %vm1080_vm8, %v2617_v9 }
 0x457   :  { %v1182_v4 = vpop.permute.xlu1 %1181 }
 0x458   :  { %1247 = vst.msk [vmem:[#allocation2 + $0xf8] sm:$0xff] %vm1215_vm9, %v1182_v4  ;;  %v1180_v21 = vpop.permute.xlu0 %1179 }
 0x459   :  { %1246 = vst.msk [vmem:[#allocation2 + $0xf0] sm:$0xff] %vm1215_vm9, %v1180_v21 }
 0x45b   :  { %v2587_v44 = vpop.permute.xlu1 %2586 }
 0x45c   :  { %2667 = vst.msk [vmem:[#allocation2 + $0x178] sm:$0xff] %vm1080_vm8, %v2587_v44  ;;  %v2585_v13 = vpop.permute.xlu0 %2584 }
 0x45d   :  { %2666 = vst.msk [vmem:[#allocation2 + $0x170] sm:$0xff] %vm1080_vm8, %v2585_v13 }
 0x45f   :  { %v2753_v26 = vpop.permute.xlu1 %2752 }
 0x460   :  { %2817 = vst.msk [vmem:[#allocation2 + $0x1f8] sm:$0xff] %vm1215_vm9, %v2753_v26  ;;  %v2751_v12 = vpop.permute.xlu0 %2750 }
 0x461   :  { %2816 = vst.msk [vmem:[#allocation2 + $0x1f0] sm:$0xff] %vm1215_vm9, %v2751_v12 }
 0x463   :  { %v1316_v19 = vpop.permute.xlu1 %1315 }
 0x464   :  { %1381 = vst.msk [vmem:[#allocation2 + $0xf8] sm:$0xff] %vm1349_vm10, %v1316_v19  ;;  %v1314_v33 = vpop.permute.xlu0 %1313 }
 0x465   :  { %1380 = vst.msk [vmem:[#allocation2 + $0xf0] sm:$0xff] %vm1349_vm10, %v1314_v33 }
 0x467   :  { %v2721_v23 = vpop.permute.xlu1 %2720 }
 0x468   :  { %2801 = vst.msk [vmem:[#allocation2 + $0x178] sm:$0xff] %vm1215_vm9, %v2721_v23  ;;  %v2719_v52 = vpop.permute.xlu0 %2718 }
 0x469   :  { %2800 = vst.msk [vmem:[#allocation2 + $0x170] sm:$0xff] %vm1215_vm9, %v2719_v52 }
 0x46b   :  { %v2886_v40 = vpop.permute.xlu1 %2885  ;;  %v1413_v8 = vld [vmem:[#allocation2 + $0xf8] sm:$0xff] }
 0x46c   :  { %2950 = vst.msk [vmem:[#allocation2 + $0x1f8] sm:$0xff] %vm1349_vm10, %v2886_v40  ;;  %v2884_v16 = vpop.permute.xlu0 %2883  ;;  %v1412_v37 = vld [vmem:[#allocation2 + $0xf0] sm:$0xff] }
 0x46d   :  { %2949 = vst.msk [vmem:[#allocation2 + $0x1f0] sm:$0xff] %vm1349_vm10, %v2884_v16  ;;  %v3457_v3 = vpack.c.bf16 %v1413_v8, %v1412_v37 }
 0x46f   :  { %3459 = vmatprep.subr.msk.bf16.mxu0 %vm5392_vm12, %v3457_v3  ;;  %v1284_v28 = vpop.permute.xlu1 %1283 }
 0x470   :  { %1365 = vst.msk [vmem:[#allocation2 + $0x78] sm:$0xff] %vm1349_vm10, %v1284_v28  ;;  %v1282_v30 = vpop.permute.xlu0 %1281 }
 0x471   :  { %1364 = vst.msk [vmem:[#allocation2 + $0x70] sm:$0xff] %vm1349_vm10, %v1282_v30 }
 0x473   :  { %v2854_v0 = vpop.permute.xlu1 %2853  ;;  %v2982_v25 = vld [vmem:[#allocation2 + $0x1f8] sm:$0xff] }
 0x474   :  { %2934 = vst.msk [vmem:[#allocation2 + $0x178] sm:$0xff] %vm1349_vm10, %v2854_v0  ;;  %v2852_v42 = vpop.permute.xlu0 %2851  ;;  %v2981_v58 = vld [vmem:[#allocation2 + $0x1f0] sm:$0xff] }
 0x475   :  { %2933 = vst.msk [vmem:[#allocation2 + $0x170] sm:$0xff] %vm1349_vm10, %v2852_v42  ;;  %v3505_v51 = vpack.c.bf16 %v2982_v25, %v2981_v58 }
 0x477   :  { %3507 = vmatprep.subr.msk.bf16.mxu1 %vm5392_vm12, %v3505_v51  ;;  %v1397_v56 = vld [vmem:[#allocation2 + $0x78] sm:$0xff] }
 0x478   :  { %v1396_v55 = vld [vmem:[#allocation2 + $0x70] sm:$0xff] }
 0x479   :  { %v3460_v38 = vpack.c.bf16 %v1397_v56, %v1396_v55 }
 0x47b   :  { %3462 = vmatpush3.bf16.xpose.msk.msra.mxu0 %vm5392_vm12, %v3460_v38  ;;  %v2966_v59 = vld [vmem:[#allocation2 + $0x178] sm:$0xff] }
 0x47c   :  { %v2965_v24 = vld [vmem:[#allocation2 + $0x170] sm:$0xff] }
 0x47d   :  { %v3508_v41 = vpack.c.bf16 %v2966_v59, %v2965_v24 }
 0x47f   :  { %3510 = vmatpush3.bf16.xpose.msk.msra.mxu1 %vm5392_vm12, %v3508_v41 }
 0x482   :  { %3380 = vmatmul.mubr.msk.f32.vlgmr.msra.gmra.mrb[0].mxu0 %vm1414_vm11, %v6321_v10 }
 0x486   :  { %3414 = vmatmul.mubr.msk.f32.vlgmr.msra.gmra.mrb[0].mxu1 %vm1414_vm11, %v6321_v10 }
 0x555   :  { %v1580_v2 = vpop.f32.mrb[0].mxu0 }
 0x556   :  { %v1591_v35 = vsel %vm1590_vm13, %v1580_v2, 0.0  ;;  %v1597_v20 = vmul.f32 %v1580_v2, %v1580_v2  ;;  %v1582_v11 = vpop.f32.mrb[1].mxu0 }
 0x557   :  { %v1587_v36 = vcombine.low %v1580_v2, %v1582_v11  ;;  %v1592_v22 = vsel %vm1590_vm13, %v1582_v11, 0.0  ;;  %v1598_v6 = vmul.f32 %v1582_v11, %v1582_v11 }
 0x558   :  { %v1593_v61 = vadd.f32 %v1592_v22, %v1591_v35  ;;  %v1599_v29 = vsel %vm1590_vm13, %v1597_v20, 0.0 }
 0x559   :  { %1589 = vst [vmem:[#allocation3] sm:$0xff] %v1587_v36  ;;  %v1600_v53 = vsel %vm1590_vm13, %v1598_v6, 0.0  ;;  %v3145_v31 = vpop.f32.mrb[0].mxu1 }
 0x55a   :  { %v3156_v17 = vsel %vm1590_vm13, %v3145_v31, 0.0  ;;  %v3162_v10 = vmul.f32 %v3145_v31, %v3145_v31  ;;  %v3147_v47 = vpop.f32.mrb[1].mxu1  ;;  %1594 = vadd.xlane.f32.xlu0 %v1593_v61  ;;  %v1601_v60 = vadd.f32 %v1600_v53, %v1599_v29 }
 0x55b   :  { %v3152_v39 = vcombine.low %v3145_v31, %v3147_v47  ;;  %v3157_v14 = vsel %vm1590_vm13, %v3147_v47, 0.0  ;;  %v3163_v43 = vmul.f32 %v3147_v47, %v3147_v47 }
 0x55c   :  { %v3158_v34 = vadd.f32 %v3157_v14, %v3156_v17  ;;  %v3164_v46 = vsel %vm1590_vm13, %v3162_v10, 0.0 }
 0x55d   :  { %3155 = vst [vmem:[#allocation3 + $0x8] sm:$0xff] %v3152_v39  ;;  %v3165_v7 = vsel %vm1590_vm13, %v3163_v43, 0.0 }
 0x55e   :  { %3159 = vadd.xlane.f32.xlu1 %v3158_v34  ;;  %1602 = vadd.xlane.f32.xlu0 %v1601_v60  ;;  %v3166_v54 = vadd.f32 %v3165_v7, %v3164_v46 }
 0x562   :  { %3167 = vadd.xlane.f32.xlu0 %v3166_v54 }
 0x5e7   :  { %v1595_v45 = vpop.xlane.xlu0 %1594 }
 0x5eb   :  { %v3160_v63 = vpop.xlane.xlu1 %3159  ;;  %v1603_v48 = vpop.xlane.xlu0 %1602 }
 0x5ec   :  { %v3161_v15 = vadd.f32 %v3160_v63, %v1595_v45 }
 0x5ee   :  { %v3171_v57 = vadd.f32 %v3170_v1, %v3161_v15 }
 0x5ef   :  { %v3168_v62 = vpop.xlane.xlu0 %3167 }
 0x5f0   :  { %3173 = vst.msk [vmem:[%s6473_s5] sm:$0xf] %vm3172_vm15, %v3171_v57  ;;  %v3169_v50 = vadd.f32 %v3168_v62, %v1603_v48 }
 0x5f7   :  { %v3174_v18 = vld [vmem:[%s6473_s5] sm:$0xf] }
 0x5f8   :  { %v3175_v49 = vadd.f32 %v3174_v18, %v3169_v50 }
 0x5fa   :  { %3177 = vst.msk [vmem:[%s6473_s5] sm:$0xf] %vm3176_vm0, %v3175_v49 }
 0x601   :  { %v3181_v5 = vld [vmem:[%s6473_s5] sm:$0xf] }
 0x602   :  { %v3182_v27 = vmul.f32 0.001953125, %v3181_v5 }
 0x604   :  { %v3183_v9 = vmul.f32 %v3182_v27, %v3182_v27 }
 0x606   :  { %3185 = vrot.lane.b32.xlu1 %v3183_v9, %s3561_s11 }
 0x678   :  { %v3186_v4 = vpop.permute.xlu1 %3185 }
 0x679   :  { %v3188_v21 = vsub.f32 %v3182_v27, %v3186_v4 }
 0x67b   :  { %v3189_v44 = vmax.f32 %v3188_v21, 0.0 }
 0x67d   :  { %v3191_v13 = vadd.f32 1e-05, %v3189_v44 }
 0x67f   :  { %3524 = vrsqrt.f32 %v3191_v13 }
 0x689   :  { %v3525_v26 = vpop.eup %3524 }
 0x68a   :  { %3194 = vrot.lane.b32.xlu0 %v3525_v26, %s3562_s19 }
 0x68b   :  { %3539 = shalt.err (!%p3536_p4)
}
 0x68c   :  { %s3540_s8 = scalar_lea.hbm %s6472_s4, 256 }
 0x68d   :  { %p3541_p5 = scmp.ne.s32.totalorder %s6472_s4, %s3540_s8  ;;  %p3544_p6 = scmp.lt.u32.totalorder %s3540_s8, %s6472_s4 }
 0x68f   :  { %p3546_p7 = pnand %p3544_p6, %p3541_p5 }
 0x691   :  { %3549 = shalt.err (!%p3546_p7)
}
 0x692   :  { %s3564_s0 = smov 128   ;;  %v3190_v12 = vld [vmem:[%s6470_s2] sm:$0xf] }
 0x693   :  { %3218 = dma.vmem_to_hbm [thread:$0]  %s3213_s29, 256, %s6472_s4, [#allocation4], %s3564_s0, %s3564_s0, %s3553_s18  }
 0x694   :  { %v3199_v23 = vld [vmem:[%s6471_s3] sm:$0xf] }
 0x6fc   :  { %v3195_v19 = vpop.permute.xlu0 %3194 }
 0x6fd   :  { %v3197_v33 = vmul.f32 %v3195_v19, %v3190_v12 }
 0x6ff   :  { %v3200_v52 = vmul.f32 %v3197_v33, %v3182_v27  ;;  %3198 = vst.msk [vmem:[%s6473_s5] sm:$0xf] %vm3172_vm15, %v3197_v33 }
 0x701   :  { %v3201_v40 = vsub.f32 %v3199_v23, %v3200_v52 }
 0x703   :  { %3203 = vrot.lane.b32.xlu1 %v3201_v40, %s3561_s11 }
 0x775   :  { %v3204_v8 = vpop.permute.xlu1 %3203 }
 0x776   :  { %3206 = vst.msk [vmem:[%s6473_s5] sm:$0xf] %vm3176_vm0, %v3204_v8 }
 0x777   :  { %3550 = dma.done.wait [#allocation4], 256  }
 0x778   :  { %3551 = vsyncadd [#allocation4], 4294967040 }
 0x779   :  { %3226 = vsyncpa [#allocation4], 1 }

</bundles_post_ra>
